<compile_context>
chip_gen: v7x
topology: tpu7x:2x2x1
jax: 0.10.0
libtpu: 0.0.40
codegen_flags: <defaults>
</compile_context>

<pallas_src>
import numpy as np
import jax
import jax.numpy as jnp
from jax import lax
from jax.experimental import pallas as pl
from jax.experimental.pallas import tpu as pltpu  # noqa: F401  (TPU backend)

# ---------------------------------------------------------------------------
# Hyper-parameters (small shapes consistent with the module)
# ---------------------------------------------------------------------------
FEW = 3            # few_shots (odd -> kerns = FEW)
DIM = 32           # embed_dim
BATCH = 2
KERNS = FEW if FEW % 2 != 0 else FEW - 1
PAD = KERNS // 2
C1, C2 = 32, 64    # conv1 / conv2 output channels
S = 2 * FEW        # support sequence length (few * 2)
Q = 2              # query sequence length
H = DIM            # LSTM hidden size
G = 4 * H          # LSTM gate width (i|f|g|o)


# ---------------------------------------------------------------------------
# Single fused kernel: co-attention/proj -> BiLSTM -> aggregation ->
#                      pair attention -> conv stack -> matching score
# ---------------------------------------------------------------------------
def fused_kernel(sup_ref, qry_ref,
                 wp_ref, bp_ref,
                 wih_ref, whh_ref, blstm_ref,
                 ww_ref, bw_ref, wu_ref, bu_ref,
                 w1_ref, b1_ref, w2_ref, b2_ref, wf_ref, bf_ref,
                 scores_ref, rel_ref):
    B = BATCH
    f32 = jnp.float32

    sup = sup_ref[...]                       # [S, D]
    qry = qry_ref[...]                       # [B*Q, D]
    wp = wp_ref[...]                         # [4D, D]
    bp = bp_ref[...]                         # [1, D]
    wih = wih_ref[...]                       # [D, 2G]   (fwd gates | bwd gates)
    whh = whh_ref[...]                       # [H, 2G]
    b_lstm = blstm_ref[...]                  # [1, 2G]

    # ---------------- stage 1: co-attention + fuse + single proj matmul ----
    fused_rows = []
    for b in range(B):
        q_b = qry[b * Q:(b + 1) * Q, :]                                     # [Q, D]
        att = jnp.dot(sup, q_b.T, preferred_element_type=f32)               # [S, Q]
        sup_ = jnp.dot(jax.nn.softmax(att, axis=-1), q_b,
                       preferred_element_type=f32)                          # [S, D]
        q_ = jnp.dot(jax.nn.softmax(att.T, axis=-1), sup,
                     preferred_element_type=f32)                            # [Q, D]
        fused_rows.append(jnp.concatenate(
            [sup, sup_, jnp.abs(sup - sup_), sup * sup_], axis=-1))         # [S, 4D]
        fused_rows.append(jnp.concatenate(
            [q_b, q_, jnp.abs(q_b - q_), q_b * q_], axis=-1))               # [Q, 4D]
    fused = jnp.concatenate(fused_rows, axis=0)                             # [B*(S+Q), 4D]
    y = jnp.dot(fused, wp, preferred_element_type=f32) + bp                 # [B*(S+Q), D]
    y = jnp.where(y > 0, y, 0.01 * y)                                       # leaky_relu

    # ---------------- stage 2: BiLSTM (hoisted input matmul, stacked chains)
    # All input-to-hidden contributions (both directions) in one matmul.
    xwb = jnp.dot(y, wih, preferred_element_type=f32) + b_lstm              # [B*(S+Q), 2G]

    # rows 0..B-1 are forward chains, rows B..2B-1 are backward chains.
    fwd_mask = jnp.concatenate(
        [jnp.ones((B, 1), f32), jnp.zeros((B, 1), f32)], axis=0)            # [2B, 1]

    def run_chains(starts, T):
        """Run 2B LSTM chains (fwd+bwd per batch) for T steps, fully unrolled."""
        nch = 2 * B
        h = jnp.zeros((nch, H), f32)
        c = jnp.zeros((nch, H), f32)
        fwd_out = [None] * T
        bwd_out = [None] * T
        for k in range(T):
            xin_rows = []
            for b in range(B):                       # forward chains read time k
                r = starts[b] + k
                xin_rows.append(xwb[r:r + 1, 0:G])
            for b in range(B):                       # backward chains read time T-1-k
                r = starts[b] + (T - 1 - k)
                xin_rows.append(xwb[r:r + 1, G:2 * G])
            xin = jnp.concatenate(xin_rows, axis=0)                         # [2B, G]

            # single recurrent matmul for all chains; pick fwd/bwd half per row
            rec_full = jnp.dot(h, whh, preferred_element_type=f32)          # [2B, 2G]
            rec = (rec_full[:, 0:G] * fwd_mask
                   + rec_full[:, G:2 * G] * (1.0 - fwd_mask))

            gates = xin + rec                                               # [2B, 4H]
            sg = jax.nn.sigmoid(gates)                                      # full-width EUP
            tg = jnp.tanh(gates)
            i = sg[:, 0:H]
            f = sg[:, H:2 * H]
            gg = tg[:, 2 * H:3 * H]
            o = sg[:, 3 * H:4 * H]
            c = f * c + i * gg
            h = o * jnp.tanh(c)
            fwd_out[k] = h[0:B, :]
            bwd_out[T - 1 - k] = h[B:2 * B, :]
        return fwd_out, bwd_out

    sup_starts = [b * (S + Q) for b in range(B)]
    qry_starts = [b * (S + Q) + S for b in range(B)]
    sf, sb = run_chains(sup_starts, S)        # lists of [B, H]
    qf, qb = run_chains(qry_starts, Q)

    # ---------------- stage 3: local aggregation + enhance_w / enhance_u ----
    qrows = [jnp.concatenate([qf[t], qb[t]], axis=1) for t in range(Q)]     # [B, 2H]
    qmax = qrows[0]
    qsum = qrows[0]
    for t in range(1, Q):
        qmax = jnp.maximum(qmax, qrows[t])
        qsum = qsum + qrows[t]
    qcat = jnp.concatenate([qmax, qsum / Q], axis=1)                        # [B, 4H]
    eq_all = (jnp.dot(qcat, ww_ref[...], preferred_element_type=f32)
              + bw_ref[...])                                                # [B, D]

    srows = [jnp.concatenate([sf[t], sb[t]], axis=1) for t in range(S)]     # [B, 2H]
    pcat = []
    for p in range(FEW):
        r0 = srows[2 * p]
        r1 = srows[2 * p + 1]
        pcat.append(jnp.concatenate(
            [jnp.maximum(r0, r1), 0.5 * (r0 + r1)], axis=1))                # [B, 4H]
    scat = jnp.concatenate(
        [pcat[p][b:b + 1, :] for b in range(B) for p in range(FEW)], axis=0)  # [B*FEW, 4H]
    es_all = (jnp.dot(scat, wu_ref[...], preferred_element_type=f32)
              + bu_ref[...])                                                # [B*FEW, D]

    # ---------------- stage 4: conv stack (im2col, batched over B) ----------
    w1 = w1_ref[...]     # [C1, K]
    b1 = b1_ref[...]     # [C1, 1]
    w2 = w2_ref[...]     # [C2, K*C1]   (col = kh*C1 + c1)
    b2 = b2_ref[...]     # [C2, 1]
    wf = wf_ref[...]     # [1, FEW*C2]  (col = f*C2 + c2)
    bf = bf_ref[...]     # [1, 1]

    def shift_seg(seg, s):
        # seg: [R, FEW*D]; shift right by s DIM-blocks along the few axis, zero fill
        if s == 0:
            return seg
        if abs(s) >= FEW:
            return jnp.zeros_like(seg)
        R = seg.shape[0]
        z = jnp.zeros((R, abs(s) * DIM), f32)
        if s > 0:
            return jnp.concatenate([z, seg[:, :(FEW - s) * DIM]], axis=1)
        return jnp.concatenate([seg[:, (-s) * DIM:], z], axis=1)

    def shifted(x_flat, s):
        # x_flat: [R, B*FEW*D]; shift each batch segment independently
        segs = [shift_seg(x_flat[:, b * FEW * DIM:(b + 1) * FEW * DIM], s)
                for b in range(B)]
        return jnp.concatenate(segs, axis=1)

    # lay es out lane-dense: [1, B*FEW*D], block (b, f) at columns (b*FEW+f)*D
    x_flat = jnp.concatenate(
        [es_all[r:r + 1, :] for r in range(B * FEW)], axis=1)               # [1, B*FEW*D]

    # conv1 (Cin=1) + ReLU: one [C1,K]@[K, B*FEW*D] matmul
    patch1 = jnp.concatenate(
        [shifted(x_flat, PAD - kh) for kh in range(KERNS)], axis=0)         # [K, BFD]
    out1 = jnp.maximum(jnp.dot(w1, patch1, preferred_element_type=f32) + b1, 0.0)

    # conv2 (Cin=C1, Cout=C2) + ReLU (dropout=id): one [C2,K*C1]@[K*C1, BFD] matmul
    patch2 = jnp.concatenate(
        [shifted(out1, PAD - kh) for kh in range(KERNS)], axis=0)           # [K*C1, BFD]
    out2 = jnp.maximum(jnp.dot(w2, patch2, preferred_element_type=f32) + b2, 0.0)

    # conv_final (kernel (FEW,1), stride (K,1) -> single position) + ReLU
    patchf = jnp.concatenate(
        [jnp.concatenate([out2[:, (b * FEW + f) * DIM:(b * FEW + f + 1) * DIM]
                          for f in range(FEW)], axis=0)                     # [FEW*C2, D]
         for b in range(B)], axis=1)                                        # [FEW*C2, B*D]
    fea_all = jnp.maximum(jnp.dot(wf, patchf, preferred_element_type=f32) + bf, 0.0)

    # ---------------- stage 5: pair attention + matching score + rel loss ---
    score_cols = []
    rel_acc = jnp.zeros((1, 1), f32)
    for b in range(B):
        es_b = es_all[b * FEW:(b + 1) * FEW, :]                             # [FEW, D]
        eq_b = eq_all[b:b + 1, :]                                           # [1, D]
        att = jnp.sum(es_b * eq_b, axis=-1, keepdims=True)                  # [FEW, 1]
        att = jax.nn.softmax(att, axis=0)                                   # pair_dropout = id
        one_b = jnp.sum(att * es_b, axis=0, keepdims=True)                  # [1, D]
        rel_b = jnp.mean(jnp.sum((es_b - one_b) ** 2, axis=1, keepdims=True),
                         axis=0, keepdims=True)                             # [1, 1]
        rel_acc = rel_acc + rel_b
        fea_b = fea_all[:, b * DIM:(b + 1) * DIM]                           # [1, D]
        score_cols.append(
            -jnp.sum(fea_b * (one_b - eq_b) ** 2, axis=1, keepdims=True))   # [1, 1]

    scores_ref[...] = jnp.concatenate(score_cols, axis=1)                   # [1, B]
    rel_ref[...] = rel_acc / B                                              # [1, 1]


# ---------------------------------------------------------------------------
# Parameter re-layout done ONCE outside the jitted forward
# ---------------------------------------------------------------------------
def prepare_params(p):
    return {
        'Wp': p['Wp'], 'bp': p['bp'],
        'Wih_both': jnp.concatenate([p['Wih_f'], p['Wih_r']], axis=1),      # [D, 8H]
        'Whh_both': jnp.concatenate([p['Whh_f'], p['Whh_r']], axis=1),      # [H, 8H]
        'b_both': jnp.concatenate([p['b_f'], p['b_r']], axis=1),            # [1, 8H]
        'Ww': p['Ww'], 'bw': p['bw'], 'Wu': p['Wu'], 'bu': p['bu'],
        'w1f': p['W1'][:, 0, :, 0],                                         # [C1, K]
        'w2f': jnp.transpose(p['W2'][..., 0], (0, 2, 1)).reshape(C2, KERNS * C1),
        'wff': jnp.transpose(p['Wf'][..., 0], (0, 2, 1)).reshape(1, FEW * C2),
        'b1c': p['b1'].reshape(C1, 1),
        'b2c': p['b2'].reshape(C2, 1),
        'bfc': p['bf'].reshape(1, 1),
    }


# ---------------------------------------------------------------------------
# Full forward pass: one Pallas call, whole-array VMEM residency
# ---------------------------------------------------------------------------
def pallas_forward(support, query, pp):
    B = query.shape[0]
    sup2 = support.reshape(S, DIM)          # [S, D]  (row t = pair*2 + entity)
    q2 = query.reshape(B * Q, DIM)          # [B*Q, D]
    scores, rel = pl.pallas_call(
        fused_kernel,
        out_shape=(jax.ShapeDtypeStruct((1, B), jnp.float32),
                   jax.ShapeDtypeStruct((1, 1), jnp.float32)),
    )(sup2, q2,
      pp['Wp'], pp['bp'],
      pp['Wih_both'], pp['Whh_both'], pp['b_both'],
      pp['Ww'], pp['bw'], pp['Wu'], pp['bu'],
      pp['w1f'], pp['b1c'], pp['w2f'], pp['b2c'], pp['wff'], pp['bfc'])
    return scores.reshape(B), rel[0, 0]


# ---------------------------------------------------------------------------
# Pure-JAX reference (mirrors the PyTorch forward, eval mode)
# ---------------------------------------------------------------------------
def reference_forward(support, query, p):
    B = query.shape[0]
    sup = jnp.broadcast_to(support.reshape(1, S, DIM), (B, S, DIM))

    att = jnp.einsum('bsd,bqd->bsq', sup, query)
    support_ = jnp.einsum('bsq,bqd->bsd', jax.nn.softmax(att, axis=2), query)
    query_ = jnp.einsum('bqs,bsd->bqd',
                        jax.nn.softmax(jnp.swapaxes(att, 1, 2), axis=2), sup)

    def fuse(m1, m2):
        return jnp.concatenate([m1, m2, jnp.abs(m1 - m2), m1 * m2], axis=-1)

    es = jax.nn.leaky_relu(fuse(sup, support_) @ p['Wp'] + p['bp'])
    eq = jax.nn.leaky_relu(fuse(query, query_) @ p['Wp'] + p['bp'])

    def lstm_dir(x, Wih, Whh, b):
        Bx, T, _ = x.shape
        h = jnp.zeros((Bx, H), jnp.float32)
        c = jnp.zeros((Bx, H), jnp.float32)
        outs = []
        for t in range(T):
            g = x[:, t] @ Wih + h @ Whh + b
            i = jax.nn.sigmoid(g[:, :H]); f = jax.nn.sigmoid(g[:, H:2 * H])
            gg = jnp.tanh(g[:, 2 * H:3 * H]); o = jax.nn.sigmoid(g[:, 3 * H:])
            c = f * c + i * gg
            h = o * jnp.tanh(c)
            outs.append(h)
        return jnp.stack(outs, axis=1)

    def bilstm_ref(x):
        fwd = lstm_dir(x, p['Wih_f'], p['Whh_f'], p['b_f'])
        bwd = lstm_dir(x[:, ::-1], p['Wih_r'], p['Whh_r'], p['b_r'])[:, ::-1]
        return jnp.concatenate([fwd, bwd], axis=-1)

    sl = bilstm_ref(es)
    ql = bilstm_ref(eq)

    eqa = jnp.concatenate([ql.max(axis=1), ql.mean(axis=1)], axis=1) @ p['Ww'] + p['bw']
    sr = sl.reshape(B, FEW, 2, 2 * DIM)
    esa = jnp.concatenate([sr.max(axis=2), sr.mean(axis=2)], axis=2) @ p['Wu'] + p['bu']

    att2 = jax.nn.softmax(jnp.einsum('bfd,bd->bf', esa, eqa)[..., None], axis=1)
    one = jnp.einsum('bfd,bf->bd', esa, att2[..., 0])

    def conv(x, w, b, pad_h, stride_h=1):
        y = lax.conv_general_dilated(x, w, window_strides=(stride_h, 1),
                                     padding=((pad_h, pad_h), (0, 0)),
                                     dimension_numbers=('NCHW', 'OIHW', 'NCHW'))
        return y + b.reshape(1, -1, 1, 1)

    feat = esa[:, None, :, :]
    feat = jax.nn.relu(conv(feat, p['W1'], p['b1'], PAD))
    feat = jax.nn.relu(conv(feat, p['W2'], p['b2'], PAD))
    feat = jax.nn.relu(conv(feat, p['Wf'], p['bf'], 0, stride_h=KERNS))
    fea = feat.reshape(B, DIM)

    scores = -jnp.sum(fea * (one - eqa) ** 2, axis=1)
    rel = jnp.mean(jnp.sum((esa - one[:, None, :]) ** 2, axis=2), axis=1)
    return scores, rel.mean()


# ---------------------------------------------------------------------------
# Deterministic synthetic parameters (shapes from the module's __init__)
# ---------------------------------------------------------------------------
def init_params(key):
    ks = jax.random.split(key, 18)
    n = lambda k, shape, s=0.15: (s * jax.random.normal(k, shape)).astype(jnp.float32)
    return {
        # proj: Linear(4D, D)  (stored already transposed, [in, out])
        'Wp': n(ks[0], (4 * DIM, DIM)),  'bp': n(ks[1], (1, DIM)),
        # bidirectional LSTM(D -> D), gate order i,f,g,o; combined bias
        'Wih_f': n(ks[2], (DIM, 4 * H)), 'Whh_f': n(ks[3], (H, 4 * H)), 'b_f': n(ks[4], (1, 4 * H)),
        'Wih_r': n(ks[5], (DIM, 4 * H)), 'Whh_r': n(ks[6], (H, 4 * H)), 'b_r': n(ks[7], (1, 4 * H)),
        # enhance_w / enhance_u: Linear(4D, D)
        'Ww': n(ks[8], (4 * DIM, DIM)),  'bw': n(ks[9], (1, DIM)),
        'Wu': n(ks[10], (4 * DIM, DIM)), 'bu': n(ks[11], (1, DIM)),
        # conv1: Conv2d(1, 32, (KERNS,1)); conv2: Conv2d(32, 64, (KERNS,1));
        # conv_final: Conv2d(64, 1, (FEW,1), stride=(KERNS,1))
        'W1': n(ks[12], (C1, 1, KERNS, 1)),   'b1': n(ks[13], (C1,)),
        'W2': n(ks[14], (C2, C1, KERNS, 1)),  'b2': n(ks[15], (C2,)),
        'Wf': n(ks[16], (1, C2, FEW, 1)),     'bf': n(ks[17], (1,)),
    }


if __name__ == "__main__":
    master = jax.random.PRNGKey(0)
    kparam, kin = jax.random.split(master)
    ksup, kqry = jax.random.split(kin)

    params = init_params(kparam)
    support = jax.random.normal(ksup, (FEW, 2, DIM), dtype=jnp.float32)   # [few, 2, dim]
    query = jax.random.normal(kqry, (BATCH, 2, DIM), dtype=jnp.float32)   # [batch, 2, dim]

    prepared = prepare_params(params)   # weight re-layouts done once, outside jit

    scores, rel_loss = jax.jit(pallas_forward)(support, query, prepared)
    scores = jax.block_until_ready(scores)
    rel_loss = jax.block_until_ready(rel_loss)

    with jax.default_matmul_precision("highest"):
        ref_scores, ref_rel = jax.jit(reference_forward)(support, query, params)
    ref_scores = jax.block_until_ready(ref_scores)

    np.testing.assert_allclose(np.asarray(scores), np.asarray(ref_scores),
                               rtol=2e-2, atol=2e-2)
    np.testing.assert_allclose(float(rel_loss), float(ref_rel), rtol=2e-2, atol=2e-2)
    print("KERNEL_OK")
</pallas_src>

<mosaic_0001>
module attributes {stable_mosaic.version = 11 : i64} {
  func.func @fused_kernel(%arg0: memref<6x32xf32, #tpu.memory_space<vmem>>, %arg1: memref<4x32xf32, #tpu.memory_space<vmem>>, %arg2: memref<128x32xf32, #tpu.memory_space<vmem>>, %arg3: memref<1x32xf32, #tpu.memory_space<vmem>>, %arg4: memref<32x256xf32, #tpu.memory_space<vmem>>, %arg5: memref<32x256xf32, #tpu.memory_space<vmem>>, %arg6: memref<1x256xf32, #tpu.memory_space<vmem>>, %arg7: memref<128x32xf32, #tpu.memory_space<vmem>>, %arg8: memref<1x32xf32, #tpu.memory_space<vmem>>, %arg9: memref<128x32xf32, #tpu.memory_space<vmem>>, %arg10: memref<1x32xf32, #tpu.memory_space<vmem>>, %arg11: memref<32x3xf32, #tpu.memory_space<vmem>>, %arg12: memref<32x1xf32, #tpu.memory_space<vmem>>, %arg13: memref<64x96xf32, #tpu.memory_space<vmem>>, %arg14: memref<64x1xf32, #tpu.memory_space<vmem>>, %arg15: memref<1x192xf32, #tpu.memory_space<vmem>>, %arg16: memref<1x1xf32, #tpu.memory_space<vmem>>, %arg17: memref<1x2xf32, #tpu.memory_space<vmem>>, %arg18: memref<1x1xf32, #tpu.memory_space<vmem>>) attributes {dimension_semantics = [], scalar_prefetch = 0 : i64, scratch_operands = 0 : i64, tpu.core_type = #tpu.core_type<tc>} {
    %c0 = arith.constant 0 : index
    %c0_0 = arith.constant 0 : index
    %0 = vector.load %arg0[%c0, %c0_0] : memref<6x32xf32, #tpu.memory_space<vmem>>, vector<6x32xf32>
    %c0_1 = arith.constant 0 : index
    %c0_2 = arith.constant 0 : index
    %1 = vector.load %arg1[%c0_1, %c0_2] : memref<4x32xf32, #tpu.memory_space<vmem>>, vector<4x32xf32>
    %c0_3 = arith.constant 0 : index
    %c0_4 = arith.constant 0 : index
    %2 = vector.load %arg2[%c0_3, %c0_4] : memref<128x32xf32, #tpu.memory_space<vmem>>, vector<128x32xf32>
    %c0_5 = arith.constant 0 : index
    %c0_6 = arith.constant 0 : index
    %3 = vector.load %arg3[%c0_5, %c0_6] : memref<1x32xf32, #tpu.memory_space<vmem>>, vector<1x32xf32>
    %c0_7 = arith.constant 0 : index
    %c0_8 = arith.constant 0 : index
    %4 = vector.load %arg4[%c0_7, %c0_8] : memref<32x256xf32, #tpu.memory_space<vmem>>, vector<32x256xf32>
    %c0_9 = arith.constant 0 : index
    %c0_10 = arith.constant 0 : index
    %5 = vector.load %arg5[%c0_9, %c0_10] : memref<32x256xf32, #tpu.memory_space<vmem>>, vector<32x256xf32>
    %c0_11 = arith.constant 0 : index
    %c0_12 = arith.constant 0 : index
    %6 = vector.load %arg6[%c0_11, %c0_12] : memref<1x256xf32, #tpu.memory_space<vmem>>, vector<1x256xf32>
    %7 = vector.extract_strided_slice %1 {offsets = [0, 0], sizes = [2, 32], strides = [1, 1]} : vector<4x32xf32> to vector<2x32xf32>
    %8 = tpu.transpose %7, [1, 0] : vector<2x32xf32> -> vector<32x2xf32>
    %cst = arith.constant dense<0.000000e+00> : vector<6x2xf32>
    %9 = tpu.matmul %0, %8, %cst {dimension_numbers = #tpu.dot_dimension_numbers<[1], [0], [0], [1], [0, 0, 1, 1], [], []>} : vector<6x32xf32>, vector<32x2xf32>, vector<6x2xf32> -> vector<6x2xf32>
    %cst_13 = arith.constant dense<0xFF800000> : vector<6xf32>
    %10 = vector.multi_reduction <maximumf>, %9, %cst_13 [1] : vector<6x2xf32> to vector<6xf32>
    %cst_14 = arith.constant 0xFF800000 : f32
    %11 = vector.broadcast %cst_14 : f32 to vector<6xf32>
    %12 = arith.maximumf %11, %10 : vector<6xf32>
    %13 = vector.shape_cast %12 : vector<6xf32> to vector<6x1xf32>
    %14 = vector.broadcast %13 : vector<6x1xf32> to vector<6x2xf32>
    %15 = arith.subf %9, %14 : vector<6x2xf32>
    %16 = math.exp %15 : vector<6x2xf32>
    %cst_15 = arith.constant dense<0.000000e+00> : vector<6xf32>
    %17 = vector.multi_reduction <add>, %16, %cst_15 [1] : vector<6x2xf32> to vector<6xf32>
    %18 = vector.shape_cast %17 : vector<6xf32> to vector<6x1xf32>
    %19 = vector.broadcast %18 : vector<6x1xf32> to vector<6x2xf32>
    %20 = arith.divf %16, %19 : vector<6x2xf32>
    %cst_16 = arith.constant dense<0.000000e+00> : vector<6x32xf32>
    %21 = tpu.matmul %20, %7, %cst_16 {dimension_numbers = #tpu.dot_dimension_numbers<[1], [0], [0], [1], [0, 0, 1, 1], [], []>} : vector<6x2xf32>, vector<2x32xf32>, vector<6x32xf32> -> vector<6x32xf32>
    %22 = tpu.transpose %9, [1, 0] : vector<6x2xf32> -> vector<2x6xf32>
    %cst_17 = arith.constant dense<0xFF800000> : vector<2xf32>
    %23 = vector.multi_reduction <maximumf>, %22, %cst_17 [1] : vector<2x6xf32> to vector<2xf32>
    %cst_18 = arith.constant 0xFF800000 : f32
    %24 = vector.broadcast %cst_18 : f32 to vector<2xf32>
    %25 = arith.maximumf %24, %23 : vector<2xf32>
    %26 = vector.shape_cast %25 : vector<2xf32> to vector<2x1xf32>
    %27 = vector.broadcast %26 : vector<2x1xf32> to vector<2x6xf32>
    %28 = arith.subf %22, %27 : vector<2x6xf32>
    %29 = math.exp %28 : vector<2x6xf32>
    %cst_19 = arith.constant dense<0.000000e+00> : vector<2xf32>
    %30 = vector.multi_reduction <add>, %29, %cst_19 [1] : vector<2x6xf32> to vector<2xf32>
    %31 = vector.shape_cast %30 : vector<2xf32> to vector<2x1xf32>
    %32 = vector.broadcast %31 : vector<2x1xf32> to vector<2x6xf32>
    %33 = arith.divf %29, %32 : vector<2x6xf32>
    %cst_20 = arith.constant dense<0.000000e+00> : vector<2x32xf32>
    %34 = tpu.matmul %33, %0, %cst_20 {dimension_numbers = #tpu.dot_dimension_numbers<[1], [0], [0], [1], [0, 0, 1, 1], [], []>} : vector<2x6xf32>, vector<6x32xf32>, vector<2x32xf32> -> vector<2x32xf32>
    %35 = arith.subf %0, %21 : vector<6x32xf32>
    %36 = math.absf %35 : vector<6x32xf32>
    %37 = arith.mulf %0, %21 : vector<6x32xf32>
    %38 = tpu.concatenate %0, %21, %36, %37 in 1 : vector<6x32xf32>, vector<6x32xf32>, vector<6x32xf32>, vector<6x32xf32> -> vector<6x128xf32>
    %39 = arith.subf %7, %34 : vector<2x32xf32>
    %40 = math.absf %39 : vector<2x32xf32>
    %41 = arith.mulf %7, %34 : vector<2x32xf32>
    %42 = tpu.concatenate %7, %34, %40, %41 in 1 : vector<2x32xf32>, vector<2x32xf32>, vector<2x32xf32>, vector<2x32xf32> -> vector<2x128xf32>
    %43 = vector.extract_strided_slice %1 {offsets = [2, 0], sizes = [2, 32], strides = [1, 1]} : vector<4x32xf32> to vector<2x32xf32>
    %44 = tpu.transpose %43, [1, 0] : vector<2x32xf32> -> vector<32x2xf32>
    %cst_21 = arith.constant dense<0.000000e+00> : vector<6x2xf32>
    %45 = tpu.matmul %0, %44, %cst_21 {dimension_numbers = #tpu.dot_dimension_numbers<[1], [0], [0], [1], [0, 0, 1, 1], [], []>} : vector<6x32xf32>, vector<32x2xf32>, vector<6x2xf32> -> vector<6x2xf32>
    %cst_22 = arith.constant dense<0xFF800000> : vector<6xf32>
    %46 = vector.multi_reduction <maximumf>, %45, %cst_22 [1] : vector<6x2xf32> to vector<6xf32>
    %cst_23 = arith.constant 0xFF800000 : f32
    %47 = vector.broadcast %cst_23 : f32 to vector<6xf32>
    %48 = arith.maximumf %47, %46 : vector<6xf32>
    %49 = vector.shape_cast %48 : vector<6xf32> to vector<6x1xf32>
    %50 = vector.broadcast %49 : vector<6x1xf32> to vector<6x2xf32>
    %51 = arith.subf %45, %50 : vector<6x2xf32>
    %52 = math.exp %51 : vector<6x2xf32>
    %cst_24 = arith.constant dense<0.000000e+00> : vector<6xf32>
    %53 = vector.multi_reduction <add>, %52, %cst_24 [1] : vector<6x2xf32> to vector<6xf32>
    %54 = vector.shape_cast %53 : vector<6xf32> to vector<6x1xf32>
    %55 = vector.broadcast %54 : vector<6x1xf32> to vector<6x2xf32>
    %56 = arith.divf %52, %55 : vector<6x2xf32>
    %cst_25 = arith.constant dense<0.000000e+00> : vector<6x32xf32>
    %57 = tpu.matmul %56, %43, %cst_25 {dimension_numbers = #tpu.dot_dimension_numbers<[1], [0], [0], [1], [0, 0, 1, 1], [], []>} : vector<6x2xf32>, vector<2x32xf32>, vector<6x32xf32> -> vector<6x32xf32>
    %58 = tpu.transpose %45, [1, 0] : vector<6x2xf32> -> vector<2x6xf32>
    %cst_26 = arith.constant dense<0xFF800000> : vector<2xf32>
    %59 = vector.multi_reduction <maximumf>, %58, %cst_26 [1] : vector<2x6xf32> to vector<2xf32>
    %cst_27 = arith.constant 0xFF800000 : f32
    %60 = vector.broadcast %cst_27 : f32 to vector<2xf32>
    %61 = arith.maximumf %60, %59 : vector<2xf32>
    %62 = vector.shape_cast %61 : vector<2xf32> to vector<2x1xf32>
    %63 = vector.broadcast %62 : vector<2x1xf32> to vector<2x6xf32>
    %64 = arith.subf %58, %63 : vector<2x6xf32>
    %65 = math.exp %64 : vector<2x6xf32>
    %cst_28 = arith.constant dense<0.000000e+00> : vector<2xf32>
    %66 = vector.multi_reduction <add>, %65, %cst_28 [1] : vector<2x6xf32> to vector<2xf32>
    %67 = vector.shape_cast %66 : vector<2xf32> to vector<2x1xf32>
    %68 = vector.broadcast %67 : vector<2x1xf32> to vector<2x6xf32>
    %69 = arith.divf %65, %68 : vector<2x6xf32>
    %cst_29 = arith.constant dense<0.000000e+00> : vector<2x32xf32>
    %70 = tpu.matmul %69, %0, %cst_29 {dimension_numbers = #tpu.dot_dimension_numbers<[1], [0], [0], [1], [0, 0, 1, 1], [], []>} : vector<2x6xf32>, vector<6x32xf32>, vector<2x32xf32> -> vector<2x32xf32>
    %71 = arith.subf %0, %57 : vector<6x32xf32>
    %72 = math.absf %71 : vector<6x32xf32>
    %73 = arith.mulf %0, %57 : vector<6x32xf32>
    %74 = tpu.concatenate %0, %57, %72, %73 in 1 : vector<6x32xf32>, vector<6x32xf32>, vector<6x32xf32>, vector<6x32xf32> -> vector<6x128xf32>
    %75 = arith.subf %43, %70 : vector<2x32xf32>
    %76 = math.absf %75 : vector<2x32xf32>
    %77 = arith.mulf %43, %70 : vector<2x32xf32>
    %78 = tpu.concatenate %43, %70, %76, %77 in 1 : vector<2x32xf32>, vector<2x32xf32>, vector<2x32xf32>, vector<2x32xf32> -> vector<2x128xf32>
    %79 = tpu.concatenate %38, %42, %74, %78 in 0 : vector<6x128xf32>, vector<2x128xf32>, vector<6x128xf32>, vector<2x128xf32> -> vector<16x128xf32>
    %cst_30 = arith.constant dense<0.000000e+00> : vector<16x32xf32>
    %80 = tpu.matmul %79, %2, %cst_30 {dimension_numbers = #tpu.dot_dimension_numbers<[1], [0], [0], [1], [0, 0, 1, 1], [], []>} : vector<16x128xf32>, vector<128x32xf32>, vector<16x32xf32> -> vector<16x32xf32>
    %81 = vector.broadcast %3 : vector<1x32xf32> to vector<16x32xf32>
    %82 = arith.addf %80, %81 : vector<16x32xf32>
    %cst_31 = arith.constant 0.000000e+00 : f32
    %83 = vector.broadcast %cst_31 : f32 to vector<16x32xf32>
    %84 = arith.cmpf ogt, %82, %83 : vector<16x32xf32>
    %cst_32 = arith.constant 0.00999999977 : f32
    %85 = vector.broadcast %cst_32 : f32 to vector<16x32xf32>
    %86 = arith.mulf %85, %82 : vector<16x32xf32>
    %87 = arith.select %84, %82, %86 : vector<16x32xi1>, vector<16x32xf32>
    %cst_33 = arith.constant dense<0.000000e+00> : vector<16x256xf32>
    %88 = tpu.matmul %87, %4, %cst_33 {dimension_numbers = #tpu.dot_dimension_numbers<[1], [0], [0], [1], [0, 0, 1, 1], [], []>} : vector<16x32xf32>, vector<32x256xf32>, vector<16x256xf32> -> vector<16x256xf32>
    %89 = vector.broadcast %6 : vector<1x256xf32> to vector<16x256xf32>
    %90 = arith.addf %88, %89 : vector<16x256xf32>
    %cst_34 = arith.constant 1.000000e+00 : f32
    %91 = vector.broadcast %cst_34 : f32 to vector<2x1xf32>
    %cst_35 = arith.constant 0.000000e+00 : f32
    %92 = vector.broadcast %cst_35 : f32 to vector<2x1xf32>
    %93 = tpu.concatenate %91, %92 in 0 : vector<2x1xf32>, vector<2x1xf32> -> vector<4x1xf32>
    %cst_36 = arith.constant 0.000000e+00 : f32
    %94 = vector.broadcast %cst_36 : f32 to vector<4x32xf32>
    %cst_37 = arith.constant 0.000000e+00 : f32
    %95 = vector.broadcast %cst_37 : f32 to vector<4x32xf32>
    %96 = vector.extract_strided_slice %90 {offsets = [0, 0], sizes = [1, 128], strides = [1, 1]} : vector<16x256xf32> to vector<1x128xf32>
    %97 = vector.extract_strided_slice %90 {offsets = [8, 0], sizes = [1, 128], strides = [1, 1]} : vector<16x256xf32> to vector<1x128xf32>
    %98 = vector.extract_strided_slice %90 {offsets = [5, 128], sizes = [1, 128], strides = [1, 1]} : vector<16x256xf32> to vector<1x128xf32>
    %99 = vector.extract_strided_slice %90 {offsets = [13, 128], sizes = [1, 128], strides = [1, 1]} : vector<16x256xf32> to vector<1x128xf32>
    %100 = tpu.concatenate %96, %97, %98, %99 in 0 : vector<1x128xf32>, vector<1x128xf32>, vector<1x128xf32>, vector<1x128xf32> -> vector<4x128xf32>
    %cst_38 = arith.constant dense<0.000000e+00> : vector<4x256xf32>
    %101 = tpu.matmul %94, %5, %cst_38 {dimension_numbers = #tpu.dot_dimension_numbers<[1], [0], [0], [1], [0, 0, 1, 1], [], []>} : vector<4x32xf32>, vector<32x256xf32>, vector<4x256xf32> -> vector<4x256xf32>
    %102 = vector.extract_strided_slice %101 {offsets = [0, 0], sizes = [4, 128], strides = [1, 1]} : vector<4x256xf32> to vector<4x128xf32>
    %103 = vector.broadcast %93 : vector<4x1xf32> to vector<4x128xf32>
    %104 = arith.mulf %102, %103 : vector<4x128xf32>
    %105 = vector.extract_strided_slice %101 {offsets = [0, 128], sizes = [4, 128], strides = [1, 1]} : vector<4x256xf32> to vector<4x128xf32>
    %cst_39 = arith.constant 1.000000e+00 : f32
    %106 = vector.broadcast %cst_39 : f32 to vector<4x1xf32>
    %107 = arith.subf %106, %93 : vector<4x1xf32>
    %108 = vector.broadcast %107 : vector<4x1xf32> to vector<4x128xf32>
    %109 = arith.mulf %105, %108 : vector<4x128xf32>
    %110 = arith.addf %104, %109 : vector<4x128xf32>
    %111 = arith.addf %100, %110 : vector<4x128xf32>
    %112 = arith.negf %111 : vector<4x128xf32>
    %113 = math.exp %112 : vector<4x128xf32>
    %cst_40 = arith.constant 1.000000e+00 : f32
    %114 = vector.broadcast %cst_40 : f32 to vector<4x128xf32>
    %115 = arith.addf %114, %113 : vector<4x128xf32>
    %116 = arith.divf %114, %115 : vector<4x128xf32>
    %117 = math.tanh %111 : vector<4x128xf32>
    %118 = vector.extract_strided_slice %116 {offsets = [0, 0], sizes = [4, 32], strides = [1, 1]} : vector<4x128xf32> to vector<4x32xf32>
    %119 = vector.extract_strided_slice %116 {offsets = [0, 32], sizes = [4, 32], strides = [1, 1]} : vector<4x128xf32> to vector<4x32xf32>
    %120 = vector.extract_strided_slice %117 {offsets = [0, 64], sizes = [4, 32], strides = [1, 1]} : vector<4x128xf32> to vector<4x32xf32>
    %121 = vector.extract_strided_slice %116 {offsets = [0, 96], sizes = [4, 32], strides = [1, 1]} : vector<4x128xf32> to vector<4x32xf32>
    %122 = arith.mulf %119, %95 : vector<4x32xf32>
    %123 = arith.mulf %118, %120 : vector<4x32xf32>
    %124 = arith.addf %122, %123 : vector<4x32xf32>
    %125 = math.tanh %124 : vector<4x32xf32>
    %126 = arith.mulf %121, %125 : vector<4x32xf32>
    %127 = vector.extract_strided_slice %126 {offsets = [0, 0], sizes = [2, 32], strides = [1, 1]} : vector<4x32xf32> to vector<2x32xf32>
    %128 = vector.extract_strided_slice %126 {offsets = [2, 0], sizes = [2, 32], strides = [1, 1]} : vector<4x32xf32> to vector<2x32xf32>
    %129 = vector.extract_strided_slice %90 {offsets = [1, 0], sizes = [1, 128], strides = [1, 1]} : vector<16x256xf32> to vector<1x128xf32>
    %130 = vector.extract_strided_slice %90 {offsets = [9, 0], sizes = [1, 128], strides = [1, 1]} : vector<16x256xf32> to vector<1x128xf32>
    %131 = vector.extract_strided_slice %90 {offsets = [4, 128], sizes = [1, 128], strides = [1, 1]} : vector<16x256xf32> to vector<1x128xf32>
    %132 = vector.extract_strided_slice %90 {offsets = [12, 128], sizes = [1, 128], strides = [1, 1]} : vector<16x256xf32> to vector<1x128xf32>
    %133 = tpu.concatenate %129, %130, %131, %132 in 0 : vector<1x128xf32>, vector<1x128xf32>, vector<1x128xf32>, vector<1x128xf32> -> vector<4x128xf32>
    %cst_41 = arith.constant dense<0.000000e+00> : vector<4x256xf32>
    %134 = tpu.matmul %126, %5, %cst_41 {dimension_numbers = #tpu.dot_dimension_numbers<[1], [0], [0], [1], [0, 0, 1, 1], [], []>} : vector<4x32xf32>, vector<32x256xf32>, vector<4x256xf32> -> vector<4x256xf32>
    %135 = vector.extract_strided_slice %134 {offsets = [0, 0], sizes = [4, 128], strides = [1, 1]} : vector<4x256xf32> to vector<4x128xf32>
    %136 = vector.broadcast %93 : vector<4x1xf32> to vector<4x128xf32>
    %137 = arith.mulf %135, %136 : vector<4x128xf32>
    %138 = vector.extract_strided_slice %134 {offsets = [0, 128], sizes = [4, 128], strides = [1, 1]} : vector<4x256xf32> to vector<4x128xf32>
    %cst_42 = arith.constant 1.000000e+00 : f32
    %139 = vector.broadcast %cst_42 : f32 to vector<4x1xf32>
    %140 = arith.subf %139, %93 : vector<4x1xf32>
    %141 = vector.broadcast %140 : vector<4x1xf32> to vector<4x128xf32>
    %142 = arith.mulf %138, %141 : vector<4x128xf32>
    %143 = arith.addf %137, %142 : vector<4x128xf32>
    %144 = arith.addf %133, %143 : vector<4x128xf32>
    %145 = arith.negf %144 : vector<4x128xf32>
    %146 = math.exp %145 : vector<4x128xf32>
    %cst_43 = arith.constant 1.000000e+00 : f32
    %147 = vector.broadcast %cst_43 : f32 to vector<4x128xf32>
    %148 = arith.addf %147, %146 : vector<4x128xf32>
    %149 = arith.divf %147, %148 : vector<4x128xf32>
    %150 = math.tanh %144 : vector<4x128xf32>
    %151 = vector.extract_strided_slice %149 {offsets = [0, 0], sizes = [4, 32], strides = [1, 1]} : vector<4x128xf32> to vector<4x32xf32>
    %152 = vector.extract_strided_slice %149 {offsets = [0, 32], sizes = [4, 32], strides = [1, 1]} : vector<4x128xf32> to vector<4x32xf32>
    %153 = vector.extract_strided_slice %150 {offsets = [0, 64], sizes = [4, 32], strides = [1, 1]} : vector<4x128xf32> to vector<4x32xf32>
    %154 = vector.extract_strided_slice %149 {offsets = [0, 96], sizes = [4, 32], strides = [1, 1]} : vector<4x128xf32> to vector<4x32xf32>
    %155 = arith.mulf %152, %124 : vector<4x32xf32>
    %156 = arith.mulf %151, %153 : vector<4x32xf32>
    %157 = arith.addf %155, %156 : vector<4x32xf32>
    %158 = math.tanh %157 : vector<4x32xf32>
    %159 = arith.mulf %154, %158 : vector<4x32xf32>
    %160 = vector.extract_strided_slice %159 {offsets = [0, 0], sizes = [2, 32], strides = [1, 1]} : vector<4x32xf32> to vector<2x32xf32>
    %161 = vector.extract_strided_slice %159 {offsets = [2, 0], sizes = [2, 32], strides = [1, 1]} : vector<4x32xf32> to vector<2x32xf32>
    %162 = vector.extract_strided_slice %90 {offsets = [2, 0], sizes = [1, 128], strides = [1, 1]} : vector<16x256xf32> to vector<1x128xf32>
    %163 = vector.extract_strided_slice %90 {offsets = [10, 0], sizes = [1, 128], strides = [1, 1]} : vector<16x256xf32> to vector<1x128xf32>
    %164 = vector.extract_strided_slice %90 {offsets = [3, 128], sizes = [1, 128], strides = [1, 1]} : vector<16x256xf32> to vector<1x128xf32>
    %165 = vector.extract_strided_slice %90 {offsets = [11, 128], sizes = [1, 128], strides = [1, 1]} : vector<16x256xf32> to vector<1x128xf32>
    %166 = tpu.concatenate %162, %163, %164, %165 in 0 : vector<1x128xf32>, vector<1x128xf32>, vector<1x128xf32>, vector<1x128xf32> -> vector<4x128xf32>
    %cst_44 = arith.constant dense<0.000000e+00> : vector<4x256xf32>
    %167 = tpu.matmul %159, %5, %cst_44 {dimension_numbers = #tpu.dot_dimension_numbers<[1], [0], [0], [1], [0, 0, 1, 1], [], []>} : vector<4x32xf32>, vector<32x256xf32>, vector<4x256xf32> -> vector<4x256xf32>
    %168 = vector.extract_strided_slice %167 {offsets = [0, 0], sizes = [4, 128], strides = [1, 1]} : vector<4x256xf32> to vector<4x128xf32>
    %169 = vector.broadcast %93 : vector<4x1xf32> to vector<4x128xf32>
    %170 = arith.mulf %168, %169 : vector<4x128xf32>
    %171 = vector.extract_strided_slice %167 {offsets = [0, 128], sizes = [4, 128], strides = [1, 1]} : vector<4x256xf32> to vector<4x128xf32>
    %cst_45 = arith.constant 1.000000e+00 : f32
    %172 = vector.broadcast %cst_45 : f32 to vector<4x1xf32>
    %173 = arith.subf %172, %93 : vector<4x1xf32>
    %174 = vector.broadcast %173 : vector<4x1xf32> to vector<4x128xf32>
    %175 = arith.mulf %171, %174 : vector<4x128xf32>
    %176 = arith.addf %170, %175 : vector<4x128xf32>
    %177 = arith.addf %166, %176 : vector<4x128xf32>
    %178 = arith.negf %177 : vector<4x128xf32>
    %179 = math.exp %178 : vector<4x128xf32>
    %cst_46 = arith.constant 1.000000e+00 : f32
    %180 = vector.broadcast %cst_46 : f32 to vector<4x128xf32>
    %181 = arith.addf %180, %179 : vector<4x128xf32>
    %182 = arith.divf %180, %181 : vector<4x128xf32>
    %183 = math.tanh %177 : vector<4x128xf32>
    %184 = vector.extract_strided_slice %182 {offsets = [0, 0], sizes = [4, 32], strides = [1, 1]} : vector<4x128xf32> to vector<4x32xf32>
    %185 = vector.extract_strided_slice %182 {offsets = [0, 32], sizes = [4, 32], strides = [1, 1]} : vector<4x128xf32> to vector<4x32xf32>
    %186 = vector.extract_strided_slice %183 {offsets = [0, 64], sizes = [4, 32], strides = [1, 1]} : vector<4x128xf32> to vector<4x32xf32>
    %187 = vector.extract_strided_slice %182 {offsets = [0, 96], sizes = [4, 32], strides = [1, 1]} : vector<4x128xf32> to vector<4x32xf32>
    %188 = arith.mulf %185, %157 : vector<4x32xf32>
    %189 = arith.mulf %184, %186 : vector<4x32xf32>
    %190 = arith.addf %188, %189 : vector<4x32xf32>
    %191 = math.tanh %190 : vector<4x32xf32>
    %192 = arith.mulf %187, %191 : vector<4x32xf32>
    %193 = vector.extract_strided_slice %192 {offsets = [0, 0], sizes = [2, 32], strides = [1, 1]} : vector<4x32xf32> to vector<2x32xf32>
    %194 = vector.extract_strided_slice %192 {offsets = [2, 0], sizes = [2, 32], strides = [1, 1]} : vector<4x32xf32> to vector<2x32xf32>
    %195 = vector.extract_strided_slice %90 {offsets = [3, 0], sizes = [1, 128], strides = [1, 1]} : vector<16x256xf32> to vector<1x128xf32>
    %196 = vector.extract_strided_slice %90 {offsets = [11, 0], sizes = [1, 128], strides = [1, 1]} : vector<16x256xf32> to vector<1x128xf32>
    %197 = vector.extract_strided_slice %90 {offsets = [2, 128], sizes = [1, 128], strides = [1, 1]} : vector<16x256xf32> to vector<1x128xf32>
    %198 = vector.extract_strided_slice %90 {offsets = [10, 128], sizes = [1, 128], strides = [1, 1]} : vector<16x256xf32> to vector<1x128xf32>
    %199 = tpu.concatenate %195, %196, %197, %198 in 0 : vector<1x128xf32>, vector<1x128xf32>, vector<1x128xf32>, vector<1x128xf32> -> vector<4x128xf32>
    %cst_47 = arith.constant dense<0.000000e+00> : vector<4x256xf32>
    %200 = tpu.matmul %192, %5, %cst_47 {dimension_numbers = #tpu.dot_dimension_numbers<[1], [0], [0], [1], [0, 0, 1, 1], [], []>} : vector<4x32xf32>, vector<32x256xf32>, vector<4x256xf32> -> vector<4x256xf32>
    %201 = vector.extract_strided_slice %200 {offsets = [0, 0], sizes = [4, 128], strides = [1, 1]} : vector<4x256xf32> to vector<4x128xf32>
    %202 = vector.broadcast %93 : vector<4x1xf32> to vector<4x128xf32>
    %203 = arith.mulf %201, %202 : vector<4x128xf32>
    %204 = vector.extract_strided_slice %200 {offsets = [0, 128], sizes = [4, 128], strides = [1, 1]} : vector<4x256xf32> to vector<4x128xf32>
    %cst_48 = arith.constant 1.000000e+00 : f32
    %205 = vector.broadcast %cst_48 : f32 to vector<4x1xf32>
    %206 = arith.subf %205, %93 : vector<4x1xf32>
    %207 = vector.broadcast %206 : vector<4x1xf32> to vector<4x128xf32>
    %208 = arith.mulf %204, %207 : vector<4x128xf32>
    %209 = arith.addf %203, %208 : vector<4x128xf32>
    %210 = arith.addf %199, %209 : vector<4x128xf32>
    %211 = arith.negf %210 : vector<4x128xf32>
    %212 = math.exp %211 : vector<4x128xf32>
    %cst_49 = arith.constant 1.000000e+00 : f32
    %213 = vector.broadcast %cst_49 : f32 to vector<4x128xf32>
    %214 = arith.addf %213, %212 : vector<4x128xf32>
    %215 = arith.divf %213, %214 : vector<4x128xf32>
    %216 = math.tanh %210 : vector<4x128xf32>
    %217 = vector.extract_strided_slice %215 {offsets = [0, 0], sizes = [4, 32], strides = [1, 1]} : vector<4x128xf32> to vector<4x32xf32>
    %218 = vector.extract_strided_slice %215 {offsets = [0, 32], sizes = [4, 32], strides = [1, 1]} : vector<4x128xf32> to vector<4x32xf32>
    %219 = vector.extract_strided_slice %216 {offsets = [0, 64], sizes = [4, 32], strides = [1, 1]} : vector<4x128xf32> to vector<4x32xf32>
    %220 = vector.extract_strided_slice %215 {offsets = [0, 96], sizes = [4, 32], strides = [1, 1]} : vector<4x128xf32> to vector<4x32xf32>
    %221 = arith.mulf %218, %190 : vector<4x32xf32>
    %222 = arith.mulf %217, %219 : vector<4x32xf32>
    %223 = arith.addf %221, %222 : vector<4x32xf32>
    %224 = math.tanh %223 : vector<4x32xf32>
    %225 = arith.mulf %220, %224 : vector<4x32xf32>
    %226 = vector.extract_strided_slice %225 {offsets = [0, 0], sizes = [2, 32], strides = [1, 1]} : vector<4x32xf32> to vector<2x32xf32>
    %227 = vector.extract_strided_slice %225 {offsets = [2, 0], sizes = [2, 32], strides = [1, 1]} : vector<4x32xf32> to vector<2x32xf32>
    %228 = vector.extract_strided_slice %90 {offsets = [4, 0], sizes = [1, 128], strides = [1, 1]} : vector<16x256xf32> to vector<1x128xf32>
    %229 = vector.extract_strided_slice %90 {offsets = [12, 0], sizes = [1, 128], strides = [1, 1]} : vector<16x256xf32> to vector<1x128xf32>
    %230 = vector.extract_strided_slice %90 {offsets = [1, 128], sizes = [1, 128], strides = [1, 1]} : vector<16x256xf32> to vector<1x128xf32>
    %231 = vector.extract_strided_slice %90 {offsets = [9, 128], sizes = [1, 128], strides = [1, 1]} : vector<16x256xf32> to vector<1x128xf32>
    %232 = tpu.concatenate %228, %229, %230, %231 in 0 : vector<1x128xf32>, vector<1x128xf32>, vector<1x128xf32>, vector<1x128xf32> -> vector<4x128xf32>
    %cst_50 = arith.constant dense<0.000000e+00> : vector<4x256xf32>
    %233 = tpu.matmul %225, %5, %cst_50 {dimension_numbers = #tpu.dot_dimension_numbers<[1], [0], [0], [1], [0, 0, 1, 1], [], []>} : vector<4x32xf32>, vector<32x256xf32>, vector<4x256xf32> -> vector<4x256xf32>
    %234 = vector.extract_strided_slice %233 {offsets = [0, 0], sizes = [4, 128], strides = [1, 1]} : vector<4x256xf32> to vector<4x128xf32>
    %235 = vector.broadcast %93 : vector<4x1xf32> to vector<4x128xf32>
    %236 = arith.mulf %234, %235 : vector<4x128xf32>
    %237 = vector.extract_strided_slice %233 {offsets = [0, 128], sizes = [4, 128], strides = [1, 1]} : vector<4x256xf32> to vector<4x128xf32>
    %cst_51 = arith.constant 1.000000e+00 : f32
    %238 = vector.broadcast %cst_51 : f32 to vector<4x1xf32>
    %239 = arith.subf %238, %93 : vector<4x1xf32>
    %240 = vector.broadcast %239 : vector<4x1xf32> to vector<4x128xf32>
    %241 = arith.mulf %237, %240 : vector<4x128xf32>
    %242 = arith.addf %236, %241 : vector<4x128xf32>
    %243 = arith.addf %232, %242 : vector<4x128xf32>
    %244 = arith.negf %243 : vector<4x128xf32>
    %245 = math.exp %244 : vector<4x128xf32>
    %cst_52 = arith.constant 1.000000e+00 : f32
    %246 = vector.broadcast %cst_52 : f32 to vector<4x128xf32>
    %247 = arith.addf %246, %245 : vector<4x128xf32>
    %248 = arith.divf %246, %247 : vector<4x128xf32>
    %249 = math.tanh %243 : vector<4x128xf32>
    %250 = vector.extract_strided_slice %248 {offsets = [0, 0], sizes = [4, 32], strides = [1, 1]} : vector<4x128xf32> to vector<4x32xf32>
    %251 = vector.extract_strided_slice %248 {offsets = [0, 32], sizes = [4, 32], strides = [1, 1]} : vector<4x128xf32> to vector<4x32xf32>
    %252 = vector.extract_strided_slice %249 {offsets = [0, 64], sizes = [4, 32], strides = [1, 1]} : vector<4x128xf32> to vector<4x32xf32>
    %253 = vector.extract_strided_slice %248 {offsets = [0, 96], sizes = [4, 32], strides = [1, 1]} : vector<4x128xf32> to vector<4x32xf32>
    %254 = arith.mulf %251, %223 : vector<4x32xf32>
    %255 = arith.mulf %250, %252 : vector<4x32xf32>
    %256 = arith.addf %254, %255 : vector<4x32xf32>
    %257 = math.tanh %256 : vector<4x32xf32>
    %258 = arith.mulf %253, %257 : vector<4x32xf32>
    %259 = vector.extract_strided_slice %258 {offsets = [0, 0], sizes = [2, 32], strides = [1, 1]} : vector<4x32xf32> to vector<2x32xf32>
    %260 = vector.extract_strided_slice %258 {offsets = [2, 0], sizes = [2, 32], strides = [1, 1]} : vector<4x32xf32> to vector<2x32xf32>
    %261 = vector.extract_strided_slice %90 {offsets = [5, 0], sizes = [1, 128], strides = [1, 1]} : vector<16x256xf32> to vector<1x128xf32>
    %262 = vector.extract_strided_slice %90 {offsets = [13, 0], sizes = [1, 128], strides = [1, 1]} : vector<16x256xf32> to vector<1x128xf32>
    %263 = vector.extract_strided_slice %90 {offsets = [0, 128], sizes = [1, 128], strides = [1, 1]} : vector<16x256xf32> to vector<1x128xf32>
    %264 = vector.extract_strided_slice %90 {offsets = [8, 128], sizes = [1, 128], strides = [1, 1]} : vector<16x256xf32> to vector<1x128xf32>
    %265 = tpu.concatenate %261, %262, %263, %264 in 0 : vector<1x128xf32>, vector<1x128xf32>, vector<1x128xf32>, vector<1x128xf32> -> vector<4x128xf32>
    %cst_53 = arith.constant dense<0.000000e+00> : vector<4x256xf32>
    %266 = tpu.matmul %258, %5, %cst_53 {dimension_numbers = #tpu.dot_dimension_numbers<[1], [0], [0], [1], [0, 0, 1, 1], [], []>} : vector<4x32xf32>, vector<32x256xf32>, vector<4x256xf32> -> vector<4x256xf32>
    %267 = vector.extract_strided_slice %266 {offsets = [0, 0], sizes = [4, 128], strides = [1, 1]} : vector<4x256xf32> to vector<4x128xf32>
    %268 = vector.broadcast %93 : vector<4x1xf32> to vector<4x128xf32>
    %269 = arith.mulf %267, %268 : vector<4x128xf32>
    %270 = vector.extract_strided_slice %266 {offsets = [0, 128], sizes = [4, 128], strides = [1, 1]} : vector<4x256xf32> to vector<4x128xf32>
    %cst_54 = arith.constant 1.000000e+00 : f32
    %271 = vector.broadcast %cst_54 : f32 to vector<4x1xf32>
    %272 = arith.subf %271, %93 : vector<4x1xf32>
    %273 = vector.broadcast %272 : vector<4x1xf32> to vector<4x128xf32>
    %274 = arith.mulf %270, %273 : vector<4x128xf32>
    %275 = arith.addf %269, %274 : vector<4x128xf32>
    %276 = arith.addf %265, %275 : vector<4x128xf32>
    %277 = arith.negf %276 : vector<4x128xf32>
    %278 = math.exp %277 : vector<4x128xf32>
    %cst_55 = arith.constant 1.000000e+00 : f32
    %279 = vector.broadcast %cst_55 : f32 to vector<4x128xf32>
    %280 = arith.addf %279, %278 : vector<4x128xf32>
    %281 = arith.divf %279, %280 : vector<4x128xf32>
    %282 = math.tanh %276 : vector<4x128xf32>
    %283 = vector.extract_strided_slice %281 {offsets = [0, 0], sizes = [4, 32], strides = [1, 1]} : vector<4x128xf32> to vector<4x32xf32>
    %284 = vector.extract_strided_slice %281 {offsets = [0, 32], sizes = [4, 32], strides = [1, 1]} : vector<4x128xf32> to vector<4x32xf32>
    %285 = vector.extract_strided_slice %282 {offsets = [0, 64], sizes = [4, 32], strides = [1, 1]} : vector<4x128xf32> to vector<4x32xf32>
    %286 = vector.extract_strided_slice %281 {offsets = [0, 96], sizes = [4, 32], strides = [1, 1]} : vector<4x128xf32> to vector<4x32xf32>
    %287 = arith.mulf %284, %256 : vector<4x32xf32>
    %288 = arith.mulf %283, %285 : vector<4x32xf32>
    %289 = arith.addf %287, %288 : vector<4x32xf32>
    %290 = math.tanh %289 : vector<4x32xf32>
    %291 = arith.mulf %286, %290 : vector<4x32xf32>
    %292 = vector.extract_strided_slice %291 {offsets = [0, 0], sizes = [2, 32], strides = [1, 1]} : vector<4x32xf32> to vector<2x32xf32>
    %293 = vector.extract_strided_slice %291 {offsets = [2, 0], sizes = [2, 32], strides = [1, 1]} : vector<4x32xf32> to vector<2x32xf32>
    %cst_56 = arith.constant 0.000000e+00 : f32
    %294 = vector.broadcast %cst_56 : f32 to vector<4x32xf32>
    %cst_57 = arith.constant 0.000000e+00 : f32
    %295 = vector.broadcast %cst_57 : f32 to vector<4x32xf32>
    %296 = vector.extract_strided_slice %90 {offsets = [6, 0], sizes = [1, 128], strides = [1, 1]} : vector<16x256xf32> to vector<1x128xf32>
    %297 = vector.extract_strided_slice %90 {offsets = [14, 0], sizes = [1, 128], strides = [1, 1]} : vector<16x256xf32> to vector<1x128xf32>
    %298 = vector.extract_strided_slice %90 {offsets = [7, 128], sizes = [1, 128], strides = [1, 1]} : vector<16x256xf32> to vector<1x128xf32>
    %299 = vector.extract_strided_slice %90 {offsets = [15, 128], sizes = [1, 128], strides = [1, 1]} : vector<16x256xf32> to vector<1x128xf32>
    %300 = tpu.concatenate %296, %297, %298, %299 in 0 : vector<1x128xf32>, vector<1x128xf32>, vector<1x128xf32>, vector<1x128xf32> -> vector<4x128xf32>
    %cst_58 = arith.constant dense<0.000000e+00> : vector<4x256xf32>
    %301 = tpu.matmul %294, %5, %cst_58 {dimension_numbers = #tpu.dot_dimension_numbers<[1], [0], [0], [1], [0, 0, 1, 1], [], []>} : vector<4x32xf32>, vector<32x256xf32>, vector<4x256xf32> -> vector<4x256xf32>
    %302 = vector.extract_strided_slice %301 {offsets = [0, 0], sizes = [4, 128], strides = [1, 1]} : vector<4x256xf32> to vector<4x128xf32>
    %303 = vector.broadcast %93 : vector<4x1xf32> to vector<4x128xf32>
    %304 = arith.mulf %302, %303 : vector<4x128xf32>
    %305 = vector.extract_strided_slice %301 {offsets = [0, 128], sizes = [4, 128], strides = [1, 1]} : vector<4x256xf32> to vector<4x128xf32>
    %cst_59 = arith.constant 1.000000e+00 : f32
    %306 = vector.broadcast %cst_59 : f32 to vector<4x1xf32>
    %307 = arith.subf %306, %93 : vector<4x1xf32>
    %308 = vector.broadcast %307 : vector<4x1xf32> to vector<4x128xf32>
    %309 = arith.mulf %305, %308 : vector<4x128xf32>
    %310 = arith.addf %304, %309 : vector<4x128xf32>
    %311 = arith.addf %300, %310 : vector<4x128xf32>
    %312 = arith.negf %311 : vector<4x128xf32>
    %313 = math.exp %312 : vector<4x128xf32>
    %cst_60 = arith.constant 1.000000e+00 : f32
    %314 = vector.broadcast %cst_60 : f32 to vector<4x128xf32>
    %315 = arith.addf %314, %313 : vector<4x128xf32>
    %316 = arith.divf %314, %315 : vector<4x128xf32>
    %317 = math.tanh %311 : vector<4x128xf32>
    %318 = vector.extract_strided_slice %316 {offsets = [0, 0], sizes = [4, 32], strides = [1, 1]} : vector<4x128xf32> to vector<4x32xf32>
    %319 = vector.extract_strided_slice %316 {offsets = [0, 32], sizes = [4, 32], strides = [1, 1]} : vector<4x128xf32> to vector<4x32xf32>
    %320 = vector.extract_strided_slice %317 {offsets = [0, 64], sizes = [4, 32], strides = [1, 1]} : vector<4x128xf32> to vector<4x32xf32>
    %321 = vector.extract_strided_slice %316 {offsets = [0, 96], sizes = [4, 32], strides = [1, 1]} : vector<4x128xf32> to vector<4x32xf32>
    %322 = arith.mulf %319, %295 : vector<4x32xf32>
    %323 = arith.mulf %318, %320 : vector<4x32xf32>
    %324 = arith.addf %322, %323 : vector<4x32xf32>
    %325 = math.tanh %324 : vector<4x32xf32>
    %326 = arith.mulf %321, %325 : vector<4x32xf32>
    %327 = vector.extract_strided_slice %326 {offsets = [0, 0], sizes = [2, 32], strides = [1, 1]} : vector<4x32xf32> to vector<2x32xf32>
    %328 = vector.extract_strided_slice %326 {offsets = [2, 0], sizes = [2, 32], strides = [1, 1]} : vector<4x32xf32> to vector<2x32xf32>
    %329 = vector.extract_strided_slice %90 {offsets = [7, 0], sizes = [1, 128], strides = [1, 1]} : vector<16x256xf32> to vector<1x128xf32>
    %330 = vector.extract_strided_slice %90 {offsets = [15, 0], sizes = [1, 128], strides = [1, 1]} : vector<16x256xf32> to vector<1x128xf32>
    %331 = vector.extract_strided_slice %90 {offsets = [6, 128], sizes = [1, 128], strides = [1, 1]} : vector<16x256xf32> to vector<1x128xf32>
    %332 = vector.extract_strided_slice %90 {offsets = [14, 128], sizes = [1, 128], strides = [1, 1]} : vector<16x256xf32> to vector<1x128xf32>
    %333 = tpu.concatenate %329, %330, %331, %332 in 0 : vector<1x128xf32>, vector<1x128xf32>, vector<1x128xf32>, vector<1x128xf32> -> vector<4x128xf32>
    %cst_61 = arith.constant dense<0.000000e+00> : vector<4x256xf32>
    %334 = tpu.matmul %326, %5, %cst_61 {dimension_numbers = #tpu.dot_dimension_numbers<[1], [0], [0], [1], [0, 0, 1, 1], [], []>} : vector<4x32xf32>, vector<32x256xf32>, vector<4x256xf32> -> vector<4x256xf32>
    %335 = vector.extract_strided_slice %334 {offsets = [0, 0], sizes = [4, 128], strides = [1, 1]} : vector<4x256xf32> to vector<4x128xf32>
    %336 = vector.broadcast %93 : vector<4x1xf32> to vector<4x128xf32>
    %337 = arith.mulf %335, %336 : vector<4x128xf32>
    %338 = vector.extract_strided_slice %334 {offsets = [0, 128], sizes = [4, 128], strides = [1, 1]} : vector<4x256xf32> to vector<4x128xf32>
    %cst_62 = arith.constant 1.000000e+00 : f32
    %339 = vector.broadcast %cst_62 : f32 to vector<4x1xf32>
    %340 = arith.subf %339, %93 : vector<4x1xf32>
    %341 = vector.broadcast %340 : vector<4x1xf32> to vector<4x128xf32>
    %342 = arith.mulf %338, %341 : vector<4x128xf32>
    %343 = arith.addf %337, %342 : vector<4x128xf32>
    %344 = arith.addf %333, %343 : vector<4x128xf32>
    %345 = arith.negf %344 : vector<4x128xf32>
    %346 = math.exp %345 : vector<4x128xf32>
    %cst_63 = arith.constant 1.000000e+00 : f32
    %347 = vector.broadcast %cst_63 : f32 to vector<4x128xf32>
    %348 = arith.addf %347, %346 : vector<4x128xf32>
    %349 = arith.divf %347, %348 : vector<4x128xf32>
    %350 = math.tanh %344 : vector<4x128xf32>
    %351 = vector.extract_strided_slice %349 {offsets = [0, 0], sizes = [4, 32], strides = [1, 1]} : vector<4x128xf32> to vector<4x32xf32>
    %352 = vector.extract_strided_slice %349 {offsets = [0, 32], sizes = [4, 32], strides = [1, 1]} : vector<4x128xf32> to vector<4x32xf32>
    %353 = vector.extract_strided_slice %350 {offsets = [0, 64], sizes = [4, 32], strides = [1, 1]} : vector<4x128xf32> to vector<4x32xf32>
    %354 = vector.extract_strided_slice %349 {offsets = [0, 96], sizes = [4, 32], strides = [1, 1]} : vector<4x128xf32> to vector<4x32xf32>
    %355 = arith.mulf %352, %324 : vector<4x32xf32>
    %356 = arith.mulf %351, %353 : vector<4x32xf32>
    %357 = arith.addf %355, %356 : vector<4x32xf32>
    %358 = math.tanh %357 : vector<4x32xf32>
    %359 = arith.mulf %354, %358 : vector<4x32xf32>
    %360 = vector.extract_strided_slice %359 {offsets = [0, 0], sizes = [2, 32], strides = [1, 1]} : vector<4x32xf32> to vector<2x32xf32>
    %361 = vector.extract_strided_slice %359 {offsets = [2, 0], sizes = [2, 32], strides = [1, 1]} : vector<4x32xf32> to vector<2x32xf32>
    %362 = tpu.concatenate %327, %361 in 1 : vector<2x32xf32>, vector<2x32xf32> -> vector<2x64xf32>
    %363 = tpu.concatenate %360, %328 in 1 : vector<2x32xf32>, vector<2x32xf32> -> vector<2x64xf32>
    %364 = arith.maximumf %362, %363 : vector<2x64xf32>
    %365 = arith.addf %362, %363 : vector<2x64xf32>
    %cst_64 = arith.constant 2.000000e+00 : f32
    %366 = vector.broadcast %cst_64 : f32 to vector<2x64xf32>
    %367 = arith.divf %365, %366 : vector<2x64xf32>
    %368 = tpu.concatenate %364, %367 in 1 : vector<2x64xf32>, vector<2x64xf32> -> vector<2x128xf32>
    %c0_65 = arith.constant 0 : index
    %c0_66 = arith.constant 0 : index
    %369 = vector.load %arg7[%c0_65, %c0_66] : memref<128x32xf32, #tpu.memory_space<vmem>>, vector<128x32xf32>
    %cst_67 = arith.constant dense<0.000000e+00> : vector<2x32xf32>
    %370 = tpu.matmul %368, %369, %cst_67 {dimension_numbers = #tpu.dot_dimension_numbers<[1], [0], [0], [1], [0, 0, 1, 1], [], []>} : vector<2x128xf32>, vector<128x32xf32>, vector<2x32xf32> -> vector<2x32xf32>
    %c0_68 = arith.constant 0 : index
    %c0_69 = arith.constant 0 : index
    %371 = vector.load %arg8[%c0_68, %c0_69] : memref<1x32xf32, #tpu.memory_space<vmem>>, vector<1x32xf32>
    %372 = vector.broadcast %371 : vector<1x32xf32> to vector<2x32xf32>
    %373 = arith.addf %370, %372 : vector<2x32xf32>
    %374 = tpu.concatenate %127, %293 in 1 : vector<2x32xf32>, vector<2x32xf32> -> vector<2x64xf32>
    %375 = tpu.concatenate %160, %260 in 1 : vector<2x32xf32>, vector<2x32xf32> -> vector<2x64xf32>
    %376 = tpu.concatenate %193, %227 in 1 : vector<2x32xf32>, vector<2x32xf32> -> vector<2x64xf32>
    %377 = tpu.concatenate %226, %194 in 1 : vector<2x32xf32>, vector<2x32xf32> -> vector<2x64xf32>
    %378 = tpu.concatenate %259, %161 in 1 : vector<2x32xf32>, vector<2x32xf32> -> vector<2x64xf32>
    %379 = tpu.concatenate %292, %128 in 1 : vector<2x32xf32>, vector<2x32xf32> -> vector<2x64xf32>
    %380 = arith.maximumf %374, %375 : vector<2x64xf32>
    %381 = arith.addf %374, %375 : vector<2x64xf32>
    %cst_70 = arith.constant 5.000000e-01 : f32
    %382 = vector.broadcast %cst_70 : f32 to vector<2x64xf32>
    %383 = arith.mulf %382, %381 : vector<2x64xf32>
    %384 = tpu.concatenate %380, %383 in 1 : vector<2x64xf32>, vector<2x64xf32> -> vector<2x128xf32>
    %385 = arith.maximumf %376, %377 : vector<2x64xf32>
    %386 = arith.addf %376, %377 : vector<2x64xf32>
    %cst_71 = arith.constant 5.000000e-01 : f32
    %387 = vector.broadcast %cst_71 : f32 to vector<2x64xf32>
    %388 = arith.mulf %387, %386 : vector<2x64xf32>
    %389 = tpu.concatenate %385, %388 in 1 : vector<2x64xf32>, vector<2x64xf32> -> vector<2x128xf32>
    %390 = arith.maximumf %378, %379 : vector<2x64xf32>
    %391 = arith.addf %378, %379 : vector<2x64xf32>
    %cst_72 = arith.constant 5.000000e-01 : f32
    %392 = vector.broadcast %cst_72 : f32 to vector<2x64xf32>
    %393 = arith.mulf %392, %391 : vector<2x64xf32>
    %394 = tpu.concatenate %390, %393 in 1 : vector<2x64xf32>, vector<2x64xf32> -> vector<2x128xf32>
    %395 = vector.extract_strided_slice %384 {offsets = [0, 0], sizes = [1, 128], strides = [1, 1]} : vector<2x128xf32> to vector<1x128xf32>
    %396 = vector.extract_strided_slice %389 {offsets = [0, 0], sizes = [1, 128], strides = [1, 1]} : vector<2x128xf32> to vector<1x128xf32>
    %397 = vector.extract_strided_slice %394 {offsets = [0, 0], sizes = [1, 128], strides = [1, 1]} : vector<2x128xf32> to vector<1x128xf32>
    %398 = vector.extract_strided_slice %384 {offsets = [1, 0], sizes = [1, 128], strides = [1, 1]} : vector<2x128xf32> to vector<1x128xf32>
    %399 = vector.extract_strided_slice %389 {offsets = [1, 0], sizes = [1, 128], strides = [1, 1]} : vector<2x128xf32> to vector<1x128xf32>
    %400 = vector.extract_strided_slice %394 {offsets = [1, 0], sizes = [1, 128], strides = [1, 1]} : vector<2x128xf32> to vector<1x128xf32>
    %401 = tpu.concatenate %395, %396, %397, %398, %399, %400 in 0 : vector<1x128xf32>, vector<1x128xf32>, vector<1x128xf32>, vector<1x128xf32>, vector<1x128xf32>, vector<1x128xf32> -> vector<6x128xf32>
    %c0_73 = arith.constant 0 : index
    %c0_74 = arith.constant 0 : index
    %402 = vector.load %arg9[%c0_73, %c0_74] : memref<128x32xf32, #tpu.memory_space<vmem>>, vector<128x32xf32>
    %cst_75 = arith.constant dense<0.000000e+00> : vector<6x32xf32>
    %403 = tpu.matmul %401, %402, %cst_75 {dimension_numbers = #tpu.dot_dimension_numbers<[1], [0], [0], [1], [0, 0, 1, 1], [], []>} : vector<6x128xf32>, vector<128x32xf32>, vector<6x32xf32> -> vector<6x32xf32>
    %c0_76 = arith.constant 0 : index
    %c0_77 = arith.constant 0 : index
    %404 = vector.load %arg10[%c0_76, %c0_77] : memref<1x32xf32, #tpu.memory_space<vmem>>, vector<1x32xf32>
    %405 = vector.broadcast %404 : vector<1x32xf32> to vector<6x32xf32>
    %406 = arith.addf %403, %405 : vector<6x32xf32>
    %c0_78 = arith.constant 0 : index
    %c0_79 = arith.constant 0 : index
    %407 = vector.load %arg11[%c0_78, %c0_79] : memref<32x3xf32, #tpu.memory_space<vmem>>, vector<32x3xf32>
    %c0_80 = arith.constant 0 : index
    %c0_81 = arith.constant 0 : index
    %408 = vector.load %arg12[%c0_80, %c0_81] : memref<32x1xf32, #tpu.memory_space<vmem>>, vector<32x1xf32>
    %c0_82 = arith.constant 0 : index
    %c0_83 = arith.constant 0 : index
    %409 = vector.load %arg13[%c0_82, %c0_83] : memref<64x96xf32, #tpu.memory_space<vmem>>, vector<64x96xf32>
    %c0_84 = arith.constant 0 : index
    %c0_85 = arith.constant 0 : index
    %410 = vector.load %arg14[%c0_84, %c0_85] : memref<64x1xf32, #tpu.memory_space<vmem>>, vector<64x1xf32>
    %c0_86 = arith.constant 0 : index
    %c0_87 = arith.constant 0 : index
    %411 = vector.load %arg15[%c0_86, %c0_87] : memref<1x192xf32, #tpu.memory_space<vmem>>, vector<1x192xf32>
    %c0_88 = arith.constant 0 : index
    %c0_89 = arith.constant 0 : index
    %412 = vector.load %arg16[%c0_88, %c0_89] : memref<1x1xf32, #tpu.memory_space<vmem>>, vector<1x1xf32>
    %413 = vector.extract_strided_slice %406 {offsets = [0, 0], sizes = [1, 32], strides = [1, 1]} : vector<6x32xf32> to vector<1x32xf32>
    %414 = vector.extract_strided_slice %406 {offsets = [1, 0], sizes = [1, 32], strides = [1, 1]} : vector<6x32xf32> to vector<1x32xf32>
    %415 = vector.extract_strided_slice %406 {offsets = [2, 0], sizes = [1, 32], strides = [1, 1]} : vector<6x32xf32> to vector<1x32xf32>
    %416 = vector.extract_strided_slice %406 {offsets = [3, 0], sizes = [1, 32], strides = [1, 1]} : vector<6x32xf32> to vector<1x32xf32>
    %417 = vector.extract_strided_slice %406 {offsets = [4, 0], sizes = [1, 32], strides = [1, 1]} : vector<6x32xf32> to vector<1x32xf32>
    %418 = vector.extract_strided_slice %406 {offsets = [5, 0], sizes = [1, 32], strides = [1, 1]} : vector<6x32xf32> to vector<1x32xf32>
    %419 = tpu.concatenate %413, %414, %415, %416, %417, %418 in 1 : vector<1x32xf32>, vector<1x32xf32>, vector<1x32xf32>, vector<1x32xf32>, vector<1x32xf32>, vector<1x32xf32> -> vector<1x192xf32>
    %420 = vector.extract_strided_slice %419 {offsets = [0, 0], sizes = [1, 96], strides = [1, 1]} : vector<1x192xf32> to vector<1x96xf32>
    %cst_90 = arith.constant 0.000000e+00 : f32
    %421 = vector.broadcast %cst_90 : f32 to vector<1x32xf32>
    %422 = vector.extract_strided_slice %420 {offsets = [0, 0], sizes = [1, 64], strides = [1, 1]} : vector<1x96xf32> to vector<1x64xf32>
    %423 = tpu.concatenate %421, %422 in 1 : vector<1x32xf32>, vector<1x64xf32> -> vector<1x96xf32>
    %424 = vector.extract_strided_slice %419 {offsets = [0, 96], sizes = [1, 96], strides = [1, 1]} : vector<1x192xf32> to vector<1x96xf32>
    %cst_91 = arith.constant 0.000000e+00 : f32
    %425 = vector.broadcast %cst_91 : f32 to vector<1x32xf32>
    %426 = vector.extract_strided_slice %424 {offsets = [0, 0], sizes = [1, 64], strides = [1, 1]} : vector<1x96xf32> to vector<1x64xf32>
    %427 = tpu.concatenate %425, %426 in 1 : vector<1x32xf32>, vector<1x64xf32> -> vector<1x96xf32>
    %428 = tpu.concatenate %423, %427 in 1 : vector<1x96xf32>, vector<1x96xf32> -> vector<1x192xf32>
    %429 = vector.extract_strided_slice %419 {offsets = [0, 0], sizes = [1, 96], strides = [1, 1]} : vector<1x192xf32> to vector<1x96xf32>
    %430 = vector.extract_strided_slice %419 {offsets = [0, 96], sizes = [1, 96], strides = [1, 1]} : vector<1x192xf32> to vector<1x96xf32>
    %431 = tpu.concatenate %429, %430 in 1 : vector<1x96xf32>, vector<1x96xf32> -> vector<1x192xf32>
    %432 = vector.extract_strided_slice %419 {offsets = [0, 0], sizes = [1, 96], strides = [1, 1]} : vector<1x192xf32> to vector<1x96xf32>
    %cst_92 = arith.constant 0.000000e+00 : f32
    %433 = vector.broadcast %cst_92 : f32 to vector<1x32xf32>
    %434 = vector.extract_strided_slice %432 {offsets = [0, 32], sizes = [1, 64], strides = [1, 1]} : vector<1x96xf32> to vector<1x64xf32>
    %435 = tpu.concatenate %434, %433 in 1 : vector<1x64xf32>, vector<1x32xf32> -> vector<1x96xf32>
    %436 = vector.extract_strided_slice %419 {offsets = [0, 96], sizes = [1, 96], strides = [1, 1]} : vector<1x192xf32> to vector<1x96xf32>
    %cst_93 = arith.constant 0.000000e+00 : f32
    %437 = vector.broadcast %cst_93 : f32 to vector<1x32xf32>
    %438 = vector.extract_strided_slice %436 {offsets = [0, 32], sizes = [1, 64], strides = [1, 1]} : vector<1x96xf32> to vector<1x64xf32>
    %439 = tpu.concatenate %438, %437 in 1 : vector<1x64xf32>, vector<1x32xf32> -> vector<1x96xf32>
    %440 = tpu.concatenate %435, %439 in 1 : vector<1x96xf32>, vector<1x96xf32> -> vector<1x192xf32>
    %441 = tpu.concatenate %428, %431, %440 in 0 : vector<1x192xf32>, vector<1x192xf32>, vector<1x192xf32> -> vector<3x192xf32>
    %cst_94 = arith.constant dense<0.000000e+00> : vector<32x192xf32>
    %442 = tpu.matmul %407, %441, %cst_94 {dimension_numbers = #tpu.dot_dimension_numbers<[1], [0], [0], [1], [0, 0, 1, 1], [], []>} : vector<32x3xf32>, vector<3x192xf32>, vector<32x192xf32> -> vector<32x192xf32>
    %443 = vector.broadcast %408 : vector<32x1xf32> to vector<32x192xf32>
    %444 = arith.addf %442, %443 : vector<32x192xf32>
    %cst_95 = arith.constant 0.000000e+00 : f32
    %445 = vector.broadcast %cst_95 : f32 to vector<32x192xf32>
    %446 = arith.maximumf %444, %445 : vector<32x192xf32>
    %447 = vector.extract_strided_slice %446 {offsets = [0, 0], sizes = [32, 96], strides = [1, 1]} : vector<32x192xf32> to vector<32x96xf32>
    %cst_96 = arith.constant 0.000000e+00 : f32
    %448 = vector.broadcast %cst_96 : f32 to vector<32x32xf32>
    %449 = vector.extract_strided_slice %447 {offsets = [0, 0], sizes = [32, 64], strides = [1, 1]} : vector<32x96xf32> to vector<32x64xf32>
    %450 = tpu.concatenate %448, %449 in 1 : vector<32x32xf32>, vector<32x64xf32> -> vector<32x96xf32>
    %451 = vector.extract_strided_slice %446 {offsets = [0, 96], sizes = [32, 96], strides = [1, 1]} : vector<32x192xf32> to vector<32x96xf32>
    %cst_97 = arith.constant 0.000000e+00 : f32
    %452 = vector.broadcast %cst_97 : f32 to vector<32x32xf32>
    %453 = vector.extract_strided_slice %451 {offsets = [0, 0], sizes = [32, 64], strides = [1, 1]} : vector<32x96xf32> to vector<32x64xf32>
    %454 = tpu.concatenate %452, %453 in 1 : vector<32x32xf32>, vector<32x64xf32> -> vector<32x96xf32>
    %455 = tpu.concatenate %450, %454 in 1 : vector<32x96xf32>, vector<32x96xf32> -> vector<32x192xf32>
    %456 = vector.extract_strided_slice %446 {offsets = [0, 0], sizes = [32, 96], strides = [1, 1]} : vector<32x192xf32> to vector<32x96xf32>
    %457 = vector.extract_strided_slice %446 {offsets = [0, 96], sizes = [32, 96], strides = [1, 1]} : vector<32x192xf32> to vector<32x96xf32>
    %458 = tpu.concatenate %456, %457 in 1 : vector<32x96xf32>, vector<32x96xf32> -> vector<32x192xf32>
    %459 = vector.extract_strided_slice %446 {offsets = [0, 0], sizes = [32, 96], strides = [1, 1]} : vector<32x192xf32> to vector<32x96xf32>
    %cst_98 = arith.constant 0.000000e+00 : f32
    %460 = vector.broadcast %cst_98 : f32 to vector<32x32xf32>
    %461 = vector.extract_strided_slice %459 {offsets = [0, 32], sizes = [32, 64], strides = [1, 1]} : vector<32x96xf32> to vector<32x64xf32>
    %462 = tpu.concatenate %461, %460 in 1 : vector<32x64xf32>, vector<32x32xf32> -> vector<32x96xf32>
    %463 = vector.extract_strided_slice %446 {offsets = [0, 96], sizes = [32, 96], strides = [1, 1]} : vector<32x192xf32> to vector<32x96xf32>
    %cst_99 = arith.constant 0.000000e+00 : f32
    %464 = vector.broadcast %cst_99 : f32 to vector<32x32xf32>
    %465 = vector.extract_strided_slice %463 {offsets = [0, 32], sizes = [32, 64], strides = [1, 1]} : vector<32x96xf32> to vector<32x64xf32>
    %466 = tpu.concatenate %465, %464 in 1 : vector<32x64xf32>, vector<32x32xf32> -> vector<32x96xf32>
    %467 = tpu.concatenate %462, %466 in 1 : vector<32x96xf32>, vector<32x96xf32> -> vector<32x192xf32>
    %468 = tpu.concatenate %455, %458, %467 in 0 : vector<32x192xf32>, vector<32x192xf32>, vector<32x192xf32> -> vector<96x192xf32>
    %cst_100 = arith.constant dense<0.000000e+00> : vector<64x192xf32>
    %469 = tpu.matmul %409, %468, %cst_100 {dimension_numbers = #tpu.dot_dimension_numbers<[1], [0], [0], [1], [0, 0, 1, 1], [], []>} : vector<64x96xf32>, vector<96x192xf32>, vector<64x192xf32> -> vector<64x192xf32>
    %470 = vector.broadcast %410 : vector<64x1xf32> to vector<64x192xf32>
    %471 = arith.addf %469, %470 : vector<64x192xf32>
    %cst_101 = arith.constant 0.000000e+00 : f32
    %472 = vector.broadcast %cst_101 : f32 to vector<64x192xf32>
    %473 = arith.maximumf %471, %472 : vector<64x192xf32>
    %474 = vector.extract_strided_slice %473 {offsets = [0, 0], sizes = [64, 32], strides = [1, 1]} : vector<64x192xf32> to vector<64x32xf32>
    %475 = vector.extract_strided_slice %473 {offsets = [0, 32], sizes = [64, 32], strides = [1, 1]} : vector<64x192xf32> to vector<64x32xf32>
    %476 = vector.extract_strided_slice %473 {offsets = [0, 64], sizes = [64, 32], strides = [1, 1]} : vector<64x192xf32> to vector<64x32xf32>
    %477 = tpu.concatenate %474, %475, %476 in 0 : vector<64x32xf32>, vector<64x32xf32>, vector<64x32xf32> -> vector<192x32xf32>
    %478 = vector.extract_strided_slice %473 {offsets = [0, 96], sizes = [64, 32], strides = [1, 1]} : vector<64x192xf32> to vector<64x32xf32>
    %479 = vector.extract_strided_slice %473 {offsets = [0, 128], sizes = [64, 32], strides = [1, 1]} : vector<64x192xf32> to vector<64x32xf32>
    %480 = vector.extract_strided_slice %473 {offsets = [0, 160], sizes = [64, 32], strides = [1, 1]} : vector<64x192xf32> to vector<64x32xf32>
    %481 = tpu.concatenate %478, %479, %480 in 0 : vector<64x32xf32>, vector<64x32xf32>, vector<64x32xf32> -> vector<192x32xf32>
    %482 = tpu.concatenate %477, %481 in 1 : vector<192x32xf32>, vector<192x32xf32> -> vector<192x64xf32>
    %cst_102 = arith.constant dense<0.000000e+00> : vector<1x64xf32>
    %483 = tpu.matmul %411, %482, %cst_102 {dimension_numbers = #tpu.dot_dimension_numbers<[1], [0], [0], [1], [0, 0, 1, 1], [], []>} : vector<1x192xf32>, vector<192x64xf32>, vector<1x64xf32> -> vector<1x64xf32>
    %484 = vector.broadcast %412 : vector<1x1xf32> to vector<1x64xf32>
    %485 = arith.addf %483, %484 : vector<1x64xf32>
    %cst_103 = arith.constant 0.000000e+00 : f32
    %486 = vector.broadcast %cst_103 : f32 to vector<1x64xf32>
    %487 = arith.maximumf %485, %486 : vector<1x64xf32>
    %cst_104 = arith.constant 0.000000e+00 : f32
    %488 = vector.broadcast %cst_104 : f32 to vector<1x1xf32>
    %489 = vector.extract_strided_slice %406 {offsets = [0, 0], sizes = [3, 32], strides = [1, 1]} : vector<6x32xf32> to vector<3x32xf32>
    %490 = vector.extract_strided_slice %373 {offsets = [0, 0], sizes = [1, 32], strides = [1, 1]} : vector<2x32xf32> to vector<1x32xf32>
    %491 = vector.broadcast %490 : vector<1x32xf32> to vector<3x32xf32>
    %492 = arith.mulf %489, %491 : vector<3x32xf32>
    %cst_105 = arith.constant dense<0.000000e+00> : vector<3xf32>
    %493 = vector.multi_reduction <add>, %492, %cst_105 [1] : vector<3x32xf32> to vector<3xf32>
    %494 = vector.shape_cast %493 : vector<3xf32> to vector<3x1xf32>
    %cst_106 = arith.constant dense<0xFF800000> : vector<1xf32>
    %495 = vector.multi_reduction <maximumf>, %494, %cst_106 [0] : vector<3x1xf32> to vector<1xf32>
    %cst_107 = arith.constant 0xFF800000 : f32
    %496 = vector.broadcast %cst_107 : f32 to vector<1xf32>
    %497 = arith.maximumf %496, %495 : vector<1xf32>
    %498 = vector.shape_cast %497 : vector<1xf32> to vector<1x1xf32>
    %499 = vector.broadcast %498 : vector<1x1xf32> to vector<3x1xf32>
    %500 = arith.subf %494, %499 : vector<3x1xf32>
    %501 = math.exp %500 : vector<3x1xf32>
    %cst_108 = arith.constant dense<0.000000e+00> : vector<1xf32>
    %502 = vector.multi_reduction <add>, %501, %cst_108 [0] : vector<3x1xf32> to vector<1xf32>
    %503 = vector.shape_cast %502 : vector<1xf32> to vector<1x1xf32>
    %504 = vector.broadcast %503 : vector<1x1xf32> to vector<3x1xf32>
    %505 = arith.divf %501, %504 : vector<3x1xf32>
    %506 = vector.broadcast %505 : vector<3x1xf32> to vector<3x32xf32>
    %507 = arith.mulf %506, %489 : vector<3x32xf32>
    %cst_109 = arith.constant dense<0.000000e+00> : vector<32xf32>
    %508 = vector.multi_reduction <add>, %507, %cst_109 [0] : vector<3x32xf32> to vector<32xf32>
    %509 = vector.shape_cast %508 : vector<32xf32> to vector<1x32xf32>
    %510 = vector.broadcast %509 : vector<1x32xf32> to vector<3x32xf32>
    %511 = arith.subf %489, %510 : vector<3x32xf32>
    %512 = arith.mulf %511, %511 : vector<3x32xf32>
    %cst_110 = arith.constant dense<0.000000e+00> : vector<3xf32>
    %513 = vector.multi_reduction <add>, %512, %cst_110 [1] : vector<3x32xf32> to vector<3xf32>
    %514 = vector.shape_cast %513 : vector<3xf32> to vector<3x1xf32>
    %cst_111 = arith.constant dense<0.000000e+00> : vector<1xf32>
    %515 = vector.multi_reduction <add>, %514, %cst_111 [0] : vector<3x1xf32> to vector<1xf32>
    %516 = vector.shape_cast %515 : vector<1xf32> to vector<1x1xf32>
    %cst_112 = arith.constant 3.000000e+00 : f32
    %517 = vector.broadcast %cst_112 : f32 to vector<1x1xf32>
    %518 = arith.divf %516, %517 : vector<1x1xf32>
    %519 = arith.addf %488, %518 : vector<1x1xf32>
    %520 = vector.extract_strided_slice %487 {offsets = [0, 0], sizes = [1, 32], strides = [1, 1]} : vector<1x64xf32> to vector<1x32xf32>
    %521 = arith.subf %509, %490 : vector<1x32xf32>
    %522 = arith.mulf %521, %521 : vector<1x32xf32>
    %523 = arith.mulf %520, %522 : vector<1x32xf32>
    %cst_113 = arith.constant dense<0.000000e+00> : vector<1xf32>
    %524 = vector.multi_reduction <add>, %523, %cst_113 [1] : vector<1x32xf32> to vector<1xf32>
    %525 = vector.shape_cast %524 : vector<1xf32> to vector<1x1xf32>
    %cst_114 = arith.constant 0.000000e+00 : f32
    %526 = vector.broadcast %cst_114 : f32 to vector<1x1xf32>
    %527 = arith.subf %526, %525 : vector<1x1xf32>
    %528 = vector.extract_strided_slice %406 {offsets = [3, 0], sizes = [3, 32], strides = [1, 1]} : vector<6x32xf32> to vector<3x32xf32>
    %529 = vector.extract_strided_slice %373 {offsets = [1, 0], sizes = [1, 32], strides = [1, 1]} : vector<2x32xf32> to vector<1x32xf32>
    %530 = vector.broadcast %529 : vector<1x32xf32> to vector<3x32xf32>
    %531 = arith.mulf %528, %530 : vector<3x32xf32>
    %cst_115 = arith.constant dense<0.000000e+00> : vector<3xf32>
    %532 = vector.multi_reduction <add>, %531, %cst_115 [1] : vector<3x32xf32> to vector<3xf32>
    %533 = vector.shape_cast %532 : vector<3xf32> to vector<3x1xf32>
    %cst_116 = arith.constant dense<0xFF800000> : vector<1xf32>
    %534 = vector.multi_reduction <maximumf>, %533, %cst_116 [0] : vector<3x1xf32> to vector<1xf32>
    %cst_117 = arith.constant 0xFF800000 : f32
    %535 = vector.broadcast %cst_117 : f32 to vector<1xf32>
    %536 = arith.maximumf %535, %534 : vector<1xf32>
    %537 = vector.shape_cast %536 : vector<1xf32> to vector<1x1xf32>
    %538 = vector.broadcast %537 : vector<1x1xf32> to vector<3x1xf32>
    %539 = arith.subf %533, %538 : vector<3x1xf32>
    %540 = math.exp %539 : vector<3x1xf32>
    %cst_118 = arith.constant dense<0.000000e+00> : vector<1xf32>
    %541 = vector.multi_reduction <add>, %540, %cst_118 [0] : vector<3x1xf32> to vector<1xf32>
    %542 = vector.shape_cast %541 : vector<1xf32> to vector<1x1xf32>
    %543 = vector.broadcast %542 : vector<1x1xf32> to vector<3x1xf32>
    %544 = arith.divf %540, %543 : vector<3x1xf32>
    %545 = vector.broadcast %544 : vector<3x1xf32> to vector<3x32xf32>
    %546 = arith.mulf %545, %528 : vector<3x32xf32>
    %cst_119 = arith.constant dense<0.000000e+00> : vector<32xf32>
    %547 = vector.multi_reduction <add>, %546, %cst_119 [0] : vector<3x32xf32> to vector<32xf32>
    %548 = vector.shape_cast %547 : vector<32xf32> to vector<1x32xf32>
    %549 = vector.broadcast %548 : vector<1x32xf32> to vector<3x32xf32>
    %550 = arith.subf %528, %549 : vector<3x32xf32>
    %551 = arith.mulf %550, %550 : vector<3x32xf32>
    %cst_120 = arith.constant dense<0.000000e+00> : vector<3xf32>
    %552 = vector.multi_reduction <add>, %551, %cst_120 [1] : vector<3x32xf32> to vector<3xf32>
    %553 = vector.shape_cast %552 : vector<3xf32> to vector<3x1xf32>
    %cst_121 = arith.constant dense<0.000000e+00> : vector<1xf32>
    %554 = vector.multi_reduction <add>, %553, %cst_121 [0] : vector<3x1xf32> to vector<1xf32>
    %555 = vector.shape_cast %554 : vector<1xf32> to vector<1x1xf32>
    %cst_122 = arith.constant 3.000000e+00 : f32
    %556 = vector.broadcast %cst_122 : f32 to vector<1x1xf32>
    %557 = arith.divf %555, %556 : vector<1x1xf32>
    %558 = arith.addf %519, %557 : vector<1x1xf32>
    %559 = vector.extract_strided_slice %487 {offsets = [0, 32], sizes = [1, 32], strides = [1, 1]} : vector<1x64xf32> to vector<1x32xf32>
    %560 = arith.subf %548, %529 : vector<1x32xf32>
    %561 = arith.mulf %560, %560 : vector<1x32xf32>
    %562 = arith.mulf %559, %561 : vector<1x32xf32>
    %cst_123 = arith.constant dense<0.000000e+00> : vector<1xf32>
    %563 = vector.multi_reduction <add>, %562, %cst_123 [1] : vector<1x32xf32> to vector<1xf32>
    %564 = vector.shape_cast %563 : vector<1xf32> to vector<1x1xf32>
    %cst_124 = arith.constant 0.000000e+00 : f32
    %565 = vector.broadcast %cst_124 : f32 to vector<1x1xf32>
    %566 = arith.subf %565, %564 : vector<1x1xf32>
    %567 = tpu.concatenate %527, %566 in 1 : vector<1x1xf32>, vector<1x1xf32> -> vector<1x2xf32>
    %c0_125 = arith.constant 0 : index
    %c0_126 = arith.constant 0 : index
    %568 = vector.load %arg17[%c0_125, %c0_126] : memref<1x2xf32, #tpu.memory_space<vmem>>, vector<1x2xf32>
    tpu.vector_store %arg17[%c0_125, %c0_126], %567 {strides = array<i32>} : memref<1x2xf32, #tpu.memory_space<vmem>>, vector<1x2xf32>,
    %cst_127 = arith.constant 2.000000e+00 : f32
    %569 = vector.broadcast %cst_127 : f32 to vector<1x1xf32>
    %570 = arith.divf %558, %569 : vector<1x1xf32>
    %c0_128 = arith.constant 0 : index
    %c0_129 = arith.constant 0 : index
    %571 = vector.load %arg18[%c0_128, %c0_129] : memref<1x1xf32, #tpu.memory_space<vmem>>, vector<1x1xf32>
    tpu.vector_store %arg18[%c0_128, %c0_129], %570 {strides = array<i32>} : memref<1x1xf32, #tpu.memory_space<vmem>>, vector<1x1xf32>,
    return
  }
}

</mosaic_0001>

<bundles_post_ra>
// kernel: pallas_forward.1
= control target key start
LH: loop header
LB: loop body
LE: loop exit
PB: predicated region body
PF: predicated region fallthrough
CT: control target
= control target key end

     0   :  { %s4934_s0 = inlined_call_operand.vmem [shape: f32[6,32], index: 0, kind: input, shape index: {}]   ;;  %s4935_s1 = inlined_call_operand.vmem [shape: f32[4,32], index: 1, kind: input, shape index: {}]   ;;  %s4936_s2 = inlined_call_operand.vmem [shape: f32[128,32], index: 2, kind: input, shape index: {}]   ;;  %s4937_s3 = inlined_call_operand.vmem [shape: f32[1,32], index: 3, kind: input, shape index: {}]   ;;  %s4938_s4 = inlined_call_operand.vmem [shape: f32[32,256], index: 4, kind: input, shape index: {}]   ;;  %s4939_s5 = inlined_call_operand.vmem [shape: f32[32,256], index: 5, kind: input, shape index: {}]   ;;  %s4940_s6 = inlined_call_operand.vmem [shape: f32[1,256], index: 6, kind: input, shape index: {}]   ;;  %s4941_s7 = inlined_call_operand.vmem [shape: f32[128,32], index: 7, kind: input, shape index: {}]   ;;  %s4942_s8 = inlined_call_operand.vmem [shape: f32[1,32], index: 8, kind: input, shape index: {}]   ;;  %s4943_s9 = inlined_call_operand.vmem [shape: f32[128,32], index: 9, kind: input, shape index: {}]   ;;  %s4944_s10 = inlined_call_operand.vmem [shape: f32[1,32], index: 10, kind: input, shape index: {}]   ;;  %s4945_s11 = inlined_call_operand.vmem [shape: f32[32,3], index: 11, kind: input, shape index: {}]   ;;  %s4946_s12 = inlined_call_operand.vmem [shape: f32[32,1], index: 12, kind: input, shape index: {}]   ;;  %s4947_s13 = inlined_call_operand.vmem [shape: f32[64,96], index: 13, kind: input, shape index: {}]   ;;  %s4948_s14 = inlined_call_operand.vmem [shape: f32[64,1], index: 14, kind: input, shape index: {}]   ;;  %s4949_s15 = inlined_call_operand.vmem [shape: f32[1,192], index: 15, kind: input, shape index: {}]   ;;  %s4950_s16 = inlined_call_operand.<no memory space> [shape: f32[1,1], index: 16, kind: input, shape index: {}]   ;;  %s4951_s17 = inlined_call_operand.hbm [shape: f32[1,2], index: 17, kind: output, shape index: {0}]   ;;  %s4952_s18 = inlined_call_operand.hbm [shape: f32[1,1], index: 18, kind: output, shape index: {1}]  }
   0x1   :  { %4954 = sst [smem:[#allocation9_spill]] %s4934_s0  ;;  %v24_v0 = vstv %s4950_s16 }
   0x2   :  { %4955 = sst [smem:[#allocation10_spill]] %s4935_s1  ;;  %25 = vst [vmem:[#allocation2] sm:$0x1] %v24_v0 }
   0x3   :  { %4956 = sst [smem:[#allocation11_spill]] %s4936_s2 }
   0x4   :  { %26 = vsyncpa [#allocation4], 0  ;;  %s4957_s0 = sld [smem:[#allocation10_spill]]  ;;  %vm98_vm0 = vcmask 261120   ;;  %v3839_v2 = vmov 0.0   ;;  %vm3840_vm1 = vmmov 0  }
   0x5   :  { %3138 = vmatprep.subr.mxu0 %v3839_v2  ;;  %3140 = vmatprep.mubr.msk.f32.mxu0 %vm3840_vm1, %v3839_v2 }
   0xa   :  { %v3949_v1 = vld [vmem:[%s4957_s0] sm:$0xf] }
   0xb   :  { %27 = vsyncpa [#allocation6], 0  ;;  %3139 = vmatpush3.xpose.msk.msra.mxu0 %vm98_vm0, %v3949_v1  ;;  %s4958_s1 = sld [smem:[#allocation9_spill]]  ;;  %v423_v4 = vrot.slane %v3949_v1, 2  ;;  %3143 = vmatprep.subr.mxu1 %v3839_v2  ;;  %vm175_vm2 = vcmask 13312   ;;  %vm296_vm3 = vcmask 41984  }
   0xc   :  { %3153 = vmatprep.subr.mxu0 %v3839_v2  ;;  %3145 = vmatprep.mubr.msk.f32.mxu1 %vm3840_vm1, %v3839_v2  ;;  %vm191_vm4 = vcmask 1041408   ;;  %vm312_vm5 = vcmask 1045504   ;;  %vm187_vm6 = vcmask 15360   ;;  %vm308_vm7 = vcmask 48128   ;;  %s4959_s22 = sld [smem:[#allocation11_spill]]  ;;  %s3841_s19 = smov 32  }
   0xd   :  { %3144 = vmatpush3.msk.msra.mxu1 %vm191_vm4, %v3949_v1  ;;  %s3843_s24 = smov 64   ;;  %vm401_vm8 = vcmask 523264   ;;  %vm403_vm9 = vcmask 785408   ;;  %vm935_vm12 = vcmask 1040384   ;;  %vm938_vm13 = vcmask 1042432  }
   0xe   :  { %3148 = vmatprep.subr.mxu1 %v3839_v2  ;;  %vm1970_vm14 = vcmask 1043456   ;;  %vm1972_vm15 = vcmask 1044480  }
  0x11   :  { %v3959_v3 = vld [vmem:[%s4958_s1] sm:$0x3f]  ;;  %s3842_s1 = smov 96  }
  0x12   :  { %3141 = vmatmul.mubr.msk.f32.vlgmr.msra.gmra.mrb[0].mxu0 %vm98_vm0, %v3959_v3  ;;  %v64_v49 = vld [vmem:[%s4959_s22] sm:$0xff]  ;;  %v65_v50 = vld [vmem:[%s4959_s22 + $0x8] sm:$0xff]  ;;  %v66_v51 = vld [vmem:[%s4959_s22 + $0x10] sm:$0xff] }
  0x13   :  { %3154 = vmatpush3.xpose.msk.msra.mxu0 %vm98_vm0, %v423_v4  ;;  %3155 = vmatprep.mubr.msk.f32.mxu0 %vm3840_vm1, %v3839_v2  ;;  %v3273_v52 = vpack.c.bf16 %v65_v50, %v64_v49  ;;  %v67_v53 = vld [vmem:[%s4959_s22 + $0x18] sm:$0xff]  ;;  %v68_v55 = vld [vmem:[%s4959_s22 + $0x20] sm:$0xff]  ;;  %v69_v56 = vld [vmem:[%s4959_s22 + $0x28] sm:$0xff] }
  0x14   :  { %3163 = vmatprep.subr.mxu0 %v3839_v2  ;;  %v3277_v54 = vpack.c.bf16 %v67_v53, %v66_v51  ;;  %v3281_v57 = vpack.c.bf16 %v69_v56, %v68_v55  ;;  %v70_v58 = vld [vmem:[%s4959_s22 + $0x30] sm:$0xff]  ;;  %v71_v59 = vld [vmem:[%s4959_s22 + $0x38] sm:$0xff]  ;;  %v72_v63 = vld [vmem:[%s4959_s22 + $0x40] sm:$0xff] }
  0x15   :  { %v3285_v60 = vpack.c.bf16 %v71_v59, %v70_v58  ;;  %v73_v0 = vld [vmem:[%s4959_s22 + $0x48] sm:$0xff] }
  0x16   :  { %3156 = vmatmul.mubr.msk.f32.vlgmr.msra.gmra.mrb[2].mxu0 %vm98_vm0, %v3959_v3 }
  0x17   :  { %3165 = vmatprep.mubr.msk.f32.mxu0 %vm3840_vm1, %v3839_v2  ;;  %3164 = vmatpush3.msk.msra.mxu0 %vm312_vm5, %v3959_v3 }
  0xe5   :  { %v171_v5 = vpop.f32.mrb[0].mxu0 }
  0xe6   :  { %264 = vxpose.xlu0.b32.start.end [1/1] (short) (narrow) %v171_v5, 8  ;;  %v3142_v6 = vpop.f32.mrb[1].mxu0  ;;  %v176_v7 = vsel %vm175_vm2, %v171_v5, -inf }
  0xe7   :  { %177 = vmax.xlane.f32.xlu1 %v176_v7 }
  0xe9   :  { %v492_v8 = vpop.f32.mrb[2].mxu0 }
  0xea   :  { %582 = vxpose.xlu0.b32.start.end [1/1] (short) (narrow) %v492_v8, 8  ;;  %v3157_v9 = vpop.f32.mrb[3].mxu0  ;;  %v496_v14 = vsel %vm175_vm2, %v492_v8, -inf }
  0xeb   :  { %v74_v9 = vld [vmem:[%s4959_s22 + $0x50] sm:$0xff] }
 0x166   :  { %v280_v10 = vpop.trf.xlu0 }
 0x167   :  { %v297_v11 = vsel %vm296_vm3, %v280_v10, -inf }
 0x168   :  { %298 = vmax.xlane.f32.xlu1 %v297_v11 }
 0x16a   :  { %v598_v12 = vpop.trf.xlu0 }
 0x16b   :  { %v614_v13 = vsel %vm296_vm3, %v598_v12, -inf }
 0x16c   :  { %615 = vmax.xlane.f32.xlu0 %v614_v13  ;;  %497 = vmax.xlane.f32.xlu1 %v496_v14 }
 0x174   :  { %v178_v15 = vpop.xlane.xlu1 %177 }
 0x175   :  { %v179_v16 = vsub.f32 %v171_v5, %v178_v15 }
 0x177   :  { %v180_v17 = vmul.f32 1.442695, %v179_v16 }
 0x179   :  { %3703 = vpow2.f32 %v180_v17 }
 0x183   :  { %v3704_v18 = vpop.eup %3703 }
 0x184   :  { %v182_v19 = vsel %vm175_vm2, %v3704_v18, 0.0 }
 0x185   :  { %183 = vadd.xlane.f32.xlu1 %v182_v19 }
 0x1f5   :  { %v299_v20 = vpop.xlane.xlu1 %298 }
 0x1f6   :  { %v300_v21 = vsub.f32 %v280_v10, %v299_v20  ;;  %v75_v10 = vld [vmem:[%s4959_s22 + $0x58] sm:$0xff] }
 0x1f7   :  { %v3293_v11 = vpack.c.bf16 %v75_v10, %v74_v9 }
 0x1f8   :  { %v301_v22 = vmul.f32 1.442695, %v300_v21 }
 0x1f9   :  { %v616_v23 = vpop.xlane.xlu0 %615  ;;  %v498_v24 = vpop.xlane.xlu1 %497 }
 0x1fa   :  { %3705 = vpow2.f32 %v301_v22  ;;  %v617_v25 = vsub.f32 %v598_v12, %v616_v23  ;;  %v499_v26 = vsub.f32 %v492_v8, %v498_v24 }
 0x1fc   :  { %v618_v27 = vmul.f32 1.442695, %v617_v25  ;;  %v500_v28 = vmul.f32 1.442695, %v499_v26  ;;  %v76_v25 = vld [vmem:[%s4959_s22 + $0x60] sm:$0xff]  ;;  %v77_v26 = vld [vmem:[%s4959_s22 + $0x68] sm:$0xff] }
 0x1fe   :  { %3707 = vpow2.f32 %v618_v27 }
 0x1ff   :  { %3709 = vpow2.f32 %v500_v28  ;;  %v3297_v28 = vpack.c.bf16 %v77_v26, %v76_v25  ;;  %v94_v26 = vld [vmem:[%s4939_s5 + $0x28] sm:$0xff] }
 0x204   :  { %v3706_v29 = vpop.eup %3705 }
 0x205   :  { %v303_v30 = vsel %vm296_vm3, %v3706_v29, 0.0 }
 0x206   :  { %304 = vadd.xlane.f32.xlu1 %v303_v30 }
 0x208   :  { %v3708_v31 = vpop.eup %3707 }
 0x209   :  { %v620_v32 = vsel %vm296_vm3, %v3708_v31, 0.0  ;;  %v3710_v33 = vpop.eup %3709  ;;  %vm2863_vm3 = vcmask 256000  }
 0x20a   :  { %621 = vadd.xlane.f32.xlu1 %v620_v32  ;;  %v502_v34 = vsel %vm175_vm2, %v3710_v33, 0.0  ;;  %vm2922_vm2 = vcmask 259075  }
 0x20e   :  { %503 = vadd.xlane.f32.xlu1 %v502_v34  ;;  %v78_v34 = vld [vmem:[%s4959_s22 + $0x70] sm:$0xff] }
 0x212   :  { %v184_v35 = vpop.xlane.xlu1 %183 }
 0x213   :  { %3711 = vrcp.f32 %v184_v35  ;;  %v79_v35 = vld [vmem:[%s4959_s22 + $0x78] sm:$0xff] }
 0x21d   :  { %v3712_v36 = vpop.eup %3711 }
 0x21e   :  { %v186_v37 = vmul.f32 %v3712_v36, %v3704_v18  ;;  %v3301_v36 = vpack.c.bf16 %v79_v35, %v78_v34  ;;  %v3040_v35 = vld [vmem:[%s4937_s3] ss:$0 sm:$0xff] }
 0x220   :  { %3146 = vmatmul.mubr.msk.f32.vlgmr.msra.gmra.mrb[0].mxu1 %vm187_vm6, %v186_v37  ;;  %v82_v37 = vld [vmem:[%s4938_s4 + $0x8] sm:$0xff] }
 0x221   :  { %3149 = vmatpush3.msk.msra.mxu1 %vm312_vm5, %v3959_v3  ;;  %3150 = vmatprep.mubr.msk.f32.mxu1 %vm3840_vm1, %v3839_v2 }
 0x222   :  { %3158 = vmatprep.subr.mxu1 %v3839_v2 }
 0x293   :  { %v305_v38 = vpop.xlane.xlu1 %304 }
 0x294   :  { %3713 = vrcp.f32 %v305_v38  ;;  %v84_v38 = vld [vmem:[%s4938_s4 + $0x18] sm:$0xff] }
 0x297   :  { %v622_v39 = vpop.xlane.xlu1 %621 }
 0x298   :  { %3715 = vrcp.f32 %v622_v39  ;;  %v3305_v39 = vpack.c.bf16 %v84_v38, %v82_v37 }
 0x29a   :  { %3306 = vmatprep.subr.bf16.mxu0 %v3305_v39 }
 0x29b   :  { %v504_v40 = vpop.xlane.xlu1 %503 }
 0x29c   :  { %3717 = vrcp.f32 %v504_v40 }
 0x29e   :  { %v3714_v41 = vpop.eup %3713 }
 0x29f   :  { %v307_v42 = vmul.f32 %v3714_v41, %v3706_v29 }
 0x2a1   :  { %3151 = vmatmul.mubr.msk.f32.vlgmr.msra.gmra.mrb[2].mxu1 %vm308_vm7, %v307_v42 }
 0x2a2   :  { %v3716_v43 = vpop.eup %3715  ;;  %3159 = vmatpush3.msk.msra.mxu1 %vm191_vm4, %v423_v4  ;;  %3160 = vmatprep.mubr.msk.f32.mxu1 %vm3840_vm1, %v3839_v2  ;;  %v3289_v4 = vpack.c.bf16 %v73_v0, %v72_v63 }
 0x2a3   :  { %v624_v44 = vmul.f32 %v3716_v43, %v3708_v31  ;;  %3274 = vmatprep.subr.bf16.mxu1 %v3273_v52 }
 0x2a5   :  { %3166 = vmatmul.mubr.msk.f32.vlgmr.msra.gmra.mrb[4].mxu0 %vm308_vm7, %v624_v44 }
 0x2a6   :  { %v3718_v45 = vpop.eup %3717  ;;  %912 = vmatprep.mubr.f32.mxu0 %v3839_v2 }
 0x2a7   :  { %v506_v46 = vmul.f32 %v3718_v45, %v3710_v33 }
 0x2a9   :  { %3161 = vmatmul.mubr.msk.f32.vlgmr.msra.gmra.mrb[4].mxu1 %vm187_vm6, %v506_v46 }
 0x2aa   :  { %3276 = vmatpush3.bf16.msra.mxu1 %v3273_v52 }
 0x2ab   :  { %3278 = vmatprep.subr.bf16.mxu1 %v3277_v54 }
 0x2ae   :  { %3280 = vmatpush3.bf16.msra.mxu1 %v3277_v54 }
 0x2af   :  { %3282 = vmatprep.subr.bf16.mxu1 %v3281_v57 }
 0x2b2   :  { %3284 = vmatpush3.bf16.msra.mxu1 %v3281_v57 }
 0x2b3   :  { %3286 = vmatprep.subr.bf16.mxu1 %v3285_v60 }
 0x2b6   :  { %3288 = vmatpush3.bf16.msra.mxu1 %v3285_v60 }
 0x2b7   :  { %3290 = vmatprep.subr.bf16.mxu1 %v3289_v4 }
 0x2ba   :  { %3292 = vmatpush3.bf16.msra.mxu1 %v3289_v4 }
 0x2bb   :  { %3294 = vmatprep.subr.bf16.mxu1 %v3293_v11 }
 0x2be   :  { %3296 = vmatpush3.bf16.msra.mxu1 %v3293_v11  ;;  %v81_v11 = vld [vmem:[%s4938_s4] sm:$0xff] }
 0x2bf   :  { %3298 = vmatprep.subr.bf16.mxu1 %v3297_v28 }
 0x2c2   :  { %3300 = vmatpush3.bf16.msra.mxu1 %v3297_v28 }
 0x2c3   :  { %3302 = vmatprep.subr.bf16.mxu1 %v3301_v36 }
 0x2c6   :  { %3304 = vmatpush3.bf16.msra.mxu1 %v3301_v36 }
 0x2f3   :  { %v260_v47 = vpop.f32.mrb[0].mxu1 }
 0x2f4   :  { %v3147_v48 = vpop.f32.mrb[1].mxu1  ;;  %v385_v12 = vsub.f32 %v3959_v3, %v260_v47  ;;  %v387_v16 = vmul.f32 %v260_v47, %v3959_v3 }
 0x2f6   :  { %v386_v29 = vand.u32 2147483647, %v385_v12  ;;  %v83_v12 = vld [vmem:[%s4938_s4 + $0x10] sm:$0xff] }
 0x374   :  { %v381_v61 = vpop.f32.mrb[2].mxu1 }
 0x375   :  { %v3152_v62 = vpop.f32.mrb[3].mxu1  ;;  %v405_v5 = vsub.f32 %v3949_v1, %v381_v61  ;;  %v407_v18 = vmul.f32 %v381_v61, %v3949_v1 }
 0x377   :  { %v406_v17 = vand.u32 2147483647, %v405_v5 }
 0x378   :  { %v694_v6 = vpop.f32.mrb[4].mxu0 }
 0x379   :  { %v717_v7 = vrot.slane %v694_v6, 6  ;;  %v3167_v8 = vpop.f32.mrb[5].mxu0 }
 0x37b   :  { %v719_v13 = vsub.f32 %v3949_v1, %v717_v7  ;;  %v721_v14 = vmul.f32 %v717_v7, %v3949_v1  ;;  %v3491_v15 = vpack.i.bf16 %v717_v7, %v381_v61 }
 0x37c   :  { %v578_v19 = vpop.f32.mrb[4].mxu1 }
 0x37d   :  { %v720_v20 = vand.u32 2147483647, %v719_v13  ;;  %v3486_v21 = vpack.i.bf16 %v578_v19, %v260_v47  ;;  %v698_v22 = vsub.f32 %v3959_v3, %v578_v19  ;;  %v700_v23 = vmul.f32 %v578_v19, %v3959_v3  ;;  %v3162_v24 = vpop.f32.mrb[5].mxu1 }
 0x37e   :  { %v3496_v27 = vpack.i.bf16 %v721_v14, %v407_v18  ;;  %v3307_v13 = vpack.c.bf16 %v83_v12, %v81_v11  ;;  %v86_v14 = vld [vmem:[%s4938_s4 + $0x28] sm:$0xff]  ;;  %v87_v18 = vld [vmem:[%s4938_s4 + $0x30] sm:$0xff] }
 0x37f   :  { %v699_v30 = vand.u32 2147483647, %v698_v22  ;;  %3487 = vrot.lane.b32.xlu1 %v3486_v21, %s3841_s19  ;;  %v3506_v31 = vpack.i.bf16 %v720_v20, %v406_v17  ;;  %v3511_v32 = vpack.i.bf16 %v700_v23, %v387_v16  ;;  %v85_v17 = vld [vmem:[%s4938_s4 + $0x20] sm:$0xff]  ;;  %v90_v20 = vld [vmem:[%s4939_s5 + $0x8] sm:$0xff]  ;;  %v92_v21 = vld [vmem:[%s4939_s5 + $0x18] sm:$0xff] }
 0x380   :  { %3497 = vrot.lane.b32.xlu0 %v3496_v27, %s3842_s1  ;;  %3308 = vmatpush1.bf16.msra.mxu0 %v3307_v13  ;;  %v3311_v19 = vpack.c.bf16 %v87_v18, %v85_v17  ;;  %v4115_v22 = vpack.c.bf16 %v92_v21, %v90_v20  ;;  %v89_v23 = vld [vmem:[%s4939_s5] sm:$0xff]  ;;  %v91_v24 = vld [vmem:[%s4939_s5 + $0x10] sm:$0xff]  ;;  %v96_v27 = vld [vmem:[%s4939_s5 + $0x38] sm:$0xff] }
 0x381   :  { %v3501_v33 = vpack.i.bf16 %v699_v30, %v386_v29  ;;  %v4123_v25 = vpack.c.bf16 %v91_v24, %v89_v23  ;;  %v4134_v28 = vpack.c.bf16 %v96_v27, %v94_v26  ;;  %v93_v29 = vld [vmem:[%s4939_s5 + $0x20] sm:$0xff]  ;;  %v95_v30 = vld [vmem:[%s4939_s5 + $0x30] sm:$0xff] }
 0x382   :  { %3338 = vmatprep.subr.bf16.mxu1 %v4115_v22 }
 0x383   :  { %3492 = vrot.lane.b32.xlu1 %v3491_v15, %s3841_s19  ;;  %v88_v15 = vld [vmem:[%s4938_s4 + $0x38] sm:$0xff] }
 0x384   :  { %v3309_v16 = vpack.c.bf16 %v88_v15, %v86_v14 }
 0x386   :  { %3310 = vmatprep.subr.bf16.mxu0 %v3309_v16 }
 0x387   :  { %3502 = vrot.lane.b32.xlu1 %v3501_v33, %s3843_s24  ;;  %3312 = vmatpush1.bf16.msra.mxu0 %v3311_v19  ;;  %v3844_v33 = vmov 0  }
 0x388   :  { %3314 = vmatprep.subr.bf16.mxu0 %v4115_v22  ;;  %3516 = vset.pattern.permute.xlu1 %v3844_v33 }
 0x389   :  { %3522 = vset.pattern.permute.xlu0 %v3844_v33 }
 0x38b   :  { %3507 = vrot.lane.b32.xlu1 %v3506_v31, %s3843_s24  ;;  %v4142_v31 = vpack.c.bf16 %v95_v30, %v93_v29 }
 0x38f   :  { %3512 = vrot.lane.b32.xlu1 %v3511_v32, %s3842_s1  ;;  %v925_v32 = vsel %vm191_vm4, 1.0, %v3839_v2 }
 0x390   :  { %v1020_v34 = vsub.f32 1.0, %v925_v32 }
 0x393   :  { %1016 = vperm.xlu1 %3516, %v925_v32  }
 0x397   :  { %1023 = vperm.xlu1 %3516, %v1020_v34  }
 0x3f1   :  { %v3488_v40 = vpop.permute.xlu1 %3487 }
 0x3f2   :  { %v3498_v43 = vpop.permute.xlu0 %3497  ;;  %v3490_v46 = vunpack.i.h.bf16 %v3488_v40  ;;  %v3489_v47 = vunpack.i.l.bf16 %v3488_v40 }
 0x3f3   :  { %v3500_v49 = vunpack.i.h.bf16 %v3498_v43  ;;  %v3499_v50 = vunpack.i.l.bf16 %v3498_v43 }
 0x3f4   :  { %v713_v59 = vsel %vm98_vm0, %v3959_v3, %v3490_v46  ;;  %v400_v60 = vsel %vm98_vm0, %v3959_v3, %v3489_v47  ;;  %v97_v47 = vld [vmem:[%s4940_s6] sm:$0x3] }
 0x3f5   :  { %v3493_v41 = vpop.permute.xlu1 %3492 }
 0x3f6   :  { %v3495_v44 = vunpack.i.h.bf16 %v3493_v41  ;;  %v3494_v45 = vunpack.i.l.bf16 %v3493_v41 }
 0x3f8   :  { %v733_v53 = vsel %vm98_vm0, %v3949_v1, %v3495_v44  ;;  %v420_v54 = vsel %vm98_vm0, %v3949_v1, %v3494_v45  ;;  %v832_v44 = vlaneseq }
 0x3f9   :  { %v3503_v42 = vpop.permute.xlu1 %3502 }
 0x3fa   :  { %v3505_v55 = vunpack.i.h.bf16 %v3503_v42  ;;  %v3504_v56 = vunpack.i.l.bf16 %v3503_v42  ;;  %v833_v45 = vshrl.u32 %v832_v44, 7 }
 0x3fc   :  { %v402_v6 = vsel %vm401_vm8, %v400_v60, %v3504_v56  ;;  %v714_v7 = vsel %vm401_vm8, %v713_v59, %v3505_v55  ;;  %v4166_v46 = vsub.s32 0, %v833_v45 }
 0x3fd   :  { %v3508_v48 = vpop.permute.xlu1 %3507 }
 0x3fe   :  { %v3510_v51 = vunpack.i.h.bf16 %v3508_v48  ;;  %v3509_v52 = vunpack.i.l.bf16 %v3508_v48  ;;  %v4171_v48 = vsub.s32 1, %v833_v45 }
 0x400   :  { %v734_v57 = vsel %vm401_vm8, %v733_v53, %v3510_v51  ;;  %v421_v58 = vsel %vm401_vm8, %v420_v54, %v3509_v52 }
 0x401   :  { %v3513_v61 = vpop.permute.xlu1 %3512  ;;  %v422_v62 = vsel %vm403_vm9, %v421_v58, %v3499_v50  ;;  %v735_v63 = vsel %vm403_vm9, %v734_v57, %v3500_v49  ;;  %v835_v49 = vrot.slane %v97_v47, %v4166_v46  ;;  %v839_v50 = vrot.slane %v97_v47, %v4171_v48 }
 0x402   :  { %v3515_v0 = vunpack.i.h.bf16 %v3513_v61  ;;  %v3514_v4 = vunpack.i.l.bf16 %v3513_v61  ;;  %v737_v1 = vrot.slane %v422_v62, 2  ;;  %v740_v5 = vrot.slane %v735_v63, 4 }
 0x404   :  { %v404_v8 = vsel %vm403_vm9, %v402_v6, %v3514_v4  ;;  %v715_v9 = vsel %vm403_vm9, %v714_v7, %v3515_v0 }
 0x405   :  { %v742_v10 = vsel %vm312_vm5, %v404_v8, %v737_v1  ;;  %v743_v3 = vsel %vm312_vm5, %v715_v9, %v740_v5  ;;  %vm2998_vm5 = vcmask 0  }
 0x406   :  { %3200 = vmatprep.mubr.f32.mxu1 %v742_v10 }
 0x407   :  { %3201 = vmatmul.mubr.f32.vlgmr.msra.gmra.mrb[6].mxu1 %v743_v3 }
 0x408   :  { %1358 = vmatprep.mubr.f32.mxu1 %v3839_v2  ;;  %3340 = vmatpush1.bf16.msra.mxu1 %v4123_v25 }
 0x409   :  { %3342 = vmatprep.subr.bf16.mxu1 %v4134_v28 }
 0x40c   :  { %3344 = vmatpush1.bf16.msra.mxu1 %v4142_v31 }
 0x40d   :  { %3354 = vmatprep.subr.bf16.mxu1 %v4115_v22 }
 0x412   :  { %v4179_v55 = vpop.permute.xlu1 %1016 }
 0x416   :  { %v4196_v19 = vpop.permute.xlu1 %1023 }
 0x4da   :  { %v3202_v36 = vpop.f32.mrb[6].mxu1 }
 0x4db   :  { %v816_v37 = vpop.f32.mrb[7].mxu1  ;;  %v822_v38 = vadd.f32 %v3202_v36, %v3040_v35 }
 0x4dc   :  { %v817_v39 = vadd.f32 %v3040_v35, %v816_v37 }
 0x4dd   :  { %v828_v41 = vmul.f32 0.01, %v822_v38  ;;  %vm826_vm11 = vcmp.gt.f32.partialorder %v822_v38, 0.0 }
 0x4de   :  { %vm825_vm10 = vcmp.gt.f32.partialorder %v817_v39, 0.0  ;;  %v827_v40 = vmul.f32 0.01, %v817_v39 }
 0x4df   :  { %v830_v43 = vsel %vm826_vm11, %v822_v38, %v828_v41 }
 0x4e0   :  { %v829_v42 = vsel %vm825_vm10, %v817_v39, %v827_v40 }
 0x4e1   :  { %3041 = vmatmul.mubr.msk.f32.vlgmr.msra.gmra.mrb[6].mxu0 %vm98_vm0, %v829_v42 }
 0x4e2   :  { %3316 = vmatpush1.bf16.msra.mxu0 %v4123_v25  ;;  %918 = vmatprep.mubr.f32.mxu0 %v3839_v2 }
 0x4e3   :  { %3318 = vmatprep.subr.bf16.mxu0 %v4134_v28 }
 0x4e5   :  { %3042 = vmatmul.mubr.msk.f32.gmra.mrb[8].mxu0 %vm98_vm0, %v830_v43 }
 0x4e6   :  { %3320 = vmatpush1.bf16.msra.mxu0 %v4142_v31  ;;  %1007 = vmatprep.mubr.f32.mxu0 %v3839_v2 }
 0x4e7   :  { %3322 = vmatprep.subr.bf16.mxu0 %v4115_v22 }
 0x4e9   :  { %1008 = vmatmul.mubr.f32.vlgmr.msra.gmra.mrb[10].mxu0 %v3839_v2 }
 0x4ea   :  { %3324 = vmatpush1.bf16.msra.mxu0 %v4123_v25  ;;  %1132 = vmatprep.mubr.f32.mxu0 %v3839_v2 }
 0x4eb   :  { %3326 = vmatprep.subr.bf16.mxu0 %v4134_v28 }
 0x4ee   :  { %3328 = vmatpush1.bf16.msra.mxu0 %v4142_v31 }
 0x4ef   :  { %3330 = vmatprep.subr.bf16.mxu0 %v4115_v22 }
 0x5b4   :  { %v914_v51 = vpop.f32.mrb[6].mxu0 }
 0x5b5   :  { %v4175_v52 = vadd.f32 %v914_v51, %v835_v49  ;;  %v916_v53 = vpop.f32.mrb[7].mxu0 }
 0x5b6   :  { %v4177_v54 = vadd.f32 %v916_v53, %v839_v50 }
 0x5b7   :  { %v1623_v56 = vrot.slane %v4175_v52, 6  ;;  %v1054_v57 = vrot.slane %v4175_v52, 1  ;;  %v1167_v58 = vrot.slane %v4175_v52, 2  ;;  %v1280_v63 = vrot.slane %v4175_v52, 3 }
 0x5b8   :  { %v920_v59 = vpop.f32.mrb[8].mxu0  ;;  %v930_v60 = vrot.slane %v4177_v54, 3  ;;  %v1627_v61 = vrot.slane %v4177_v54, 5  ;;  %v1056_v62 = vrot.slane %v4177_v54, 2  ;;  %v1171_v1 = vrot.slane %v4177_v54, 1 }
 0x5b9   :  { %v921_v0 = vadd.f32 %v920_v59, %v835_v49  ;;  %v922_v4 = vpop.f32.mrb[9].mxu0  ;;  %v1393_v5 = vrot.slane %v4175_v52, 4  ;;  %v1397_v6 = vrot.slane %v4177_v54, 7  ;;  %v1508_v8 = vrot.slane %v4175_v52, 5 }
 0x5ba   :  { %v923_v7 = vadd.f32 %v922_v4, %v839_v50  ;;  %v1512_v9 = vrot.slane %v4177_v54, 6  ;;  %v1659_v10 = vrot.slane %v4175_v52, 7 }
 0x5bb   :  { %v927_v3 = vrot.slane %v921_v0, 7  ;;  %v1625_v11 = vrot.slane %v921_v0, 5  ;;  %v1060_v12 = vsel %vm935_vm12, %v1054_v57, %v921_v0  ;;  %v1169_v13 = vrot.slane %v921_v0, 1 }
 0x5bc   :  { %v1009_v14 = vpop.f32.mrb[10].mxu0  ;;  %v933_v15 = vrot.slane %v923_v7, 2  ;;  %v1629_v16 = vrot.slane %v923_v7, 4  ;;  %v1058_v17 = vrot.slane %v923_v7, 1  ;;  %v1061_v18 = vsel %vm191_vm4, %v1060_v12, %v1056_v62 }
 0x5bd   :  { %v1019_v20 = vmul.f32 %v4179_v55, %v1009_v14  ;;  %v936_v21 = vsel %vm935_vm12, %v4175_v52, %v927_v3  ;;  %v1011_v23 = vpop.f32.mrb[11].mxu0  ;;  %v1631_v24 = vsel %vm935_vm12, %v1623_v56, %v1625_v11  ;;  %v1173_v26 = vsel %vm935_vm12, %v1167_v58, %v1169_v13 }
 0x5be   :  { %v937_v27 = vsel %vm191_vm4, %v936_v21, %v930_v60  ;;  %v1026_v29 = vmul.f32 %v4196_v19, %v1011_v23  ;;  %v1632_v30 = vsel %vm191_vm4, %v1631_v24, %v1627_v61  ;;  %v1062_v32 = vsel %vm938_vm13, %v1061_v18, %v1058_v17 }
 0x5bf   :  { %v939_v33 = vsel %vm938_vm13, %v937_v27, %v933_v15  ;;  %v1633_v34 = vsel %vm938_vm13, %v1632_v30, %v1629_v16  ;;  %v1174_v35 = vsel %vm191_vm4, %v1173_v26, %v1171_v1  ;;  %v1282_v36 = vrot.slane %v921_v0, 2 }
 0x5c0   :  { %v1027_v37 = vadd.f32 %v1026_v29, %v1019_v20  ;;  %v4211_v38 = vsel %vm938_vm13, %v1174_v35, %v923_v7  ;;  %v1284_v39 = vrot.slane %v923_v7, 7  ;;  %v1395_v40 = vrot.slane %v921_v0, 3 }
 0x5c1   :  { %v1286_v41 = vsel %vm935_vm12, %v1280_v63, %v1282_v36  ;;  %v1399_v42 = vrot.slane %v923_v7, 6  ;;  %v1510_v43 = vrot.slane %v921_v0, 4  ;;  %v1514_v44 = vrot.slane %v923_v7, 5 }
 0x5c2   :  { %v1028_v45 = vadd.f32 %v1027_v37, %v939_v33  ;;  %v4214_v47 = vadd.f32 %v1633_v34, %v1027_v37  ;;  %v1287_v49 = vsel %vm191_vm4, %v1286_v41, %v4177_v54  ;;  %v1401_v50 = vsel %vm935_vm12, %v1393_v5, %v1395_v40 }
 0x5c3   :  { %v4220_v51 = vsel %vm938_vm13, %v1287_v49, %v1284_v39  ;;  %v1402_v52 = vsel %vm191_vm4, %v1401_v50, %v1397_v6  ;;  %v1516_v53 = vsel %vm935_vm12, %v1508_v8, %v1510_v43  ;;  %v1661_v56 = vrot.slane %v921_v0, 6 }
 0x5c4   :  { %3719 = vtanh.f32 %v1028_v45  ;;  %v4225_v57 = vsel %vm938_vm13, %v1402_v52, %v1399_v42  ;;  %v1663_v58 = vrot.slane %v4177_v54, 4  ;;  %v1517_v59 = vsel %vm191_vm4, %v1516_v53, %v1512_v9 }
 0x5c5   :  { %v1665_v60 = vrot.slane %v923_v7, 3  ;;  %v1667_v61 = vsel %vm935_vm12, %v1659_v10, %v1661_v56  ;;  %v4231_v62 = vsel %vm938_vm13, %v1517_v59, %v1514_v44  ;;  %v3043_v1 = vmul.f32 -1.442695, %v1028_v45 }
 0x5c6   :  { %v1668_v63 = vsel %vm191_vm4, %v1667_v61, %v1663_v58 }
 0x5c7   :  { %v4235_v4 = vsel %vm938_vm13, %v1668_v63, %v1665_v60  ;;  %3721 = vpow2.f32 %v3043_v1 }
 0x5ce   :  { %v3720_v0 = vpop.eup %3719 }
 0x5cf   :  { %1038 = vrot.lane.b32.xlu1 %v3720_v0, %s3843_s24 }
 0x5d1   :  { %v3722_v5 = vpop.eup %3721 }
 0x5d2   :  { %v1032_v54 = vadd.f32 1.0, %v3722_v5 }
 0x5d4   :  { %3723 = vrcp.f32 %v1032_v54 }
 0x5de   :  { %v3724_v6 = vpop.eup %3723 }
 0x5df   :  { %v1036_v9 = vmul.f32 0.0, %v3724_v6 }
 0x641   :  { %v1039_v7 = vpop.permute.xlu1 %1038 }
 0x642   :  { %v1041_v8 = vmul.f32 %v3724_v6, %v1039_v7 }
 0x644   :  { %1043 = vrot.lane.b32.xlu1 %v1041_v8, %s3841_s19 }
 0x6b6   :  { %v1044_v10 = vpop.permute.xlu1 %1043 }
 0x6b7   :  { %v1046_v3 = vadd.f32 %v1044_v10, %v1036_v9 }
 0x6b9   :  { %3725 = vtanh.f32 %v1046_v3 }
 0x6c3   :  { %v3726_v11 = vpop.eup %3725 }
 0x6c4   :  { %1049 = vrot.lane.b32.xlu0 %v3726_v11, %s3843_s24 }
 0x736   :  { %v1050_v12 = vpop.permute.xlu0 %1049 }
 0x737   :  { %v4240_v13 = vmul.f32 %v3724_v6, %v1050_v12 }
 0x739   :  { %1064 = vrot.lane.b32.xlu1 %v4240_v13, %s3841_s19 }
 0x7ab   :  { %v4244_v14 = vpop.permute.xlu1 %1064 }
 0x7ac   :  { %3044 = vmatmul.mubr.msk.f32.vlgmr.msra.gmra.mrb[12].mxu0 %vm98_vm0, %v4244_v14 }
 0x7ad   :  { %3332 = vmatpush1.bf16.msra.mxu0 %v4123_v25  ;;  %1245 = vmatprep.mubr.f32.mxu0 %v3839_v2 }
 0x7ae   :  { %3334 = vmatprep.subr.bf16.mxu0 %v4134_v28 }
 0x7b1   :  { %3336 = vmatpush1.bf16.msra.mxu0 %v4142_v31 }
 0x7b2   :  { %3346 = vmatprep.subr.bf16.mxu0 %v4115_v22 }
 0x87f   :  { %v1134_v15 = vpop.f32.mrb[12].mxu0 }
 0x880   :  { %v1139_v16 = vmul.f32 %v1134_v15, %v4179_v55  ;;  %v1136_v17 = vpop.f32.mrb[13].mxu0 }
 0x881   :  { %v1140_v18 = vmul.f32 %v1136_v17, %v4196_v19 }
 0x883   :  { %v1141_v20 = vadd.f32 %v1140_v18, %v1139_v16 }
 0x885   :  { %v1142_v21 = vadd.f32 %v1141_v20, %v1062_v32 }
 0x887   :  { %3727 = vtanh.f32 %v1142_v21  ;;  %v3045_v24 = vmul.f32 -1.442695, %v1142_v21 }
 0x889   :  { %3729 = vpow2.f32 %v3045_v24 }
 0x891   :  { %v3728_v23 = vpop.eup %3727 }
 0x892   :  { %1152 = vrot.lane.b32.xlu0 %v3728_v23, %s3843_s24 }
 0x893   :  { %v3730_v26 = vpop.eup %3729 }
 0x894   :  { %v1146_v27 = vadd.f32 1.0, %v3730_v26 }
 0x896   :  { %3731 = vrcp.f32 %v1146_v27 }
 0x8a0   :  { %v3732_v29 = vpop.eup %3731 }
 0x8a1   :  { %v1150_v34 = vmul.f32 %v3732_v29, %v1046_v3 }
 0x904   :  { %v1153_v30 = vpop.permute.xlu0 %1152 }
 0x905   :  { %v1155_v33 = vmul.f32 %v3732_v29, %v1153_v30 }
 0x907   :  { %1157 = vrot.lane.b32.xlu1 %v1155_v33, %s3841_s19 }
 0x979   :  { %v1158_v35 = vpop.permute.xlu1 %1157 }
 0x97a   :  { %v1160_v36 = vadd.f32 %v1158_v35, %v1150_v34 }
 0x97c   :  { %3733 = vtanh.f32 %v1160_v36 }
 0x986   :  { %v3734_v37 = vpop.eup %3733 }
 0x987   :  { %1163 = vrot.lane.b32.xlu0 %v3734_v37, %s3843_s24 }
 0x9f9   :  { %v1164_v32 = vpop.permute.xlu0 %1163 }
 0x9fa   :  { %v4258_v39 = vmul.f32 %v3732_v29, %v1164_v32 }
 0x9fc   :  { %1177 = vrot.lane.b32.xlu1 %v4258_v39, %s3841_s19 }
 0xa6e   :  { %v4262_v40 = vpop.permute.xlu1 %1177 }
 0xa6f   :  { %3046 = vmatmul.mubr.msk.f32.vlgmr.msra.gmra.mrb[14].mxu0 %vm98_vm0, %v4262_v40 }
 0xa70   :  { %3348 = vmatpush1.bf16.msra.mxu0 %v4123_v25  ;;  %1473 = vmatprep.mubr.f32.mxu0 %v3839_v2 }
 0xa71   :  { %3350 = vmatprep.subr.bf16.mxu0 %v4134_v28 }
 0xa74   :  { %3352 = vmatpush1.bf16.msra.mxu0 %v4142_v31 }
 0xa75   :  { %3362 = vmatprep.subr.bf16.mxu0 %v4115_v22 }
 0xb42   :  { %v1247_v41 = vpop.f32.mrb[14].mxu0 }
 0xb43   :  { %v1252_v42 = vmul.f32 %v1247_v41, %v4179_v55  ;;  %v1249_v43 = vpop.f32.mrb[15].mxu0 }
 0xb44   :  { %v1253_v44 = vmul.f32 %v1249_v43, %v4196_v19 }
 0xb46   :  { %v1254_v45 = vadd.f32 %v1253_v44, %v1252_v42 }
 0xb48   :  { %v1255_v49 = vadd.f32 %v1254_v45, %v4211_v38 }
 0xb4a   :  { %3735 = vtanh.f32 %v1255_v49  ;;  %v3047_v52 = vmul.f32 -1.442695, %v1255_v49 }
 0xb4c   :  { %3737 = vpow2.f32 %v3047_v52 }
 0xb54   :  { %v3736_v50 = vpop.eup %3735 }
 0xb55   :  { %1265 = vrot.lane.b32.xlu0 %v3736_v50, %s3843_s24  ;;  %v3054_v50 = vmul.f32 -1.442695, %v4214_v47 }
 0xb56   :  { %v3738_v53 = vpop.eup %3737 }
 0xb57   :  { %v1259_v56 = vadd.f32 1.0, %v3738_v53 }
 0xb59   :  { %3739 = vrcp.f32 %v1259_v56 }
 0xb63   :  { %v3740_v58 = vpop.eup %3739 }
 0xb64   :  { %v1263_v60 = vmul.f32 %v3740_v58, %v1160_v36 }
 0xbc7   :  { %v1266_v22 = vpop.permute.xlu0 %1265 }
 0xbc8   :  { %v1268_v59 = vmul.f32 %v3740_v58, %v1266_v22 }
 0xbca   :  { %1270 = vrot.lane.b32.xlu1 %v1268_v59, %s3841_s19 }
 0xc3c   :  { %v1271_v61 = vpop.permute.xlu1 %1270 }
 0xc3d   :  { %v1273_v63 = vadd.f32 %v1271_v61, %v1263_v60 }
 0xc3f   :  { %3741 = vtanh.f32 %v1273_v63 }
 0xc49   :  { %v3742_v0 = vpop.eup %3741 }
 0xc4a   :  { %1276 = vrot.lane.b32.xlu0 %v3742_v0, %s3843_s24 }
 0xcbc   :  { %v1277_v38 = vpop.permute.xlu0 %1276 }
 0xcbd   :  { %v4277_v1 = vmul.f32 %v3740_v58, %v1277_v38 }
 0xcbf   :  { %1290 = vrot.lane.b32.xlu1 %v4277_v1, %s3841_s19 }
 0xd31   :  { %v4281_v5 = vpop.permute.xlu1 %1290 }
 0xd32   :  { %3048 = vmatmul.mubr.msk.f32.vlgmr.msra.gmra.mrb[8].mxu1 %vm98_vm0, %v4281_v5 }
 0xd33   :  { %3356 = vmatpush1.bf16.msra.mxu1 %v4123_v25  ;;  %1588 = vmatprep.mubr.f32.mxu1 %v3839_v2 }
 0xd34   :  { %3358 = vmatprep.subr.bf16.mxu1 %v4134_v28 }
 0xd37   :  { %3360 = vmatpush1.bf16.msra.mxu1 %v4142_v31 }
 0xe05   :  { %v1360_v54 = vpop.f32.mrb[8].mxu1 }
 0xe06   :  { %v1365_v6 = vmul.f32 %v1360_v54, %v4179_v55  ;;  %v1362_v7 = vpop.f32.mrb[9].mxu1 }
 0xe07   :  { %v1366_v8 = vmul.f32 %v1362_v7, %v4196_v19 }
 0xe09   :  { %v1367_v9 = vadd.f32 %v1366_v8, %v1365_v6  ;;  %v1917_v8 = vrot.slane %v4258_v39, 2 }
 0xe0b   :  { %v1368_v10 = vadd.f32 %v1367_v9, %v4220_v51  ;;  %v1925_v9 = vrot.slane %v4240_v13, 2 }
 0xe0d   :  { %3743 = vtanh.f32 %v1368_v10  ;;  %v3049_v11 = vmul.f32 -1.442695, %v1368_v10 }
 0xe0f   :  { %3745 = vpow2.f32 %v3049_v11 }
 0xe17   :  { %v3744_v3 = vpop.eup %3743 }
 0xe18   :  { %1378 = vrot.lane.b32.xlu0 %v3744_v3, %s3843_s24 }
 0xe19   :  { %v3746_v12 = vpop.eup %3745 }
 0xe1a   :  { %v1372_v15 = vadd.f32 1.0, %v3746_v12 }
 0xe1c   :  { %3747 = vrcp.f32 %v1372_v15 }
 0xe26   :  { %v3748_v16 = vpop.eup %3747 }
 0xe27   :  { %v1376_v20 = vmul.f32 %v3748_v16, %v1273_v63 }
 0xe8a   :  { %v1379_v17 = vpop.permute.xlu0 %1378 }
 0xe8b   :  { %v1381_v18 = vmul.f32 %v3748_v16, %v1379_v17 }
 0xe8d   :  { %1383 = vrot.lane.b32.xlu1 %v1381_v18, %s3841_s19 }
 0xeff   :  { %v1384_v21 = vpop.permute.xlu1 %1383 }
 0xf00   :  { %v1386_v23 = vadd.f32 %v1384_v21, %v1376_v20 }
 0xf02   :  { %3749 = vtanh.f32 %v1386_v23 }
 0xf0c   :  { %v3750_v24 = vpop.eup %3749 }
 0xf0d   :  { %1389 = vrot.lane.b32.xlu0 %v3750_v24, %s3843_s24 }
 0xf7f   :  { %v1390_v51 = vpop.permute.xlu0 %1389 }
 0xf80   :  { %v1392_v26 = vmul.f32 %v3748_v16, %v1390_v51 }
 0xf82   :  { %1405 = vrot.lane.b32.xlu1 %v1392_v26, %s3841_s19  ;;  %v1905_v7 = vrot.slane %v1392_v26, 2 }
 0xff4   :  { %v4296_v27 = vpop.permute.xlu1 %1405 }
 0xff5   :  { %3050 = vmatmul.mubr.msk.f32.vlgmr.msra.gmra.mrb[16].mxu0 %vm98_vm0, %v4296_v27 }
 0xff6   :  { %3364 = vmatpush1.bf16.msra.mxu0 %v4123_v25  ;;  %1739 = vmatprep.mubr.f32.mxu0 %v3839_v2 }
 0xff7   :  { %3366 = vmatprep.subr.bf16.mxu0 %v4134_v28 }
 0xffa   :  { %3368 = vmatpush1.bf16.msra.mxu0 %v4142_v31 }
0x10c8   :  { %v1475_v29 = vpop.f32.mrb[16].mxu0 }
0x10c9   :  { %v1480_v30 = vmul.f32 %v1475_v29, %v4179_v55  ;;  %v1477_v33 = vpop.f32.mrb[17].mxu0 }
0x10ca   :  { %v1481_v34 = vmul.f32 %v1477_v33, %v4196_v19 }
0x10cc   :  { %v1482_v35 = vadd.f32 %v1481_v34, %v1480_v30 }
0x10ce   :  { %v1483_v36 = vadd.f32 %v1482_v35, %v4225_v57 }
0x10d0   :  { %3751 = vtanh.f32 %v1483_v36  ;;  %v3051_v25 = vmul.f32 -1.442695, %v1483_v36 }
0x10d2   :  { %3753 = vpow2.f32 %v3051_v25 }
0x10da   :  { %v3752_v37 = vpop.eup %3751 }
0x10db   :  { %1493 = vrot.lane.b32.xlu0 %v3752_v37, %s3843_s24 }
0x10dc   :  { %v3754_v32 = vpop.eup %3753 }
0x10dd   :  { %v1487_v41 = vadd.f32 1.0, %v3754_v32  ;;  %v1911_v32 = vrot.slane %v4277_v1, 2 }
0x10df   :  { %3755 = vrcp.f32 %v1487_v41 }
0x10e9   :  { %v3756_v28 = vpop.eup %3755 }
0x10ea   :  { %v1491_v43 = vmul.f32 %v3756_v28, %v1386_v23 }
0x114d   :  { %v1494_v31 = vpop.permute.xlu0 %1493 }
0x114e   :  { %v1496_v42 = vmul.f32 %v3756_v28, %v1494_v31 }
0x1150   :  { %1498 = vrot.lane.b32.xlu1 %v1496_v42, %s3841_s19  ;;  %v3845_v42 = vmov 0.0|0.0  }
0x1151   :  { %3393 = vmatprep.subr.bf16.mxu0 %v3845_v42  ;;  %3369 = vmatprep.subr.bf16.mxu1 %v3845_v42 }
0x11c2   :  { %v1499_v44 = vpop.permute.xlu1 %1498 }
0x11c3   :  { %v1501_v45 = vadd.f32 %v1499_v44, %v1491_v43  ;;  %v1977_v43 = vld [vmem:[%s4943_s9 + $0x18] sm:$0xff] }
0x11c5   :  { %3757 = vtanh.f32 %v1501_v45 }
0x11c6   :  { %3759 = vtanh.f32 %v4214_v47 }
0x11c7   :  { %3761 = vpow2.f32 %v3054_v50 }
0x11cf   :  { %v3758_v57 = vpop.eup %3757 }
0x11d0   :  { %1504 = vrot.lane.b32.xlu0 %v3758_v57, %s3843_s24  ;;  %v3760_v49 = vpop.eup %3759 }
0x11d1   :  { %v3762_v52 = vpop.eup %3761 }
0x11d2   :  { %v1638_v53 = vadd.f32 1.0, %v3762_v52  ;;  %v1978_v52 = vld [vmem:[%s4943_s9 + $0x20] sm:$0xff] }
0x11d4   :  { %1644 = vrot.lane.b32.xlu0 %v3760_v49, %s3843_s24  ;;  %3763 = vrcp.f32 %v1638_v53  ;;  %v1979_v53 = vld [vmem:[%s4943_s9 + $0x28] sm:$0xff] }
0x11de   :  { %v3764_v22 = vpop.eup %3763 }
0x11df   :  { %v1642_v47 = vmul.f32 0.0, %v3764_v22 }
0x1242   :  { %v1505_v56 = vpop.permute.xlu0 %1504 }
0x1243   :  { %v1507_v58 = vmul.f32 %v3756_v28, %v1505_v56 }
0x1245   :  { %1520 = vrot.lane.b32.xlu1 %v1507_v58, %s3841_s19  ;;  %v1899_v10 = vrot.slane %v1507_v58, 2  ;;  %v1981_v58 = vld [vmem:[%s4943_s9 + $0x38] sm:$0xff] }
0x1246   :  { %v1645_v59 = vpop.permute.xlu0 %1644 }
0x1247   :  { %v1647_v60 = vmul.f32 %v3764_v22, %v1645_v59  ;;  %v1982_v59 = vld [vmem:[%s4943_s9 + $0x40] sm:$0xff] }
0x1249   :  { %1649 = vrot.lane.b32.xlu1 %v1647_v60, %s3841_s19  ;;  %v1983_v60 = vld [vmem:[%s4943_s9 + $0x48] sm:$0xff] }
0x12b7   :  { %v4315_v61 = vpop.permute.xlu1 %1520 }
0x12b8   :  { %3052 = vmatmul.mubr.msk.f32.vlgmr.msra.gmra.mrb[10].mxu1 %vm98_vm0, %v4315_v61 }
0x12b9   :  { %3235 = vmatprep.mubr.msk.f32.mxu1 %vm3840_vm1, %v3839_v2 }
0x12bb   :  { %v1650_v63 = vpop.permute.xlu1 %1649 }
0x12bc   :  { %v4321_v0 = vadd.f32 %v1650_v63, %v1642_v47  ;;  %v3406_v47 = vpack.c.bf16 %v1983_v60, %v1982_v59  ;;  %v1984_v63 = vld [vmem:[%s4943_s9 + $0x50] sm:$0xff]  ;;  %v3058_v60 = vld [vmem:[%s4944_s10] ss:$0 sm:$0xff] }
0x12be   :  { %3765 = vtanh.f32 %v4321_v0 }
0x12c8   :  { %v3766_v38 = vpop.eup %3765 }
0x12c9   :  { %1655 = vrot.lane.b32.xlu1 %v3766_v38, %s3843_s24  ;;  %v1985_v38 = vld [vmem:[%s4943_s9 + $0x58] sm:$0xff] }
0x133b   :  { %v1656_v54 = vpop.permute.xlu1 %1655 }
0x133c   :  { %v4325_v6 = vmul.f32 %v3764_v22, %v1656_v54  ;;  %v3409_v54 = vpack.c.bf16 %v1985_v38, %v1984_v63 }
0x133e   :  { %1671 = vrot.lane.b32.xlu1 %v4325_v6, %s3841_s19 }
0x1342   :  { %1906 = vrot.lane.b32.xlu1 %v1905_v7, %s3843_s24 }
0x1346   :  { %1918 = vrot.lane.b32.xlu1 %v1917_v8, %s3843_s24 }
0x134a   :  { %1926 = vrot.lane.b32.xlu1 %v1925_v9, %s3843_s24 }
0x134e   :  { %1900 = vrot.lane.b32.xlu1 %v1899_v10, %s3843_s24 }
0x138b   :  { %v1590_v3 = vpop.f32.mrb[10].mxu1 }
0x138c   :  { %v1595_v11 = vmul.f32 %v1590_v3, %v4179_v55  ;;  %v1592_v12 = vpop.f32.mrb[11].mxu1 }
0x138d   :  { %v1596_v15 = vmul.f32 %v1592_v12, %v4196_v19 }
0x138f   :  { %v1597_v16 = vadd.f32 %v1596_v15, %v1595_v11 }
0x1391   :  { %v1598_v17 = vadd.f32 %v1597_v16, %v4231_v62 }
0x1393   :  { %3767 = vtanh.f32 %v1598_v17  ;;  %v3053_v13 = vmul.f32 -1.442695, %v1598_v17  ;;  %v1986_v17 = vld [vmem:[%s4943_s9 + $0x60] sm:$0xff] }
0x1395   :  { %3769 = vpow2.f32 %v3053_v13  ;;  %v1988_v13 = vld [vmem:[%s4943_s9 + $0x70] sm:$0xff] }
0x139d   :  { %v3768_v39 = vpop.eup %3767 }
0x139e   :  { %1608 = vrot.lane.b32.xlu0 %v3768_v39, %s3843_s24  ;;  %v1987_v39 = vld [vmem:[%s4943_s9 + $0x68] sm:$0xff] }
0x139f   :  { %v3770_v20 = vpop.eup %3769 }
0x13a0   :  { %v1602_v21 = vadd.f32 1.0, %v3770_v20  ;;  %v1989_v20 = vld [vmem:[%s4943_s9 + $0x78] sm:$0xff] }
0x13a2   :  { %3771 = vrcp.f32 %v1602_v21 }
0x13ac   :  { %v3772_v23 = vpop.eup %3771 }
0x13ad   :  { %v1606_v26 = vmul.f32 %v3772_v23, %v1501_v45 }
0x13b0   :  { %v4339_v18 = vpop.permute.xlu1 %1671 }
0x13b1   :  { %3055 = vmatmul.mubr.msk.f32.vlgmr.msra.gmra.mrb[18].mxu0 %vm98_vm0, %v4339_v18 }
0x13b2   :  { %3270 = vmatprep.mubr.msk.f32.mxu0 %vm3840_vm1, %v3839_v2  ;;  %vm2177_vm1 = vcmask 23552  }
0x13b4   :  { %v1907_v31 = vpop.permute.xlu1 %1906 }
0x13b5   :  { %v4371_v57 = vsel %vm98_vm0, %v4281_v5, %v1907_v31  ;;  %v3400_v5 = vpack.c.bf16 %v1979_v53, %v1978_v52 }
0x13b8   :  { %v1919_v7 = vpop.permute.xlu1 %1918 }
0x13b9   :  { %v1921_v3 = vsel %vm98_vm0, %v4315_v61, %v1919_v7  ;;  %v3412_v61 = vpack.c.bf16 %v1987_v39, %v1986_v17  ;;  %v1800_v17 = vld [vmem:[%s4941_s7 + $0x10] sm:$0xff] }
0x13bc   :  { %v1927_v8 = vpop.permute.xlu1 %1926 }
0x13c0   :  { %v1901_v12 = vpop.permute.xlu1 %1900 }
0x1410   :  { %v1609_v24 = vpop.permute.xlu0 %1608 }
0x1411   :  { %v1611_v62 = vmul.f32 %v3772_v23, %v1609_v24 }
0x1413   :  { %1613 = vrot.lane.b32.xlu0 %v1611_v62, %s3841_s19  ;;  %v1903_v62 = vsel %vm98_vm0, %v4262_v40, %v1901_v12  ;;  %v1798_v12 = vld [vmem:[%s4941_s7] sm:$0xff] }
0x1484   :  { %v1741_v51 = vpop.f32.mrb[18].mxu0 }
0x1485   :  { %v1746_v29 = vmul.f32 %v1741_v51, %v4179_v55  ;;  %v1743_v30 = vpop.f32.mrb[19].mxu0  ;;  %v1614_v33 = vpop.permute.xlu0 %1613  ;;  %v1974_v55 = vld [vmem:[%s4943_s9] sm:$0xff] }
0x1486   :  { %v1747_v34 = vmul.f32 %v1743_v30, %v4196_v19  ;;  %v1616_v35 = vadd.f32 %v1614_v33, %v1606_v26  ;;  %v1975_v19 = vld [vmem:[%s4943_s9 + $0x8] sm:$0xff]  ;;  %v3415_v26 = vpack.c.bf16 %v1989_v20, %v1988_v13 }
0x1487   :  { %v3394_v1 = vpack.c.bf16 %v1975_v19, %v1974_v55 }
0x1488   :  { %v1748_v36 = vadd.f32 %v1747_v34, %v1746_v29  ;;  %3773 = vtanh.f32 %v1616_v35 }
0x1489   :  { %3395 = vmatpush3.bf16.msra.mxu0 %v3394_v1 }
0x148a   :  { %v4349_v37 = vadd.f32 %v1748_v36, %v4235_v4  ;;  %v1976_v4 = vld [vmem:[%s4943_s9 + $0x10] sm:$0xff]  ;;  %3396 = vmatprep.subr.bf16.mxu0 %v3845_v42 }
0x148b   :  { %v3397_v45 = vpack.c.bf16 %v1977_v43, %v1976_v4 }
0x148c   :  { %3775 = vtanh.f32 %v4349_v37  ;;  %v3056_v40 = vmul.f32 -1.442695, %v4349_v37 }
0x148d   :  { %3398 = vmatpush3.bf16.msra.mxu0 %v3397_v45 }
0x148e   :  { %3399 = vmatprep.subr.bf16.mxu0 %v3845_v42  ;;  %3777 = vpow2.f32 %v3056_v40 }
0x1491   :  { %3401 = vmatpush3.bf16.msra.mxu0 %v3400_v5 }
0x1492   :  { %v3774_v25 = vpop.eup %3773  ;;  %3402 = vmatprep.subr.bf16.mxu0 %v3845_v42 }
0x1493   :  { %1619 = vrot.lane.b32.xlu0 %v3774_v25, %s3843_s24 }
0x1496   :  { %v3776_v35 = vpop.eup %3775 }
0x1497   :  { %1912 = vrot.lane.b32.xlu0 %v1911_v32, %s3843_s24 }
0x1505   :  { %v1620_v41 = vpop.permute.xlu0 %1619 }
0x1506   :  { %v1622_v28 = vmul.f32 %v3772_v23, %v1620_v41 }
0x1508   :  { %1922 = vrot.lane.b32.xlu0 %v1622_v28, %s3841_s19  ;;  %v1893_v49 = vrot.slane %v1622_v28, 2 }
0x1509   :  { %v1913_v44 = vpop.permute.xlu0 %1912 }
0x150a   :  { %v4375_v50 = vsel %vm98_vm0, %v4296_v27, %v1913_v44  ;;  %v1980_v27 = vld [vmem:[%s4943_s9 + $0x30] sm:$0xff] }
0x150b   :  { %v1938_v56 = vmax.f32 %v4371_v57, %v4375_v50  ;;  %v3403_v22 = vpack.c.bf16 %v1981_v58, %v1980_v27  ;;  %v1939_v9 = vadd.f32 %v4375_v50, %v4371_v57 }
0x150c   :  { %1894 = vrot.lane.b32.xlu0 %v1893_v49, %s3843_s24 }
0x150d   :  { %3404 = vmatpush3.bf16.msra.mxu0 %v3403_v22  ;;  %v1940_v21 = vmul.f32 0.5, %v1939_v9 }
0x150e   :  { %3405 = vmatprep.subr.bf16.mxu0 %v3845_v42 }
0x1511   :  { %3407 = vmatpush3.bf16.msra.mxu0 %v3406_v47 }
0x1512   :  { %3408 = vmatprep.subr.bf16.mxu0 %v3845_v42 }
0x1515   :  { %3410 = vmatpush3.bf16.msra.mxu0 %v3409_v54 }
0x1516   :  { %3411 = vmatprep.subr.bf16.mxu0 %v3845_v42 }
0x1519   :  { %3413 = vmatpush3.bf16.msra.mxu0 %v3412_v61 }
0x151a   :  { %3414 = vmatprep.subr.bf16.mxu0 %v3845_v42 }
0x151d   :  { %3416 = vmatpush3.bf16.msra.mxu0 %v3415_v26 }
0x157a   :  { %v1923_v10 = vpop.permute.xlu0 %1922 }
0x157b   :  { %v1929_v11 = vsel %vm98_vm0, %v1923_v10, %v1927_v8 }
0x157c   :  { %v1946_v15 = vmax.f32 %v1921_v3, %v1929_v11  ;;  %v1947_v16 = vadd.f32 %v1929_v11, %v1921_v3  ;;  %v1784_v11 = vrot.slane %v4325_v6, 2  ;;  %v1801_v6 = vld [vmem:[%s4941_s7 + $0x18] sm:$0xff] }
0x157d   :  { %v3373_v39 = vpack.c.bf16 %v1801_v6, %v1800_v17 }
0x157e   :  { %v1948_v23 = vmul.f32 0.5, %v1947_v16  ;;  %v1895_v24 = vpop.permute.xlu0 %1894 }
0x157f   :  { %v1897_v51 = vsel %vm98_vm0, %v4244_v14, %v1895_v24  ;;  %v3778_v14 = vpop.eup %3777  ;;  %v1804_v24 = vld [vmem:[%s4941_s7 + $0x30] sm:$0xff] }
0x1580   :  { %v1930_v29 = vmax.f32 %v1897_v51, %v1903_v62  ;;  %v1931_v30 = vadd.f32 %v1903_v62, %v1897_v51  ;;  %v3517_v33 = vpack.i.bf16 %v1948_v23, %v1940_v21  ;;  %v1753_v36 = vadd.f32 1.0, %v3778_v14  ;;  %v1802_v21 = vld [vmem:[%s4941_s7 + $0x20] sm:$0xff]  ;;  %v1803_v23 = vld [vmem:[%s4941_s7 + $0x28] sm:$0xff]  ;;  %v1805_v51 = vld [vmem:[%s4941_s7 + $0x38] sm:$0xff] }
0x1581   :  { %v3376_v62 = vpack.c.bf16 %v1803_v23, %v1802_v21  ;;  %v1806_v14 = vld [vmem:[%s4941_s7 + $0x40] sm:$0xff]  ;;  %v2068_v23 = vld [vmem:[%s4945_s11 + $0x8] sm:$0xff] }
0x1582   :  { %v1932_v34 = vmul.f32 0.5, %v1931_v30  ;;  %3518 = vrot.lane.b32.xlu0 %v3517_v33, %s3843_s24  ;;  %3779 = vrcp.f32 %v1753_v36  ;;  %v1807_v36 = vld [vmem:[%s4941_s7 + $0x48] sm:$0xff] }
0x1584   :  { %1934 = vrot.lane.b32.xlu1 %v1932_v34, %s3843_s24  ;;  %v3379_v34 = vpack.c.bf16 %v1805_v51, %v1804_v24  ;;  %v2069_v24 = vld [vmem:[%s4945_s11 + $0x10] sm:$0xff] }
0x1586   :  { %1759 = vrot.lane.b32.xlu0 %v3776_v35, %s3843_s24 }
0x158c   :  { %v3780_v31 = vpop.eup %3779 }
0x158d   :  { %v1757_v27 = vmul.f32 %v3780_v31, %v4321_v0 }
0x15f4   :  { %v3519_v25 = vpop.permute.xlu0 %3518 }
0x15f5   :  { %v3521_v32 = vunpack.i.h.bf16 %v3519_v25  ;;  %v3520_v41 = vunpack.i.l.bf16 %v3519_v25  ;;  %v3382_v25 = vpack.c.bf16 %v1807_v36, %v1806_v14 }
0x15f6   :  { %v1935_v28 = vpop.permute.xlu1 %1934 }
0x15f7   :  { %v1945_v55 = vsel %vm401_vm8, %v1938_v56, %v3520_v41  ;;  %v1953_v19 = vsel %vm401_vm8, %v1946_v15, %v3521_v32  ;;  %v1937_v4 = vsel %vm401_vm8, %v1930_v29, %v1935_v28  ;;  %v1799_v15 = vld [vmem:[%s4941_s7 + $0x8] sm:$0xff]  ;;  %v1808_v32 = vld [vmem:[%s4941_s7 + $0x50] sm:$0xff]  ;;  %v1809_v41 = vld [vmem:[%s4941_s7 + $0x58] sm:$0xff] }
0x15f8   :  { %v1955_v1 = vrot.slane %v1945_v55, 7  ;;  %v1958_v37 = vrot.slane %v1953_v19, 6  ;;  %v1760_v43 = vpop.permute.xlu0 %1759  ;;  %v1961_v45 = vrot.slane %v1937_v4, 6  ;;  %v1963_v52 = vrot.slane %v1945_v55, 5  ;;  %v1810_v55 = vld [vmem:[%s4941_s7 + $0x60] sm:$0xff] }
0x15f9   :  { %v1762_v44 = vmul.f32 %v3780_v31, %v1760_v43  ;;  %v1965_v57 = vrot.slane %v1953_v19, 4  ;;  %v3370_v16 = vpack.c.bf16 %v1799_v15, %v1798_v12  ;;  %v3385_v28 = vpack.c.bf16 %v1809_v41, %v1808_v32  ;;  %v1811_v19 = vld [vmem:[%s4941_s7 + $0x68] sm:$0xff] }
0x15fa   :  { %v1967_v49 = vsel %vm935_vm12, %v1937_v4, %v1955_v1  ;;  %v3388_v4 = vpack.c.bf16 %v1811_v19, %v1810_v55  ;;  %v1813_v1 = vld [vmem:[%s4941_s7 + $0x78] sm:$0xff] }
0x15fb   :  { %v1968_v53 = vsel %vm191_vm4, %v1967_v49, %v1958_v37  ;;  %1764 = vrot.lane.b32.xlu1 %v1762_v44, %s3841_s19  ;;  %3371 = vmatpush3.bf16.msra.mxu1 %v3370_v16 }
0x15fc   :  { %v1969_v50 = vsel %vm938_vm13, %v1968_v53, %v1961_v45  ;;  %3372 = vmatprep.subr.bf16.mxu1 %v3845_v42 }
0x15fd   :  { %v1971_v56 = vsel %vm1970_vm14, %v1969_v50, %v1963_v52 }
0x15fe   :  { %v1973_v5 = vsel %vm1972_vm15, %v1971_v56, %v1965_v57 }
0x15ff   :  { %3271 = vmatmul.mubr.f32.vlgmr.msra.gmra.mrb[20].mxu0 %v1973_v5  ;;  %3374 = vmatpush3.bf16.msra.mxu1 %v3373_v39  ;;  %v2071_v5 = vld [vmem:[%s4946_s12] sm:$0xff] }
0x1600   :  { %2533 = vmatprep.mubr.f32.mxu0 %v3839_v2  ;;  %3375 = vmatprep.subr.bf16.mxu1 %v3845_v42 }
0x1603   :  { %3377 = vmatpush3.bf16.msra.mxu1 %v3376_v62  ;;  %v2070_v62 = vld [vmem:[%s4945_s11 + $0x18] sm:$0xff] }
0x1604   :  { %3378 = vmatprep.subr.bf16.mxu1 %v3845_v42 }
0x1607   :  { %3380 = vmatpush3.bf16.msra.mxu1 %v3379_v34 }
0x1608   :  { %3381 = vmatprep.subr.bf16.mxu1 %v3845_v42 }
0x160b   :  { %3383 = vmatpush3.bf16.msra.mxu1 %v3382_v25 }
0x160c   :  { %3384 = vmatprep.subr.bf16.mxu1 %v3845_v42 }
0x160f   :  { %3386 = vmatpush3.bf16.msra.mxu1 %v3385_v28 }
0x1610   :  { %3387 = vmatprep.subr.bf16.mxu1 %v3845_v42 }
0x1613   :  { %3389 = vmatpush3.bf16.msra.mxu1 %v3388_v4 }
0x1614   :  { %3390 = vmatprep.subr.bf16.mxu1 %v3845_v42 }
0x166d   :  { %v1765_v58 = vpop.permute.xlu1 %1764 }
0x166e   :  { %v1767_v22 = vadd.f32 %v1765_v58, %v1757_v27  ;;  %v2074_v27 = vld [vmem:[%s4946_s12 + $0x18] sm:$0xff] }
0x1670   :  { %3781 = vtanh.f32 %v1767_v22 }
0x167a   :  { %v3782_v59 = vpop.eup %3781 }
0x167b   :  { %1770 = vrot.lane.b32.xlu0 %v3782_v59, %s3843_s24 }
0x16d2   :  { %v2063_v47 = vpop.f32.mrb[20].mxu0 }
0x16d3   :  { %v4453_v63 = vadd.f32 %v3058_v60, %v2063_v47  ;;  %v3272_v38 = vpop.f32.mrb[21].mxu0  ;;  %v2072_v47 = vld [vmem:[%s4946_s12 + $0x8] sm:$0xff] }
0x16d5   :  { %v2098_v54 = vrot.slane %v4453_v63, 2  ;;  %v2094_v7 = vrot.slane %v4453_v63, 1  ;;  %v2108_v0 = vrot.slane %v4453_v63, 5  ;;  %v2102_v8 = vrot.slane %v4453_v63, 3 }
0x16d6   :  { %v2106_v26 = vrot.slane %v4453_v63, 4 }
0x16d7   :  { %2099 = vrot.lane.b32.xlu0 %v2098_v54, %s3843_s24  ;;  %2095 = vrot.lane.b32.xlu1 %v2094_v7, %s3841_s19 }
0x16db   :  { %2109 = vrot.lane.b32.xlu0 %v2108_v0, %s3841_s19  ;;  %2103 = vrot.lane.b32.xlu1 %v2102_v8, %s3842_s1 }
0x16ed   :  { %v1771_v9 = vpop.permute.xlu0 %1770 }
0x16ee   :  { %v1773_v10 = vmul.f32 %v3780_v31, %v1771_v9  ;;  %v1812_v31 = vld [vmem:[%s4941_s7 + $0x70] sm:$0xff] }
0x16ef   :  { %v3391_v37 = vpack.c.bf16 %v1813_v1, %v1812_v31 }
0x16f0   :  { %v1776_v3 = vrot.slane %v1773_v10, 2  ;;  %1781 = vrot.lane.b32.xlu0 %v1773_v10, %s3841_s19 }
0x16f1   :  { %3392 = vmatpush3.bf16.msra.mxu1 %v3391_v37 }
0x16f2   :  { %1777 = vrot.lane.b32.xlu1 %v1776_v3, %s3843_s24 }
0x16f6   :  { %1785 = vrot.lane.b32.xlu1 %v1784_v11, %s3843_s24 }
0x1749   :  { %v2100_v13 = vpop.permute.xlu0 %2099  ;;  %v2096_v61 = vpop.permute.xlu1 %2095 }
0x174a   :  { %v2112_v20 = vsel %vm98_vm0, %v4453_v63, %v2096_v61 }
0x174b   :  { %v2113_v30 = vsel %vm401_vm8, %v2112_v20, %v2100_v13  ;;  %v2067_v20 = vld [vmem:[%s4945_s11] sm:$0xff] }
0x174d   :  { %v2110_v29 = vpop.permute.xlu0 %2109  ;;  %v2104_v33 = vpop.permute.xlu1 %2103 }
0x174e   :  { %v4498_v35 = vsel %vm403_vm9, %v2113_v30, %v2104_v33  ;;  %v4501_v40 = vsel %vm98_vm0, %v2106_v26, %v2110_v29 }
0x174f   :  { %2124 = vrot.lane.b32.xlu1 %v4501_v40, %s3843_s24  ;;  %2122 = vrot.lane.b32.xlu0 %v4498_v35, %s3843_s24  ;;  %v2138_v56 = vsel %vm401_vm8, %v4501_v40, 0.0  ;;  %v2145_v3 = vrot.slane %v4501_v40, 7  ;;  %v2144_v11 = vrot.slane %v4498_v35, 7 }
0x1753   :  { %2134 = vrot.lane.b32.xlu0 %v4498_v35, %s3842_s1 }
0x1757   :  { %2117 = vrot.lane.b32.xlu0 %v4498_v35, %s3841_s19 }
0x1762   :  { %v1782_v44 = vpop.permute.xlu0 %1781 }
0x1764   :  { %v1778_v43 = vpop.permute.xlu1 %1777 }
0x1765   :  { %v1780_v49 = vsel %vm98_vm0, %v4339_v18, %v1778_v43  ;;  %v2073_v18 = vld [vmem:[%s4946_s12 + $0x10] sm:$0xff] }
0x1768   :  { %v1786_v45 = vpop.permute.xlu1 %1785 }
0x1769   :  { %v1788_v52 = vsel %vm98_vm0, %v1782_v44, %v1786_v45 }
0x176a   :  { %v1789_v53 = vmax.f32 %v1780_v49, %v1788_v52  ;;  %v1790_v57 = vadd.f32 %v1788_v52, %v1780_v49 }
0x176c   :  { %v1792_v50 = vmul.f32 0.5, %v1790_v57 }
0x176e   :  { %1794 = vrot.lane.b32.xlu1 %v1792_v50, %s3843_s24 }
0x1772   :  { %2140 = vrot.lane.b32.xlu1 %v2138_v56, %s3842_s1 }
0x1776   :  { %2159 = vperm.xlu1 %3516, %v2071_v5  }
0x177a   :  { %2169 = vperm.xlu1 %3516, %v2073_v18  }
0x177e   :  { %2174 = vperm.xlu1 %3516, %v2074_v27  }
0x17c1   :  { %v2123_v58 = vpop.permute.xlu0 %2122  ;;  %v2125_v22 = vpop.permute.xlu1 %2124 }
0x17c2   :  { %v2126_v59 = vsel %vm401_vm8, %v2123_v58, %v2125_v22 }
0x17c3   :  { %v2128_v60 = vsel %vm98_vm0, 0.0, %v2126_v59 }
0x17c4   :  { %2130 = vrot.lane.b32.xlu0 %v2128_v60, %s3842_s1 }
0x17c5   :  { %v2135_v7 = vpop.permute.xlu0 %2134 }
0x17c6   :  { %v2137_v9 = vsel %vm401_vm8, %v2135_v7, 0.0 }
0x17c8   :  { %2164 = vperm.xlu0 %3522, %v2072_v47  }
0x17c9   :  { %v2118_v8 = vpop.permute.xlu0 %2117 }
0x17ca   :  { %v2120_v12 = vsel %vm98_vm0, 0.0, %v2118_v8 }
0x17e0   :  { %v1795_v38 = vpop.permute.xlu1 %1794 }
0x17e1   :  { %v1797_v54 = vsel %vm401_vm8, %v1789_v53, %v1795_v38 }
0x17e2   :  { %3236 = vmatmul.mubr.f32.vlgmr.msra.gmra.mrb[12].mxu1 %v1797_v54 }
0x17e3   :  { %2260 = vmatprep.mubr.f32.mxu1 %v3839_v2 }
0x17e4   :  { %v2141_v0 = vpop.permute.xlu1 %2140 }
0x17e5   :  { %v2143_v10 = vsel %vm403_vm9, %v2137_v9, %v2141_v0  ;;  %v2150_v15 = vrot.slane %v2141_v0, 6 }
0x17e6   :  { %v2149_v17 = vrot.slane %v2143_v10, 6 }
0x17f5   :  { %v2160_v29 = vpop.permute.xlu1 %2159 }
0x17f9   :  { %v2170_v28 = vpop.permute.xlu1 %2169 }
0x17fd   :  { %v2175_v18 = vpop.permute.xlu1 %2174 }
0x1836   :  { %v2131_v16 = vpop.permute.xlu0 %2130 }
0x1837   :  { %v2133_v6 = vsel %vm403_vm9, %v2120_v12, %v2131_v16  ;;  %v2154_v39 = vsel %vm935_vm12, %v2131_v16, %v2145_v3  ;;  %v2083_v12 = vld [vmem:[%s4948_s14] sm:$0xff] }
0x1838   :  { %v2153_v13 = vsel %vm935_vm12, %v2133_v6, %v2144_v11  ;;  %v2156_v61 = vsel %vm191_vm4, %v2154_v39, %v2150_v15  ;;  %v2085_v15 = vld [vmem:[%s4948_s14 + $0x10] sm:$0xff]  ;;  %v2087_v16 = vld [vmem:[%s4948_s14 + $0x20] sm:$0xff] }
0x1839   :  { %3059 = vmatprep.subr.msk.mxu1 %vm938_vm13, %v2156_v61  ;;  %v2155_v21 = vsel %vm191_vm4, %v2153_v13, %v2149_v17  ;;  %v2089_v17 = vld [vmem:[%s4948_s14 + $0x30] sm:$0xff]  ;;  %vm2926_vm4 = vcmask 1045507  }
0x183a   :  { %3060 = vmatpush1.msk.msra.mxu1 %vm938_vm13, %v2155_v21 }
0x183b   :  { %3061 = vmatmul.mubr.msk.f32.vlgmr.msra.gmra.mrb[14].mxu1 %vm2177_vm1, %v2067_v20  ;;  %3441 = vmatprep.subr.bf16.mxu1 %v3845_v42 }
0x183c   :  { %2266 = vmatprep.mubr.f32.mxu1 %v3839_v2 }
0x183f   :  { %3062 = vmatmul.mubr.msk.f32.gmra.mrb[16].mxu1 %vm2177_vm1, %v2068_v23 }
0x1840   :  { %2272 = vmatprep.mubr.f32.mxu1 %v3839_v2 }
0x1843   :  { %3063 = vmatmul.mubr.msk.f32.gmra.mrb[18].mxu1 %vm2177_vm1, %v2069_v24 }
0x1844   :  { %2278 = vmatprep.mubr.f32.mxu1 %v3839_v2 }
0x1847   :  { %3064 = vmatmul.mubr.msk.f32.gmra.mrb[20].mxu1 %vm2177_vm1, %v2070_v62  ;;  %v2165_v40 = vpop.permute.xlu0 %2164 }
0x18b5   :  { %v4592_v51 = vpop.f32.mrb[12].mxu1 }
0x18b6   :  { %v3237_v26 = vpop.f32.mrb[13].mxu1 }
0x190e   :  { %v2262_v30 = vpop.f32.mrb[14].mxu1 }
0x190f   :  { %v2263_v33 = vadd.f32 %v2262_v30, %v2160_v29  ;;  %v2264_v34 = vpop.f32.mrb[15].mxu1 }
0x1910   :  { %v2265_v35 = vadd.f32 %v2264_v34, %v2160_v29 }
0x1911   :  { %v4594_v14 = vmax.f32 %v2263_v33, 0.0 }
0x1912   :  { %v4596_v36 = vmax.f32 %v2265_v35, 0.0  ;;  %v2268_v25 = vpop.f32.mrb[16].mxu1 }
0x1913   :  { %v2269_v32 = vadd.f32 %v2268_v25, %v2165_v40  ;;  %v2270_v41 = vpop.f32.mrb[17].mxu1 }
0x1914   :  { %v2271_v55 = vadd.f32 %v2270_v41, %v2165_v40  ;;  %v3523_v19 = vpack.i.bf16 %v4596_v36, %v4594_v14  ;;  %v4607_v37 = vsel %vm401_vm8, %v4596_v36, 0.0 }
0x1915   :  { %v4600_v4 = vmax.f32 %v2269_v32, 0.0 }
0x1916   :  { %v4602_v31 = vmax.f32 %v2271_v55, 0.0  ;;  %v2274_v1 = vpop.f32.mrb[18].mxu1  ;;  %3524 = vrot.lane.b32.xlu0 %v3523_v19, %s3843_s24 }
0x1917   :  { %v2275_v43 = vadd.f32 %v2274_v1, %v2170_v28  ;;  %v2276_v44 = vpop.f32.mrb[19].mxu1  ;;  %v3543_v45 = vpack.i.bf16 %v4600_v4, %v4594_v14  ;;  %v3427_v49 = vpack.c.bf16 %v4600_v4, %v4594_v14  ;;  %v2084_v1 = vld [vmem:[%s4948_s14 + $0x8] sm:$0xff] }
0x1918   :  { %v2277_v52 = vadd.f32 %v2276_v44, %v2170_v28  ;;  %v3528_v53 = vpack.i.bf16 %v4602_v31, %v4600_v4  ;;  %v2382_v57 = vsel %vm401_vm8, %v4602_v31, 0.0  ;;  %v3425_v50 = vpack.c.bf16 %v4602_v31, %v4596_v36  ;;  %v2090_v44 = vld [vmem:[%s4948_s14 + $0x38] sm:$0xff] }
0x1919   :  { %v4619_v56 = vmax.f32 %v2275_v43, 0.0  ;;  %v3568_v5 = vpack.i.bf16 %v2382_v57, %v4607_v37  ;;  %v2086_v37 = vld [vmem:[%s4948_s14 + $0x18] sm:$0xff]  ;;  %v2088_v43 = vld [vmem:[%s4948_s14 + $0x28] sm:$0xff] }
0x191a   :  { %v4622_v27 = vmax.f32 %v2277_v52, 0.0  ;;  %v2280_v58 = vpop.f32.mrb[20].mxu1  ;;  %3529 = vrot.lane.b32.xlu1 %v3528_v53, %s3843_s24 }
0x191b   :  { %v2281_v22 = vadd.f32 %v2280_v58, %v2175_v18  ;;  %v2282_v59 = vpop.f32.mrb[21].mxu1 }
0x191c   :  { %v2283_v60 = vadd.f32 %v2282_v59, %v2175_v18  ;;  %v3533_v47 = vpack.i.bf16 %v4622_v27, %v4619_v56  ;;  %v2383_v8 = vsel %vm401_vm8, %v4622_v27, 0.0 }
0x191d   :  { %v4627_v38 = vmax.f32 %v2281_v22, 0.0 }
0x191e   :  { %v4629_v54 = vmax.f32 %v2283_v60, 0.0  ;;  %3534 = vrot.lane.b32.xlu0 %v3533_v47, %s3843_s24 }
0x191f   :  { %v3548_v7 = vpack.i.bf16 %v4627_v38, %v4619_v56  ;;  %v3431_v0 = vpack.c.bf16 %v4627_v38, %v4619_v56  ;;  %v2075_v56 = vld [vmem:[%s4947_s13] sm:$0xff] }
0x1920   :  { %v2384_v9 = vsel %vm401_vm8, %v4629_v54, 0.0  ;;  %v3538_v10 = vpack.i.bf16 %v4629_v54, %v4627_v38  ;;  %v3429_v3 = vpack.c.bf16 %v4629_v54, %v4622_v27  ;;  %v2076_v38 = vld [vmem:[%s4947_s13 + $0x8] sm:$0xff] }
0x1921   :  { %v3578_v11 = vpack.i.bf16 %v2384_v9, %v2383_v8 }
0x1922   :  { %3544 = vrot.lane.b32.xlu0 %v3543_v45, %s3841_s19  ;;  %3539 = vrot.lane.b32.xlu1 %v3538_v10, %s3843_s24 }
0x1926   :  { %3549 = vrot.lane.b32.xlu0 %v3548_v7, %s3841_s19 }
0x192a   :  { %3564 = vrot.lane.b32.xlu0 %v3543_v45, %s3842_s1 }
0x192e   :  { %3574 = vrot.lane.b32.xlu0 %v3548_v7, %s3842_s1 }
0x1932   :  { %2407 = vperm.xlu0 %3522, %v2083_v12  }
0x1936   :  { %2417 = vperm.xlu0 %3522, %v2085_v15  }
0x193a   :  { %2427 = vperm.xlu0 %3522, %v2087_v16  }
0x193e   :  { %2437 = vperm.xlu0 %3522, %v2089_v17  }
0x1988   :  { %v3525_v6 = vpop.permute.xlu0 %3524 }
0x1989   :  { %v3527_v39 = vunpack.i.h.bf16 %v3525_v6  ;;  %v3526_v13 = vunpack.i.l.bf16 %v3525_v6 }
0x198b   :  { %v2333_v23 = vsel %vm401_vm8, %v3526_v13, %v3527_v39 }
0x198c   :  { %v3530_v61 = vpop.permute.xlu1 %3529  ;;  %v2341_v26 = vsel %vm98_vm0, 0.0, %v2333_v23 }
0x198d   :  { %v3532_v20 = vunpack.i.h.bf16 %v3530_v61  ;;  %v3531_v21 = vunpack.i.l.bf16 %v3530_v61 }
0x198f   :  { %v2334_v24 = vsel %vm401_vm8, %v3531_v21, %v3532_v20 }
0x1990   :  { %v3535_v62 = vpop.permute.xlu0 %3534  ;;  %v2342_v29 = vsel %vm98_vm0, 0.0, %v2334_v24 }
0x1991   :  { %v3537_v30 = vunpack.i.h.bf16 %v3535_v62  ;;  %v3536_v33 = vunpack.i.l.bf16 %v3535_v62  ;;  %v3553_v34 = vpack.i.bf16 %v2342_v29, %v2341_v26 }
0x1993   :  { %3554 = vrot.lane.b32.xlu1 %v3553_v34, %s3842_s1  ;;  %v2335_v32 = vsel %vm401_vm8, %v3536_v33, %v3537_v30 }
0x1994   :  { %v3540_v35 = vpop.permute.xlu1 %3539  ;;  %v2343_v28 = vsel %vm98_vm0, 0.0, %v2335_v32  ;;  %v3545_v45 = vpop.permute.xlu0 %3544 }
0x1995   :  { %v3542_v40 = vunpack.i.h.bf16 %v3540_v35  ;;  %v3541_v25 = vunpack.i.l.bf16 %v3540_v35  ;;  %v3547_v52 = vunpack.i.h.bf16 %v3545_v45  ;;  %v3546_v53 = vunpack.i.l.bf16 %v3545_v45 }
0x1997   :  { %v2336_v41 = vsel %vm401_vm8, %v3541_v25, %v3542_v40  ;;  %v2310_v58 = vsel %vm98_vm0, 0.0, %v3547_v52  ;;  %v2309_v22 = vsel %vm98_vm0, 0.0, %v3546_v53 }
0x1998   :  { %v2344_v55 = vsel %vm98_vm0, 0.0, %v2336_v41  ;;  %v3550_v59 = vpop.permute.xlu0 %3549 }
0x1999   :  { %v3558_v19 = vpack.i.bf16 %v2344_v55, %v2343_v28  ;;  %v3552_v9 = vunpack.i.h.bf16 %v3550_v59  ;;  %v3551_v10 = vunpack.i.l.bf16 %v3550_v59  ;;  %v2078_v28 = vld [vmem:[%s4947_s13 + $0x18] sm:$0xff]  ;;  %v2079_v55 = vld [vmem:[%s4947_s13 + $0x20] sm:$0xff] }
0x199b   :  { %3559 = vrot.lane.b32.xlu1 %v3558_v19, %s3842_s1  ;;  %v2312_v16 = vsel %vm98_vm0, 0.0, %v3552_v9  ;;  %v2311_v17 = vsel %vm98_vm0, 0.0, %v3551_v10  ;;  %v2080_v19 = vld [vmem:[%s4947_s13 + $0x28] sm:$0xff] }
0x199c   :  { %v3565_v6 = vpop.permute.xlu0 %3564 }
0x199d   :  { %v3567_v23 = vunpack.i.h.bf16 %v3565_v6  ;;  %v3566_v24 = vunpack.i.l.bf16 %v3565_v6 }
0x199f   :  { %3569 = vrot.lane.b32.xlu1 %v3568_v5, %s3842_s1  ;;  %v2378_v33 = vsel %vm401_vm8, %v3567_v23, 0.0  ;;  %v2377_v34 = vsel %vm401_vm8, %v3566_v24, 0.0 }
0x19a0   :  { %v3575_v26 = vpop.permute.xlu0 %3574 }
0x19a1   :  { %v3577_v35 = vunpack.i.h.bf16 %v3575_v26  ;;  %v3576_v36 = vunpack.i.l.bf16 %v3575_v26 }
0x19a3   :  { %3579 = vrot.lane.b32.xlu1 %v3578_v11, %s3842_s1  ;;  %v2380_v14 = vsel %vm401_vm8, %v3577_v35, 0.0  ;;  %v2379_v4 = vsel %vm401_vm8, %v3576_v36, 0.0 }
0x19a7   :  { %2412 = vperm.xlu1 %3516, %v2084_v1   ;;  %v2081_v1 = vld [vmem:[%s4947_s13 + $0x30] sm:$0xff] }
0x19ab   :  { %2422 = vperm.xlu1 %3516, %v2086_v37   ;;  %v2082_v37 = vld [vmem:[%s4947_s13 + $0x38] sm:$0xff] }
0x19af   :  { %2432 = vperm.xlu1 %3516, %v2088_v43  }
0x19b1   :  { %v2408_v45 = vpop.permute.xlu0 %2407 }
0x19b3   :  { %2442 = vperm.xlu1 %3516, %v2090_v44  }
0x1a05   :  { %v3555_v57 = vpop.permute.xlu1 %3554 }
0x1a06   :  { %v3557_v5 = vunpack.i.h.bf16 %v3555_v57  ;;  %v3556_v18 = vunpack.i.l.bf16 %v3555_v57 }
0x1a08   :  { %v2362_v60 = vsel %vm403_vm9, %v2310_v58, %v3557_v5  ;;  %v2361_v47 = vsel %vm403_vm9, %v2309_v22, %v3556_v18  ;;  %v3417_v7 = vpack.c.bf16 %v3557_v5, %v3556_v18 }
0x1a09   :  { %v3419_v8 = vpack.c.bf16 %v2362_v60, %v2361_v47 }
0x1a0a   :  { %3418 = vmatprep.subr.bf16.mxu0 %v3417_v7 }
0x1a0b   :  { %3420 = vmatpush1.bf16.msra.mxu0 %v3419_v8 }
0x1a0d   :  { %v3560_v11 = vpop.permute.xlu1 %3559 }
0x1a0e   :  { %v3562_v12 = vunpack.i.h.bf16 %v3560_v11  ;;  %v3561_v15 = vunpack.i.l.bf16 %v3560_v11 }
0x1a10   :  { %v2364_v39 = vsel %vm403_vm9, %v2312_v16, %v3562_v12  ;;  %v2363_v13 = vsel %vm403_vm9, %v2311_v17, %v3561_v15  ;;  %v3421_v61 = vpack.c.bf16 %v3562_v12, %v3561_v15 }
0x1a11   :  { %v3423_v20 = vpack.c.bf16 %v2364_v39, %v2363_v13  ;;  %v3570_v21 = vpop.permute.xlu1 %3569 }
0x1a12   :  { %3422 = vmatprep.subr.bf16.mxu0 %v3421_v61  ;;  %v3572_v62 = vunpack.i.h.bf16 %v3570_v21  ;;  %v3571_v29 = vunpack.i.l.bf16 %v3570_v21 }
0x1a13   :  { %3424 = vmatpush1.bf16.msra.mxu0 %v3423_v20 }
0x1a14   :  { %3426 = vmatprep.subr.bf16.mxu0 %v3425_v50  ;;  %v2402_v31 = vsel %vm403_vm9, %v2378_v33, %v3572_v62  ;;  %v2401_v50 = vsel %vm403_vm9, %v2377_v34, %v3571_v29  ;;  %v3433_v40 = vpack.c.bf16 %v3572_v62, %v3571_v29 }
0x1a15   :  { %v3580_v30 = vpop.permute.xlu1 %3579 }
0x1a16   :  { %v3582_v25 = vunpack.i.h.bf16 %v3580_v30  ;;  %v3581_v32 = vunpack.i.l.bf16 %v3580_v30 }
0x1a17   :  { %3428 = vmatpush1.bf16.msra.mxu0 %v3427_v49  ;;  %v3435_v49 = vpack.c.bf16 %v2402_v31, %v2401_v50 }
0x1a18   :  { %3430 = vmatprep.subr.bf16.mxu0 %v3429_v3  ;;  %v2404_v27 = vsel %vm403_vm9, %v2380_v14, %v3582_v25  ;;  %v2403_v54 = vsel %vm403_vm9, %v2379_v4, %v3581_v32  ;;  %v3437_v3 = vpack.c.bf16 %v3582_v25, %v3581_v32 }
0x1a19   :  { %v3439_v41 = vpack.c.bf16 %v2404_v27, %v2403_v54 }
0x1a1b   :  { %3432 = vmatpush1.bf16.msra.mxu0 %v3431_v0  ;;  %v2077_v0 = vld [vmem:[%s4947_s13 + $0x10] sm:$0xff] }
0x1a1c   :  { %3434 = vmatprep.subr.bf16.mxu0 %v3433_v40 }
0x1a1f   :  { %3436 = vmatpush1.bf16.msra.mxu0 %v3435_v49 }
0x1a20   :  { %3438 = vmatprep.subr.bf16.mxu0 %v3437_v3 }
0x1a23   :  { %3440 = vmatpush1.bf16.msra.mxu0 %v3439_v41 }
0x1a26   :  { %3065 = vmatmul.mubr.msk.f32.vlgmr.msra.gmra.mrb[22].mxu0 %vm403_vm9, %v2075_v56  ;;  %v2413_v57 = vpop.permute.xlu1 %2412 }
0x1a27   :  { %2539 = vmatprep.mubr.f32.mxu0 %v3839_v2 }
0x1a2a   :  { %3066 = vmatmul.mubr.msk.f32.gmra.mrb[24].mxu0 %vm403_vm9, %v2076_v38  ;;  %v2423_v9 = vpop.permute.xlu1 %2422 }
0x1a2b   :  { %2545 = vmatprep.mubr.f32.mxu0 %v3839_v2 }
0x1a2e   :  { %3067 = vmatmul.mubr.msk.f32.gmra.mrb[26].mxu0 %vm403_vm9, %v2077_v0  ;;  %v2433_v20 = vpop.permute.xlu1 %2432 }
0x1a2f   :  { %2551 = vmatprep.mubr.f32.mxu0 %v3839_v2 }
0x1a32   :  { %3068 = vmatmul.mubr.msk.f32.gmra.mrb[28].mxu0 %vm403_vm9, %v2078_v28  ;;  %v2443_v36 = vpop.permute.xlu1 %2442 }
0x1a33   :  { %2557 = vmatprep.mubr.f32.mxu0 %v3839_v2 }
0x1a36   :  { %3069 = vmatmul.mubr.msk.f32.gmra.mrb[30].mxu0 %vm403_vm9, %v2079_v55 }
0x1a37   :  { %2563 = vmatprep.mubr.f32.mxu0 %v3839_v2 }
0x1a3a   :  { %3070 = vmatmul.mubr.msk.f32.gmra.mrb[32].mxu0 %vm403_vm9, %v2080_v19 }
0x1a3b   :  { %2569 = vmatprep.mubr.f32.mxu0 %v3839_v2 }
0x1a3e   :  { %3071 = vmatmul.mubr.msk.f32.gmra.mrb[34].mxu0 %vm403_vm9, %v2081_v1 }
0x1a3f   :  { %2575 = vmatprep.mubr.f32.mxu0 %v3839_v2  ;;  %v2418_v2 = vpop.permute.xlu0 %2417 }
0x1a42   :  { %3072 = vmatmul.mubr.msk.f32.gmra.mrb[36].mxu0 %vm403_vm9, %v2082_v37 }
0x1a43   :  { %v2428_v39 = vpop.permute.xlu0 %2427 }
0x1a47   :  { %v2438_v33 = vpop.permute.xlu0 %2437 }
0x1af9   :  { %v2535_v43 = vpop.f32.mrb[22].mxu0 }
0x1afa   :  { %v2537_v44 = vpop.f32.mrb[23].mxu0  ;;  %v2536_v25 = vadd.f32 %v2535_v43, %v2408_v45 }
0x1afb   :  { %v2538_v52 = vadd.f32 %v2537_v44, %v2408_v45 }
0x1afc   :  { %v2582_v54 = vmax.f32 %v2536_v25, 0.0 }
0x1afd   :  { %v2541_v53 = vpop.f32.mrb[24].mxu0  ;;  %v2583_v58 = vmax.f32 %v2538_v52, 0.0 }
0x1afe   :  { %v2543_v5 = vpop.f32.mrb[25].mxu0  ;;  %v2542_v50 = vadd.f32 %v2541_v53, %v2413_v57 }
0x1aff   :  { %v2544_v18 = vadd.f32 %v2543_v5, %v2413_v57 }
0x1b00   :  { %v2584_v4 = vmax.f32 %v2542_v50, 0.0 }
0x1b01   :  { %v2585_v22 = vmax.f32 %v2544_v18, 0.0  ;;  %v2547_v59 = vpop.f32.mrb[26].mxu0 }
0x1b02   :  { %v2549_v60 = vpop.f32.mrb[27].mxu0  ;;  %v3623_v38 = vpack.i.bf16 %v2584_v4, %v2582_v54  ;;  %v2548_v0 = vadd.f32 %v2547_v59, %v2418_v2 }
0x1b03   :  { %v3603_v47 = vpack.i.bf16 %v2585_v22, %v2583_v58  ;;  %v2550_v7 = vadd.f32 %v2549_v60, %v2418_v2 }
0x1b04   :  { %v2586_v37 = vmax.f32 %v2548_v0, 0.0 }
0x1b05   :  { %v2553_v8 = vpop.f32.mrb[28].mxu0  ;;  %3584 = vrot.lane.b32.xlu0 %v3603_v47, %s3842_s1  ;;  %v2587_v12 = vmax.f32 %v2550_v7, 0.0 }
0x1b06   :  { %v2555_v10 = vpop.f32.mrb[29].mxu0  ;;  %v2554_v41 = vadd.f32 %v2553_v8, %v2423_v9 }
0x1b07   :  { %v2556_v11 = vadd.f32 %v2555_v10, %v2423_v9 }
0x1b08   :  { %v2588_v55 = vmax.f32 %v2554_v41, 0.0 }
0x1b09   :  { %v2589_v15 = vmax.f32 %v2556_v11, 0.0  ;;  %v2559_v16 = vpop.f32.mrb[30].mxu0 }
0x1b0a   :  { %v2561_v17 = vpop.f32.mrb[31].mxu0  ;;  %v4758_v3 = vadd.f32 %v2559_v16, %v2428_v39  ;;  %v3628_v44 = vpack.i.bf16 %v2588_v55, %v2586_v37 }
0x1b0b   :  { %v3608_v6 = vpack.i.bf16 %v2589_v15, %v2587_v12  ;;  %v2562_v13 = vadd.f32 %v2561_v17, %v2428_v39 }
0x1b0c   :  { %v2590_v28 = vmax.f32 %v4758_v3, 0.0 }
0x1b0d   :  { %v2565_v61 = vpop.f32.mrb[32].mxu0  ;;  %3589 = vrot.lane.b32.xlu1 %v3608_v6, %s3842_s1  ;;  %v2591_v24 = vmax.f32 %v2562_v13, 0.0  ;;  %v4807_v13 = vld [vmem:[%s4949_s15] sm:$0x3] }
0x1b0e   :  { %v2567_v21 = vpop.f32.mrb[33].mxu0  ;;  %v4756_v49 = vadd.f32 %v2565_v61, %v2433_v20  ;;  %v2783_v61 = vrot.slane %v4807_v13, %v4171_v48 }
0x1b0f   :  { %v2568_v23 = vadd.f32 %v2567_v21, %v2433_v20 }
0x1b10   :  { %v2592_v56 = vmax.f32 %v4756_v49, 0.0  ;;  %3073 = vmatprep.mubr.msk.f32.mxu1 %vm401_vm8, %v2783_v61  ;;  %v2092_v49 = vld [vmem:[#allocation2] sm:$0x1] }
0x1b11   :  { %v2593_v62 = vmax.f32 %v2568_v23, 0.0  ;;  %v2571_v26 = vpop.f32.mrb[34].mxu0 }
0x1b12   :  { %v2573_v29 = vpop.f32.mrb[35].mxu0  ;;  %v3633_v1 = vpack.i.bf16 %v2592_v56, %v2590_v28  ;;  %v2572_v43 = vadd.f32 %v2571_v26, %v2438_v33 }
0x1b13   :  { %v3613_v30 = vpack.i.bf16 %v2593_v62, %v2591_v24  ;;  %v2574_v34 = vadd.f32 %v2573_v29, %v2438_v33  ;;  %v3057_v33 = vld [vmem:[%s4942_s8] ss:$0 sm:$0xff]  ;;  %s3846_s8 = smov [#allocation5]  }
0x1b14   :  { %v2594_v52 = vmax.f32 %v2572_v43, 0.0 }
0x1b15   :  { %v2577_v35 = vpop.f32.mrb[36].mxu0  ;;  %3594 = vrot.lane.b32.xlu0 %v3613_v30, %s3842_s1  ;;  %v2595_v32 = vmax.f32 %v2574_v34, 0.0 }
0x1b16   :  { %v2579_v31 = vpop.f32.mrb[37].mxu0  ;;  %v4766_v19 = vadd.f32 %v2577_v35, %v2443_v36 }
0x1b17   :  { %v2580_v40 = vadd.f32 %v2579_v31, %v2443_v36  ;;  %v4839_v31 = vadd.f32 %v3057_v33, %v4592_v51 }
0x1b18   :  { %v2596_v45 = vmax.f32 %v4766_v19, 0.0 }
0x1b19   :  { %v2597_v14 = vmax.f32 %v2580_v40, 0.0  ;;  %3604 = vrot.lane.b32.xlu0 %v3603_v47, %s3843_s24  ;;  %v2920_v40 = vrot.slane %v4839_v31, %v4171_v48 }
0x1b1a   :  { %v3638_v53 = vpack.i.bf16 %v2596_v45, %v2594_v52 }
0x1b1b   :  { %v3618_v27 = vpack.i.bf16 %v2597_v14, %v2595_v32  ;;  %v2921_v25 = vmul.f32 %v2920_v40, %v4453_v63  ;;  %v2861_v14 = vrot.slane %v4839_v31, %v4166_v46 }
0x1b1d   :  { %3599 = vrot.lane.b32.xlu1 %v3618_v27, %s3842_s1  ;;  %3614 = vrot.lane.b32.xlu0 %v3613_v30, %s3843_s24  ;;  %v2923_v32 = vsel %vm2922_vm2, %v2921_v25, 0.0  ;;  %v2862_v51 = vmul.f32 %v2861_v14, %v4453_v63 }
0x1b21   :  { %3609 = vrot.lane.b32.xlu1 %v3608_v6, %s3843_s24  ;;  %3624 = vrot.lane.b32.xlu0 %v3623_v38, %s3843_s24 }
0x1b25   :  { %3619 = vrot.lane.b32.xlu1 %v3618_v27, %s3843_s24  ;;  %3634 = vrot.lane.b32.xlu0 %v3633_v1, %s3843_s24 }
0x1b29   :  { %3629 = vrot.lane.b32.xlu1 %v3628_v44, %s3843_s24  ;;  %3644 = vrot.lane.b32.xlu0 %v3623_v38, %s3842_s1 }
0x1b2d   :  { %3639 = vrot.lane.b32.xlu1 %v3638_v53, %s3843_s24  ;;  %3649 = vrot.lane.b32.xlu0 %v3628_v44, %s3842_s1 }
0x1b31   :  { %3654 = vrot.lane.b32.xlu0 %v3633_v1, %s3842_s1 }
0x1b35   :  { %3659 = vrot.lane.b32.xlu0 %v3638_v53, %s3842_s1 }
0x1b77   :  { %v3585_v57 = vpop.permute.xlu0 %3584 }
0x1b78   :  { %3664 = vrot.lane.b32.xlu1 %v3585_v57, %s3843_s24 }
0x1b7f   :  { %v3590_v5 = vpop.permute.xlu1 %3589 }
0x1b80   :  { %3669 = vrot.lane.b32.xlu1 %v3590_v5, %s3843_s24 }
0x1b87   :  { %v3595_v18 = vpop.permute.xlu0 %3594 }
0x1b88   :  { %3674 = vrot.lane.b32.xlu1 %v3595_v18, %s3843_s24 }
0x1b8b   :  { %v3605_v58 = vpop.permute.xlu0 %3604 }
0x1b8c   :  { %3684 = vrot.lane.b32.xlu0 %v3605_v58, %s3843_s24 }
0x1b8f   :  { %v3600_v22 = vpop.permute.xlu1 %3599  ;;  %v3615_v59 = vpop.permute.xlu0 %3614 }
0x1b90   :  { %3679 = vrot.lane.b32.xlu1 %v3600_v22, %s3843_s24  ;;  %3694 = vrot.lane.b32.xlu0 %v3615_v59, %s3843_s24 }
0x1b93   :  { %v3610_v60 = vpop.permute.xlu1 %3609  ;;  %v4781_v47 = vpop.permute.xlu0 %3624 }
0x1b94   :  { %v3627_v2 = vunpack.i.h.bf16 %v4781_v47  ;;  %v3626_v7 = vunpack.i.l.bf16 %v4781_v47  ;;  %3689 = vrot.lane.b32.xlu1 %v3610_v60, %s3843_s24 }
0x1b96   :  { %v2743_v8 = vsel %vm98_vm0, %v2584_v4, %v3627_v2  ;;  %v2742_v9 = vsel %vm98_vm0, %v2582_v54, %v3626_v7  ;;  %v2864_v4 = vsel %vm2863_vm3, %v2862_v51, 0.0 }
0x1b97   :  { %v3442_v10 = vpack.c.bf16 %v2743_v8, %v2742_v9  ;;  %v3620_v11 = vpop.permute.xlu1 %3619  ;;  %v4794_v12 = vpop.permute.xlu0 %3634 }
0x1b98   :  { %v3637_v16 = vunpack.i.h.bf16 %v4794_v12  ;;  %v3636_v17 = vunpack.i.l.bf16 %v4794_v12  ;;  %3699 = vrot.lane.b32.xlu1 %v3620_v11, %s3843_s24 }
0x1b99   :  { %3443 = vmatpush1.bf16.msra.mxu1 %v3442_v10 }
0x1b9a   :  { %3444 = vmatprep.subr.bf16.mxu1 %v3845_v42  ;;  %v2747_v62 = vsel %vm98_vm0, %v2592_v56, %v3637_v16  ;;  %v2746_v26 = vsel %vm98_vm0, %v2590_v28, %v3636_v17 }
0x1b9b   :  { %v4797_v15 = vpop.permute.xlu1 %3629  ;;  %v3448_v34 = vpack.c.bf16 %v2747_v62, %v2746_v26  ;;  %v3645_v48 = vpop.permute.xlu0 %3644 }
0x1b9c   :  { %v3632_v6 = vunpack.i.h.bf16 %v4797_v15  ;;  %v3631_v39 = vunpack.i.l.bf16 %v4797_v15  ;;  %v3647_v54 = vunpack.i.h.bf16 %v3645_v48  ;;  %v3646_v3 = vunpack.i.l.bf16 %v3645_v48 }
0x1b9e   :  { %v2745_v20 = vsel %vm98_vm0, %v2588_v55, %v3632_v6  ;;  %v2744_v21 = vsel %vm98_vm0, %v2586_v37, %v3631_v39 }
0x1b9f   :  { %v3445_v23 = vpack.c.bf16 %v2745_v20, %v2744_v21  ;;  %v4817_v24 = vpop.permute.xlu1 %3639  ;;  %v3650_v55 = vpop.permute.xlu0 %3649 }
0x1ba0   :  { %v3642_v29 = vunpack.i.h.bf16 %v4817_v24  ;;  %v3641_v30 = vunpack.i.l.bf16 %v4817_v24  ;;  %v3652_v1 = vunpack.i.h.bf16 %v3650_v55  ;;  %v3651_v37 = vunpack.i.l.bf16 %v3650_v55 }
0x1ba1   :  { %3446 = vmatpush1.bf16.msra.mxu1 %v3445_v23 }
0x1ba2   :  { %3447 = vmatprep.subr.bf16.mxu1 %v3845_v42  ;;  %v2749_v35 = vsel %vm98_vm0, %v2596_v45, %v3642_v29  ;;  %v2748_v36 = vsel %vm98_vm0, %v2594_v52, %v3641_v30 }
0x1ba3   :  { %v3451_v50 = vpack.c.bf16 %v2749_v35, %v2748_v36  ;;  %v3655_v53 = vpop.permute.xlu0 %3654 }
0x1ba4   :  { %v3657_v18 = vunpack.i.h.bf16 %v3655_v53  ;;  %v3656_v58 = vunpack.i.l.bf16 %v3655_v53 }
0x1ba5   :  { %3449 = vmatpush1.bf16.msra.mxu1 %v3448_v34 }
0x1ba6   :  { %3450 = vmatprep.subr.bf16.mxu1 %v3845_v42 }
0x1ba7   :  { %v3660_v60 = vpop.permute.xlu0 %3659 }
0x1ba8   :  { %v3662_v61 = vunpack.i.h.bf16 %v3660_v60  ;;  %v3661_v20 = vunpack.i.l.bf16 %v3660_v60 }
0x1ba9   :  { %3452 = vmatpush1.bf16.msra.mxu1 %v3451_v50 }
0x1baa   :  { %3453 = vmatprep.subr.bf16.mxu1 %v3845_v42 }
0x1baf   :  { %2924 = vadd.xlane.f32.xlu0 %v2923_v32 }
0x1bbc   :  { %2865 = vadd.xlane.f32.xlu1 %v2864_v4 }
0x1bc5   :  { %2768 = vperm.xlu0 %3522, %v2092_v49  }
0x1bea   :  { %v3665_v27 = vpop.permute.xlu1 %3664 }
0x1beb   :  { %v3667_v41 = vunpack.i.h.bf16 %v3665_v27  ;;  %v3666_v56 = vunpack.i.l.bf16 %v3665_v27 }
0x1bed   :  { %v2750_v38 = vsel %vm98_vm0, %v3646_v3, %v3666_v56  ;;  %v2751_v0 = vsel %vm98_vm0, %v3647_v54, %v3667_v41 }
0x1bee   :  { %v3454_v28 = vpack.c.bf16 %v2751_v0, %v2750_v38 }
0x1bf0   :  { %3455 = vmatpush1.bf16.msra.mxu1 %v3454_v28 }
0x1bf1   :  { %3456 = vmatprep.subr.bf16.mxu1 %v3845_v42 }
0x1bf2   :  { %v3670_v19 = vpop.permute.xlu1 %3669 }
0x1bf3   :  { %v3672_v43 = vunpack.i.h.bf16 %v3670_v19  ;;  %v3671_v44 = vunpack.i.l.bf16 %v3670_v19 }
0x1bf5   :  { %v2752_v45 = vsel %vm98_vm0, %v3651_v37, %v3671_v44  ;;  %v2753_v52 = vsel %vm98_vm0, %v3652_v1, %v3672_v43 }
0x1bf6   :  { %v3457_v57 = vpack.c.bf16 %v2753_v52, %v2752_v45 }
0x1bf8   :  { %3458 = vmatpush1.bf16.msra.mxu1 %v3457_v57 }
0x1bf9   :  { %3459 = vmatprep.subr.bf16.mxu1 %v3845_v42 }
0x1bfa   :  { %v3675_v5 = vpop.permute.xlu1 %3674 }
0x1bfb   :  { %v3677_v22 = vunpack.i.h.bf16 %v3675_v5  ;;  %v3676_v59 = vunpack.i.l.bf16 %v3675_v5 }
0x1bfd   :  { %v2754_v8 = vsel %vm98_vm0, %v3656_v58, %v3676_v59  ;;  %v2755_v9 = vsel %vm98_vm0, %v3657_v18, %v3677_v22 }
0x1bfe   :  { %v3460_v10 = vpack.c.bf16 %v2755_v9, %v2754_v8  ;;  %v3685_v11 = vpop.permute.xlu0 %3684 }
0x1bff   :  { %v3687_v23 = vunpack.i.h.bf16 %v3685_v11  ;;  %v3686_v62 = vunpack.i.l.bf16 %v3685_v11 }
0x1c00   :  { %3461 = vmatpush1.bf16.msra.mxu1 %v3460_v10 }
0x1c01   :  { %3462 = vmatprep.subr.bf16.mxu1 %v3845_v42  ;;  %v2758_v40 = vsel %vm98_vm0, %v3626_v7, %v3686_v62  ;;  %v2759_v25 = vsel %vm98_vm0, %v3627_v2, %v3687_v23 }
0x1c02   :  { %v3680_v21 = vpop.permute.xlu1 %3679  ;;  %v3695_v51 = vpop.permute.xlu0 %3694  ;;  %v3466_v4 = vpack.c.bf16 %v2759_v25, %v2758_v40 }
0x1c03   :  { %v3682_v26 = vunpack.i.h.bf16 %v3680_v21  ;;  %v3681_v33 = vunpack.i.l.bf16 %v3680_v21  ;;  %v3697_v49 = vunpack.i.h.bf16 %v3695_v51  ;;  %v3696_v48 = vunpack.i.l.bf16 %v3695_v51 }
0x1c05   :  { %v2756_v34 = vsel %vm98_vm0, %v3661_v20, %v3681_v33  ;;  %v2757_v35 = vsel %vm98_vm0, %v3662_v61, %v3682_v26  ;;  %v2762_v54 = vsel %vm98_vm0, %v3636_v17, %v3696_v48  ;;  %v2763_v3 = vsel %vm98_vm0, %v3637_v16, %v3697_v49 }
0x1c06   :  { %v3463_v36 = vpack.c.bf16 %v2757_v35, %v2756_v34  ;;  %v3690_v50 = vpop.permute.xlu1 %3689  ;;  %v3472_v15 = vpack.c.bf16 %v2763_v3, %v2762_v54  ;;  %v2779_v16 = vrot.slane %v4807_v13, %v4166_v46 }
0x1c07   :  { %v3692_v32 = vunpack.i.h.bf16 %v3690_v50  ;;  %v3691_v14 = vunpack.i.l.bf16 %v3690_v50 }
0x1c08   :  { %3464 = vmatpush1.bf16.msra.mxu1 %v3463_v36 }
0x1c09   :  { %3465 = vmatprep.subr.bf16.mxu1 %v3845_v42  ;;  %v2761_v27 = vsel %vm98_vm0, %v3632_v6, %v3692_v32  ;;  %v2760_v7 = vsel %vm98_vm0, %v3631_v39, %v3691_v14 }
0x1c0a   :  { %v3700_v47 = vpop.permute.xlu1 %3699  ;;  %v3469_v2 = vpack.c.bf16 %v2761_v27, %v2760_v7 }
0x1c0b   :  { %v3702_v41 = vunpack.i.h.bf16 %v3700_v47  ;;  %v3701_v56 = vunpack.i.l.bf16 %v3700_v47 }
0x1c0c   :  { %3467 = vmatpush1.bf16.msra.mxu1 %v3466_v4 }
0x1c0d   :  { %3468 = vmatprep.subr.bf16.mxu1 %v3845_v42  ;;  %v2765_v6 = vsel %vm98_vm0, %v3642_v29, %v3702_v41  ;;  %v2764_v39 = vsel %vm98_vm0, %v3641_v30, %v3701_v56  ;;  %vm2912_vm0 = vcmask 253952  }
0x1c0e   :  { %v3475_v12 = vpack.c.bf16 %v2765_v6, %v2764_v39 }
0x1c10   :  { %3470 = vmatpush1.bf16.msra.mxu1 %v3469_v2 }
0x1c11   :  { %3471 = vmatprep.subr.bf16.mxu1 %v3845_v42 }
0x1c14   :  { %3473 = vmatpush1.bf16.msra.mxu1 %v3472_v15 }
0x1c15   :  { %3474 = vmatprep.subr.bf16.mxu1 %v3845_v42 }
0x1c18   :  { %3476 = vmatpush1.bf16.msra.mxu1 %v3475_v12 }
0x1c1b   :  { %2852 = vmatmul.mubr.f32.vlgmr.msra.gmra.mrb[22].mxu1 %v2779_v16 }
0x1c3c   :  { %v2925_v17 = vpop.xlane.xlu0 %2924 }
0x1c3d   :  { %v2927_v38 = vsel %vm2926_vm4, %v2925_v17, -inf }
0x1c3e   :  { %v2928_v0 = vrot.slane %v2927_v38, 4 }
0x1c40   :  { %v2929_v28 = vmax.f32 %v2927_v38, %v2928_v0 }
0x1c42   :  { %v2930_v55 = vrot.slane %v2929_v28, 2 }
0x1c44   :  { %v2931_v29 = vmax.f32 %v2929_v28, %v2930_v55  ;;  %v2769_v28 = vpop.permute.xlu0 %2768 }
0x1c45   :  { %v2774_v55 = vrot.slane %v2769_v28, %v4166_v46 }
0x1c46   :  { %v2932_v19 = vrot.slane %v2931_v29, 1 }
0x1c48   :  { %v2933_v24 = vmax.f32 %v2931_v29, %v2932_v19 }
0x1c49   :  { %v2866_v1 = vpop.xlane.xlu1 %2865 }
0x1c4a   :  { %v2934_v30 = vsub.f32 %v2925_v17, %v2933_v24  ;;  %v2867_v37 = vsel %vm938_vm13, %v2866_v1, -inf }
0x1c4b   :  { %v2868_v42 = vrot.slane %v2867_v37, 4 }
0x1c4c   :  { %v2935_v43 = vmul.f32 1.442695, %v2934_v30 }
0x1c4d   :  { %v2869_v44 = vmax.f32 %v2867_v37, %v2868_v42 }
0x1c4e   :  { %3783 = vpow2.f32 %v2935_v43 }
0x1c4f   :  { %v2870_v13 = vrot.slane %v2869_v44, 2 }
0x1c51   :  { %v2871_v45 = vmax.f32 %v2869_v44, %v2870_v13 }
0x1c53   :  { %v2872_v52 = vrot.slane %v2871_v45, 1 }
0x1c55   :  { %v2873_v53 = vmax.f32 %v2871_v45, %v2872_v52 }
0x1c57   :  { %v2874_v57 = vsub.f32 %v2866_v1, %v2873_v53 }
0x1c58   :  { %v3784_v5 = vpop.eup %3783 }
0x1c59   :  { %v2938_v18 = vrot.slane %v3784_v5, 3  ;;  %v2875_v58 = vmul.f32 1.442695, %v2874_v57 }
0x1c5b   :  { %v2940_v22 = vsel %vm938_vm13, %v2938_v18, 0.0  ;;  %3785 = vpow2.f32 %v2875_v58 }
0x1c5c   :  { %v2941_v59 = vrot.slane %v2940_v22, 4 }
0x1c5e   :  { %v2942_v60 = vadd.f32 %v2941_v59, %v2940_v22 }
0x1c60   :  { %v2943_v8 = vrot.slane %v2942_v60, 2 }
0x1c62   :  { %v2944_v9 = vadd.f32 %v2943_v8, %v2942_v60 }
0x1c64   :  { %v2945_v10 = vrot.slane %v2944_v9, 1 }
0x1c65   :  { %v3786_v11 = vpop.eup %3785 }
0x1c66   :  { %v2946_v61 = vadd.f32 %v2945_v10, %v2944_v9  ;;  %v2877_v20 = vsel %vm938_vm13, %v3786_v11, 0.0 }
0x1c67   :  { %v2878_v21 = vrot.slane %v2877_v20, 4 }
0x1c68   :  { %3787 = vrcp.f32 %v2946_v61 }
0x1c69   :  { %v2879_v23 = vadd.f32 %v2878_v21, %v2877_v20 }
0x1c6b   :  { %v2880_v62 = vrot.slane %v2879_v23, 2 }
0x1c6d   :  { %v2881_v26 = vadd.f32 %v2880_v62, %v2879_v23 }
0x1c6f   :  { %v2882_v33 = vrot.slane %v2881_v26, 1 }
0x1c71   :  { %v2883_v36 = vadd.f32 %v2882_v33, %v2881_v26 }
0x1c72   :  { %v3788_v34 = vpop.eup %3787 }
0x1c73   :  { %v2948_v35 = vmul.f32 %v3788_v34, %v3784_v5  ;;  %3789 = vrcp.f32 %v2883_v36 }
0x1c75   :  { %v2949_v50 = vmul.f32 %v2948_v35, %v4453_v63 }
0x1c77   :  { %v2951_v40 = vrot.slane %v2949_v50, 3 }
0x1c79   :  { %v2953_v25 = vsel %vm2863_vm3, %v2951_v40, 0.0 }
0x1c7a   :  { %v2954_v32 = vrot.slane %v2953_v25, 4 }
0x1c7c   :  { %v2955_v14 = vadd.f32 %v2954_v32, %v2953_v25 }
0x1c7d   :  { %v3790_v49 = vpop.eup %3789 }
0x1c7e   :  { %v2956_v51 = vrot.slane %v2955_v14, 2  ;;  %v2885_v27 = vmul.f32 %v3790_v49, %v3786_v11 }
0x1c80   :  { %v2957_v4 = vadd.f32 %v2956_v51, %v2955_v14  ;;  %v2886_v54 = vmul.f32 %v2885_v27, %v4453_v63 }
0x1c82   :  { %v2958_v48 = vrot.slane %v2957_v4, 1  ;;  %v2887_v41 = vsel %vm2863_vm3, %v2886_v54, 0.0 }
0x1c83   :  { %v2888_v56 = vrot.slane %v2887_v41, 4 }
0x1c84   :  { %v2959_v7 = vadd.f32 %v2958_v48, %v2957_v4 }
0x1c85   :  { %v2889_v15 = vadd.f32 %v2888_v56, %v2887_v41 }
0x1c86   :  { %v2977_v47 = vsub.f32 %v2959_v7, %v4839_v31  ;;  %v2960_v13 = vsub.f32 %v4453_v63, %v2959_v7 }
0x1c87   :  { %v2890_v6 = vrot.slane %v2889_v15, 2 }
0x1c88   :  { %v2978_v2 = vmul.f32 %v2977_v47, %v2977_v47  ;;  %v2961_v45 = vmul.f32 %v2960_v13, %v2960_v13 }
0x1c89   :  { %v2891_v39 = vadd.f32 %v2890_v6, %v2889_v15 }
0x1c8a   :  { %v2980_v3 = vrot.slane %v2978_v2, 1  ;;  %v2962_v52 = vsel %vm2922_vm2, %v2961_v45, 0.0 }
0x1c8b   :  { %v2892_v12 = vrot.slane %v2891_v39, 1 }
0x1c8c   :  { %2981 = vrot.lane.b32.xlu1 %v2980_v3, %s3841_s19  ;;  %s3016_s19 = sshll.u32 %s3846_s8, 4  ;;  %s3017_s19 = int_to_ptr.vmem [resolvable:$true] %s3016_s19 }
0x1c8d   :  { %v2893_v16 = vadd.f32 %v2892_v12, %v2891_v39  ;;  %s3795_s30 = scalar_lea.vmem %s3017_s19, 32  ;;  %p3796_p1 = scmp.lt.s32.totalorder %s3017_s19, %s3017_s19 }
0x1c8f   :  { %v2894_v17 = vsub.f32 %v4453_v63, %v2893_v16  ;;  %v2909_v29 = vsub.f32 %v2893_v16, %v4839_v31 }
0x1c91   :  { %v2895_v38 = vmul.f32 %v2894_v17, %v2894_v17  ;;  %v2910_v37 = vmul.f32 %v2909_v29, %v2909_v29 }
0x1c93   :  { %v2896_v0 = vsel %vm2863_vm3, %v2895_v38, 0.0 }
0x1cb0   :  { %2897 = vadd.xlane.f32.xlu1 %v2896_v0 }
0x1cee   :  { %v2853_v19 = vpop.f32.mrb[22].mxu1 }
0x1cef   :  { %v2854_v24 = vadd.f32 %v2853_v19, %v2774_v55  ;;  %v2855_v1 = vpop.f32.mrb[23].mxu1 }
0x1cf1   :  { %v2857_v30 = vmax.f32 %v2854_v24, 0.0 }
0x1cf3   :  { %v2911_v42 = vmul.f32 %v2910_v37, %v2857_v30 }
0x1cf5   :  { %v2913_v46 = vsel %vm2912_vm0, %v2911_v42, 0.0 }
0x1cfe   :  { %v2982_v43 = vpop.permute.xlu1 %2981 }
0x1cff   :  { %v2984_v44 = vmul.f32 %v2982_v43, %v2857_v30 }
0x1d01   :  { %2986 = vrot.lane.b32.xlu0 %v2984_v44, %s3842_s1  ;;  %s3791_s1 = scalar_lea.vmem %s3017_s19, 16 }
0x1d02   :  { %p3792_p0 = scmp.ne.s32.totalorder %s3017_s19, %s3791_s1  ;;  %p3797_p2 = scmp.lt.s32.totalorder %s3795_s30, %s3791_s1 }
0x1d04   :  { %p3798_p3 = por %p3797_p2, %p3796_p1 }
0x1d06   :  { %p3799_p4 = pnand %p3798_p3, %p3792_p0 }
0x1d20   :  { %2963 = vadd.xlane.f32.xlu0 %v2962_v52 }
0x1d24   :  { %2914 = vadd.xlane.f32.xlu0 %v2913_v46 }
0x1d3d   :  { %v2898_v57 = vpop.xlane.xlu1 %2897 }
0x1d3e   :  { %v2899_v5 = vsel %vm938_vm13, %v2898_v57, 0.0 }
0x1d3f   :  { %v2900_v18 = vrot.slane %v2899_v5, 4 }
0x1d41   :  { %v2901_v58 = vadd.f32 %v2900_v18, %v2899_v5 }
0x1d43   :  { %v2902_v22 = vrot.slane %v2901_v58, 2 }
0x1d45   :  { %v2903_v8 = vadd.f32 %v2902_v22, %v2901_v58 }
0x1d47   :  { %v2904_v11 = vrot.slane %v2903_v8, 1 }
0x1d49   :  { %v2905_v21 = vadd.f32 %v2904_v11, %v2903_v8 }
0x1d4b   :  { %v2907_v26 = vmul.f32 0.33333334, %v2905_v21 }
0x1d73   :  { %v2987_v31 = vpop.permute.xlu0 %2986 }
0x1d74   :  { %v2989_v53 = vsel %vm2912_vm0, %v2987_v31, 0.0 }
0x1d75   :  { %2990 = vadd.xlane.f32.xlu1 %v2989_v53 }
0x1dad   :  { %v2964_v59 = vpop.xlane.xlu0 %2963 }
0x1dae   :  { %v2966_v60 = vrot.slane %v2964_v59, 3 }
0x1db0   :  { %v2968_v63 = vsel %vm938_vm13, %v2966_v60, 0.0 }
0x1db1   :  { %v2969_v9 = vrot.slane %v2968_v63, 4 }
0x1db3   :  { %v2970_v10 = vadd.f32 %v2969_v9, %v2968_v63 }
0x1db5   :  { %v2971_v61 = vrot.slane %v2970_v10, 2 }
0x1db7   :  { %v2972_v20 = vadd.f32 %v2971_v61, %v2970_v10 }
0x1db9   :  { %v2973_v23 = vrot.slane %v2972_v20, 1 }
0x1dbb   :  { %v2974_v62 = vadd.f32 %v2973_v23, %v2972_v20 }
0x1dbd   :  { %v2975_v33 = vmul.f32 0.33333334, %v2974_v62 }
0x1dbf   :  { %v2976_v34 = vadd.f32 %v2975_v33, %v2907_v26 }
0x1dc1   :  { %v2997_v35 = vmul.f32 0.5, %v2976_v34 }
0x1dc3   :  { %2999 = vst.msk [vmem:[#allocation5] sm:$0x1] %vm2998_vm5, %v2997_v35 }
0x1dc4   :  { %3802 = shalt.err (!%p3799_p4)
}
0x1dc5   :  { %s3803_s10 = scalar_lea.hbm %s4952_s18, 16 }
0x1dc6   :  { %p3804_p5 = scmp.ne.s32.totalorder %s4952_s18, %s3803_s10  ;;  %p3807_p6 = scmp.lt.u32.totalorder %s3803_s10, %s4952_s18 }
0x1dc8   :  { %p3809_p7 = pnand %p3807_p6, %p3804_p5 }
0x1dca   :  { %3812 = shalt.err (!%p3809_p7)
}
0x1dcb   :  { %3019 = dma.vmem_to_hbm [thread:$0]  %s3017_s19, 16, %s4952_s18, [#allocation6]   ;;  %v2915_v36 = vpop.xlane.xlu0 %2914  ;;  %vm2993_vm6 = vcmask 7168   ;;  %vm2995_vm7 = vcmask 8192  }
0x1dcc   :  { %s3847_s20 = smov [#allocation3]   ;;  %v2916_v40 = vsub.f32 0.0, %v2915_v36 }
0x1dcd   :  { %s3006_s21 = sshll.u32 %s3847_s20, 4  ;;  %s3007_s21 = int_to_ptr.vmem [resolvable:$true] %s3006_s21 }
0x1dce   :  { %s3813_s4 = scalar_lea.vmem %s3007_s21, 16  ;;  %s3817_s11 = scalar_lea.vmem %s3007_s21, 32 }
0x1dcf   :  { %p3814_p8 = scmp.ne.s32.totalorder %s3007_s21, %s3813_s4  ;;  %p3818_p9 = scmp.lt.s32.totalorder %s3007_s21, %s3007_s21 }
0x1dd0   :  { %p3819_p10 = scmp.lt.s32.totalorder %s3817_s11, %s3813_s4 }
0x1dd2   :  { %p3820_p11 = por %p3819_p10, %p3818_p9 }
0x1dd4   :  { %p3821_p12 = pnand %p3820_p11, %p3814_p8 }
0x1e02   :  { %v2991_v50 = vpop.xlane.xlu1 %2990 }
0x1e03   :  { %v2992_v25 = vsub.f32 0.0, %v2991_v50 }
0x1e05   :  { %v2994_v32 = vsel %vm2993_vm6, %v2916_v40, %v2992_v25 }
0x1e06   :  { %2996 = vst.msk [vmem:[#allocation3] sm:$0x1] %vm2995_vm7, %v2994_v32 }
0x1e07   :  { %3824 = shalt.err (!%p3821_p12)
}
0x1e08   :  { %s3825_s23 = scalar_lea.hbm %s4951_s17, 16 }
0x1e09   :  { %p3826_p13 = scmp.ne.s32.totalorder %s4951_s17, %s3825_s23  ;;  %p3829_p0 = scmp.lt.u32.totalorder %s3825_s23, %s4951_s17 }
0x1e0b   :  { %p3831_p1 = pnand %p3829_p0, %p3826_p13 }
0x1e0d   :  { %3834 = shalt.err (!%p3831_p1)
}
0x1e0e   :  { %3009 = dma.vmem_to_hbm [thread:$0]  %s3007_s21, 16, %s4951_s17, [#allocation4]  }
0x1e0f   :  { %3835 = dma.done.wait [#allocation4], 16  }
0x1e10   :  { %3836 = vsyncadd [#allocation4], 4294967280 }
0x1e11   :  { %3837 = dma.done.wait [#allocation6], 16  }
0x1e12   :  { %3838 = vsyncadd [#allocation6], 4294967280 }
0x1e13   :  { %3026 = vsyncpa [#allocation4], 1 }
0x1e14   :  { %3027 = vsyncpa [#allocation6], 1 }

</bundles_post_ra>
